<compile_context>
chip_gen: v7x
topology: tpu7x:2x2x1
jax: 0.10.0
libtpu: 0.0.40
codegen_flags: <defaults>
</compile_context>

<pallas_src>
import functools
import math

import jax
import jax.numpy as jnp
from jax.experimental import pallas as pl
from jax.experimental.pallas import tpu as pltpu

COMPUTE_DT = jnp.bfloat16        # storage / MXU-input dtype; accumulation is f32
F_CHUNK = 512                    # MLP intermediate chunk (keeps live f32 gelu tile small)
_VMEM_LIMIT = 64 * 1024 * 1024   # scoped VMEM: > v5e 16MiB default, <= v7x 64MiB physical

_COMPILER_PARAMS = pltpu.CompilerParams(
    dimension_semantics=("parallel",),
    vmem_limit_bytes=_VMEM_LIMIT,
)


# ---------------------------------------------------------------------------
# Grid-invariant operands: single-buffer them (pl.Buffered(1)) when supported.
# ---------------------------------------------------------------------------
def _probe_buffered_single():
    """Compile+run a trivial kernel using pipeline_mode=pl.Buffered(1)."""
    try:
        spec = pl.BlockSpec((8, 128), lambda i: (0, 0), pipeline_mode=pl.Buffered(1))

        def _k(x_ref, o_ref):
            o_ref[...] = x_ref[...] + 1.0

        out = pl.pallas_call(
            _k,
            out_shape=jax.ShapeDtypeStruct((8, 128), jnp.float32),
            grid=(1,),
            in_specs=[spec],
            out_specs=pl.BlockSpec((8, 128), lambda i: (0, 0)),
        )(jnp.zeros((8, 128), jnp.float32))
        jax.block_until_ready(out)
        return True
    except Exception:
        return False


_SINGLE_BUFFER_OK = _probe_buffered_single()


def _const_spec(block_shape):
    """BlockSpec for a grid-invariant operand (constant index_map, single buffer)."""
    n = len(block_shape)
    index_map = lambda i: (0,) * n
    if _SINGLE_BUFFER_OK:
        return pl.BlockSpec(block_shape, index_map, pipeline_mode=pl.Buffered(1))
    return pl.BlockSpec(block_shape, index_map)


# ---------------------------------------------------------------------------
# Pallas kernels
# ---------------------------------------------------------------------------
def _patch_embed_kernel(x_ref, w_ref, o_ref):
    """Patch-embedding conv (kernel=stride=patch, bias-free) as im2col matmul."""
    y = jnp.dot(x_ref[0], w_ref[...], preferred_element_type=jnp.float32)
    o_ref[0] = y.astype(o_ref.dtype)


def _pos_ln_kernel(x_ref, pos_ref, g_ref, b_ref, o_ref, *, eps):
    """Fused (embeddings + position_embedding) -> pre-layernorm, per batch."""
    x = x_ref[0].astype(jnp.float32) + pos_ref[0].astype(jnp.float32)     # (S, D)
    mu = jnp.mean(x, axis=-1, keepdims=True)
    xc = x - mu
    var = jnp.mean(xc * xc, axis=-1, keepdims=True)
    y = xc * jax.lax.rsqrt(var + eps) * g_ref[...] + b_ref[...]
    o_ref[0] = y.astype(o_ref.dtype)


def _attn_block_kernel(h_ref, g_ref, b_ref, wqkv_ref, bqkv_ref, wo_ref, bo_ref,
                       o_ref, *, n_heads, eps):
    """Fused attention block for one batch element:
       out = h + Wo(MHA(LN1(h))) + bo ; attn scale pre-folded into Wq/bq.

    All matmuls are bf16 on the MXU with f32 accumulation; softmax stats in f32.
    The per-head out-projection is accumulated directly (no concatenate)."""
    x = h_ref[0].astype(jnp.float32)                                      # (S, D)
    D = x.shape[-1]
    Dh = D // n_heads

    # LN1 (f32 stats)
    mu = jnp.mean(x, axis=-1, keepdims=True)
    xc = x - mu
    var = jnp.mean(xc * xc, axis=-1, keepdims=True)
    xn = xc * jax.lax.rsqrt(var + eps) * g_ref[...] + b_ref[...]

    # QKV projection: bf16 MXU, f32 accumulate.
    qkv = jnp.dot(xn.astype(wqkv_ref.dtype), wqkv_ref[...],
                  preferred_element_type=jnp.float32) + bqkv_ref[...]     # (S, 3D)

    # Residual + out-projection bias; per-head contributions accumulate into it.
    acc = x + bo_ref[...]                                                 # (S, D) f32
    # TODO(synk): emit QKV head-major from the projection to avoid the Dh-lane
    # offset value slices below (pure relayout cost, semantics unchanged).
    for hd in range(n_heads):
        lo = hd * Dh
        q = qkv[:, lo:lo + Dh].astype(COMPUTE_DT)                         # pre-scaled
        k = qkv[:, D + lo:D + lo + Dh].astype(COMPUTE_DT)
        v = qkv[:, 2 * D + lo:2 * D + lo + Dh].astype(COMPUTE_DT)
        s = jax.lax.dot_general(q, k, (((1,), (1,)), ((), ())),
                                preferred_element_type=jnp.float32)       # (S, S)
        s = s - jnp.max(s, axis=-1, keepdims=True)
        p = jnp.exp(s)
        p = p * pl.reciprocal(jnp.sum(p, axis=-1, keepdims=True), approx=True)
        ctx = jnp.dot(p.astype(COMPUTE_DT), v,
                      preferred_element_type=jnp.float32)                 # (S, Dh)
        acc = acc + jnp.dot(ctx.astype(COMPUTE_DT), wo_ref[lo:lo + Dh, :],
                            preferred_element_type=jnp.float32)           # (S, D)
    o_ref[0] = acc.astype(o_ref.dtype)


def _mlp_block_kernel(h_ref, g_ref, b_ref, w1_ref, b1_ref, w2_ref, b2_ref,
                      o_ref, *, eps, f_chunk):
    """Fused MLP block for one batch element:
       out = h + W2(quick_gelu(W1(LN2(h)) + b1)) + b2.

    The F (intermediate) dimension is processed in chunks so the live f32
    quick_gelu tile stays small (avoids vreg spills at F=3072)."""
    x = h_ref[0].astype(jnp.float32)                                      # (S, D)
    mu = jnp.mean(x, axis=-1, keepdims=True)
    xc = x - mu
    var = jnp.mean(xc * xc, axis=-1, keepdims=True)
    xn = (xc * jax.lax.rsqrt(var + eps) * g_ref[...] + b_ref[...]).astype(w1_ref.dtype)

    F = w1_ref.shape[1]
    acc = x + b2_ref[...]                                                 # residual + b2
    for c0 in range(0, F, f_chunk):
        c1 = min(c0 + f_chunk, F)
        h1 = jnp.dot(xn, w1_ref[:, c0:c1],
                     preferred_element_type=jnp.float32) + b1_ref[:, c0:c1]
        h1 = h1 * jax.nn.sigmoid(1.702 * h1)                              # quick_gelu f32
        acc = acc + jnp.dot(h1.astype(w2_ref.dtype), w2_ref[c0:c1, :],
                            preferred_element_type=jnp.float32)
    o_ref[0] = acc.astype(o_ref.dtype)


def _ln_head_kernel(x_ref, g_ref, b_ref, w_ref, bias_ref, o_ref, *, eps):
    """CLIP pooler post-layernorm fused with all classifier heads (one matmul)."""
    x = x_ref[...].astype(jnp.float32)
    mu = jnp.mean(x, axis=-1, keepdims=True)
    xc = x - mu
    var = jnp.mean(xc * xc, axis=-1, keepdims=True)
    xn = xc * jax.lax.rsqrt(var + eps) * g_ref[...] + b_ref[...]
    y = jnp.dot(xn.astype(w_ref.dtype), w_ref[...],
                preferred_element_type=jnp.float32) + bias_ref[...]
    o_ref[...] = y.astype(o_ref.dtype)


# ---------------------------------------------------------------------------
# Pallas wrappers (grid over batch; weights are grid-invariant VMEM blocks)
# ---------------------------------------------------------------------------
def patch_embed(x, w):
    B, nP, K = x.shape
    N = w.shape[1]
    return pl.pallas_call(
        _patch_embed_kernel,
        out_shape=jax.ShapeDtypeStruct((B, nP, N), COMPUTE_DT),
        grid=(B,),
        in_specs=[pl.BlockSpec((1, nP, K), lambda i: (i, 0, 0)),
                  _const_spec((K, N))],
        out_specs=pl.BlockSpec((1, nP, N), lambda i: (i, 0, 0)),
        compiler_params=_COMPILER_PARAMS,
    )(x, w)


def add_pos_layernorm(h, pos, g, b, eps=1e-5):
    B, S, D = h.shape
    kern = functools.partial(_pos_ln_kernel, eps=eps)
    return pl.pallas_call(
        kern,
        out_shape=jax.ShapeDtypeStruct((B, S, D), COMPUTE_DT),
        grid=(B,),
        in_specs=[pl.BlockSpec((1, S, D), lambda i: (i, 0, 0)),
                  _const_spec((1, S, D)),
                  _const_spec((1, D)),
                  _const_spec((1, D))],
        out_specs=pl.BlockSpec((1, S, D), lambda i: (i, 0, 0)),
        compiler_params=_COMPILER_PARAMS,
    )(h, pos, g, b)


def attention_block(h, g, b, wqkv, bqkv, wo, bo, *, n_heads, eps=1e-5):
    B, S, D = h.shape
    kern = functools.partial(_attn_block_kernel, n_heads=n_heads, eps=eps)
    return pl.pallas_call(
        kern,
        out_shape=jax.ShapeDtypeStruct((B, S, D), COMPUTE_DT),
        grid=(B,),
        in_specs=[pl.BlockSpec((1, S, D), lambda i: (i, 0, 0)),
                  _const_spec((1, D)),
                  _const_spec((1, D)),
                  _const_spec((D, 3 * D)),
                  _const_spec((1, 3 * D)),
                  _const_spec((D, D)),
                  _const_spec((1, D))],
        out_specs=pl.BlockSpec((1, S, D), lambda i: (i, 0, 0)),
        compiler_params=_COMPILER_PARAMS,
    )(h, g, b, wqkv, bqkv, wo, bo)


def mlp_block(h, g, b, w1, b1, w2, b2, *, eps=1e-5):
    B, S, D = h.shape
    F = w1.shape[1]
    kern = functools.partial(_mlp_block_kernel, eps=eps, f_chunk=min(F_CHUNK, F))
    return pl.pallas_call(
        kern,
        out_shape=jax.ShapeDtypeStruct((B, S, D), COMPUTE_DT),
        grid=(B,),
        in_specs=[pl.BlockSpec((1, S, D), lambda i: (i, 0, 0)),
                  _const_spec((1, D)),
                  _const_spec((1, D)),
                  _const_spec((D, F)),
                  _const_spec((1, F)),
                  _const_spec((F, D)),
                  _const_spec((1, D))],
        out_specs=pl.BlockSpec((1, S, D), lambda i: (i, 0, 0)),
        compiler_params=_COMPILER_PARAMS,
    )(h, g, b, w1, b1, w2, b2)


def ln_head(x, g, b, w, bias, *, eps=1e-5):
    M, D = x.shape
    N = w.shape[1]
    kern = functools.partial(_ln_head_kernel, eps=eps)
    return pl.pallas_call(
        kern,
        out_shape=jax.ShapeDtypeStruct((M, N), jnp.float32),
        grid=(1,),
        in_specs=[pl.BlockSpec((M, D), lambda i: (0, 0)),
                  _const_spec((1, D)),
                  _const_spec((1, D)),
                  _const_spec((D, N)),
                  _const_spec((1, N))],
        out_specs=pl.BlockSpec((M, N), lambda i: (0, 0)),
        compiler_params=_COMPILER_PARAMS,
    )(x, g, b, w, bias)


# ---------------------------------------------------------------------------
# CLIP-style vision tower + classifier heads (small synthetic config)
# ---------------------------------------------------------------------------
def init_params(key, *, img, channels, patch, hidden, mlp, n_layers,
                n_category, n_digits, n_heads):
    keys = iter(jax.random.split(key, 128))

    def nrm(shape, scale=0.02):
        return (scale * jax.random.normal(next(keys), shape)).astype(jnp.float32)

    num_patches = (img // patch) ** 2
    seq = num_patches + 1
    head_dim = hidden // n_heads
    scale = 1.0 / math.sqrt(head_dim)

    params = {
        "patch_w": nrm((channels * patch * patch, hidden)).astype(COMPUTE_DT),
        "class_emb": nrm((1, 1, hidden)),
        "pos_emb": nrm((1, seq, hidden)),
        "pre_ln_g": jnp.ones((1, hidden), jnp.float32),
        "pre_ln_b": jnp.zeros((1, hidden), jnp.float32),
        "post_ln_g": jnp.ones((1, hidden), jnp.float32),
        "post_ln_b": jnp.zeros((1, hidden), jnp.float32),
        "layers": [],
    }
    for _ in range(n_layers):
        wq, wk, wv = nrm((hidden, hidden)), nrm((hidden, hidden)), nrm((hidden, hidden))
        bq, bk, bv = nrm((1, hidden)), nrm((1, hidden)), nrm((1, hidden))
        # attention scale folded into the Q projection (saves an SxS VPU multiply)
        wqkv = jnp.concatenate([wq * scale, wk, wv], axis=1)
        bqkv = jnp.concatenate([bq * scale, bk, bv], axis=1)
        params["layers"].append({
            "ln1_g": jnp.ones((1, hidden), jnp.float32),
            "ln1_b": jnp.zeros((1, hidden), jnp.float32),
            "ln2_g": jnp.ones((1, hidden), jnp.float32),
            "ln2_b": jnp.zeros((1, hidden), jnp.float32),
            "wqkv": wqkv.astype(COMPUTE_DT), "bqkv": bqkv,
            "wo": nrm((hidden, hidden)).astype(COMPUTE_DT), "bo": nrm((1, hidden)),
            "w1": nrm((hidden, mlp)).astype(COMPUTE_DT), "b1": nrm((1, mlp)),
            "w2": nrm((mlp, hidden)).astype(COMPUTE_DT), "b2": nrm((1, hidden)),
        })
    # n_digits independent Linear(hidden -> n_category) heads packed digit-major
    # along the columns (one lane-dense matmul); columns zero-padded to a
    # multiple of 128 so the output store is unmasked (lane-dense vst).
    n_out = n_digits * n_category
    n_out_pad = ((n_out + 127) // 128) * 128
    head_w = nrm((n_digits, hidden, n_category)).transpose(1, 0, 2).reshape(hidden, n_out)
    head_b = nrm((n_digits, 1, n_category)).reshape(1, n_out)
    params["head_w"] = jnp.pad(head_w, ((0, 0), (0, n_out_pad - n_out))).astype(COMPUTE_DT)
    params["head_b"] = jnp.pad(head_b, ((0, 0), (0, n_out_pad - n_out)))
    return params


def clip_classifier_forward(params, pixel_values, *, patch, n_heads, n_digits,
                            n_category):
    # layout: pixel_values NCHW (B, C, H, W), matching the PyTorch module.
    B, C, H, W = pixel_values.shape
    nH, nW = H // patch, W // patch
    hidden = params["patch_w"].shape[1]

    # patch-embedding conv (kernel=stride=patch, bias-free) == im2col + matmul
    # TODO(synk): fold the im2col unfold into the patch kernel's BlockSpec index_map
    x = pixel_values.reshape(B, C, nH, patch, nW, patch)
    x = x.transpose(0, 2, 4, 1, 3, 5).reshape(B, nH * nW, C * patch * patch)
    pe = patch_embed(x.astype(COMPUTE_DT), params["patch_w"])           # (B, nP, D)

    cls = jnp.broadcast_to(params["class_emb"].astype(COMPUTE_DT), (B, 1, hidden))
    h = jnp.concatenate([cls, pe], axis=1)                              # (B, S, D)

    # fused (+ position embedding, pre_layernorm)
    h = add_pos_layernorm(h, params["pos_emb"],
                          params["pre_ln_g"], params["pre_ln_b"])

    for lyr in params["layers"]:
        # --- self-attention block: one fused kernel per layer ---
        h = attention_block(h, lyr["ln1_g"], lyr["ln1_b"],
                            lyr["wqkv"], lyr["bqkv"], lyr["wo"], lyr["bo"],
                            n_heads=n_heads)
        # --- MLP block (pre-LN, quick_gelu): one fused kernel per layer ---
        h = mlp_block(h, lyr["ln2_g"], lyr["ln2_b"],
                      lyr["w1"], lyr["b1"], lyr["w2"], lyr["b2"])

    # CLIP pooler_output = post_layernorm(last_hidden_state[:, 0, :]);
    # fused with all n_digits classifier heads as one (lane-padded) matmul.
    pooled = h[:, 0, :]                                                 # (B, D)
    logits = ln_head(pooled, params["post_ln_g"], params["post_ln_b"],
                     params["head_w"], params["head_b"])                # (B, Npad) f32
    logits = logits[:, : n_digits * n_category]
    return logits.reshape(B, n_digits, n_category)


# ---------------------------------------------------------------------------
if __name__ == "__main__":
    # Small synthetic config (stand-in for clip-vit-base-patch32: 768 -> 64, etc.)
    B, C, IMG, PATCH = 2, 3, 16, 8
    HIDDEN, N_HEADS, MLP, N_LAYERS = 64, 4, 128, 2
    N_CATEGORY, N_DIGITS = 10, 4

    key = jax.random.PRNGKey(0)
    k_param, k_input = jax.random.split(key)
    params = init_params(k_param, img=IMG, channels=C, patch=PATCH,
                         hidden=HIDDEN, mlp=MLP, n_layers=N_LAYERS,
                         n_category=N_CATEGORY, n_digits=N_DIGITS,
                         n_heads=N_HEADS)
    pixel_values = jax.random.normal(k_input, (B, C, IMG, IMG), jnp.float32)

    fwd = jax.jit(functools.partial(clip_classifier_forward, patch=PATCH,
                                    n_heads=N_HEADS, n_digits=N_DIGITS,
                                    n_category=N_CATEGORY))
    out = fwd(params, pixel_values)
    jax.block_until_ready(out)

    assert out.shape == (B, N_DIGITS, N_CATEGORY), out.shape
    assert out.dtype == jnp.float32
    assert bool(jnp.all(jnp.isfinite(out)))
    print("KERNEL_OK")
</pallas_src>

<mosaic_0001>
module attributes {stable_mosaic.version = 11 : i64} {
  func.func @_k(%arg0: i32, %arg1: memref<8x128xf32, #tpu.memory_space<vmem>>, %arg2: memref<8x128xf32, #tpu.memory_space<vmem>>) attributes {dimension_semantics = [#tpu.dimension_semantics<arbitrary>], iteration_bounds = array<i64: 1>, scalar_prefetch = 0 : i64, scratch_operands = 0 : i64, tpu.core_type = #tpu.core_type<tc>, window_params = [{pipeline_mode = #tpu.pipeline_mode<synchronous>, transform_indices = @transform_0, window_bounds = array<i64: 8, 128>}, {pipeline_mode = #tpu.pipeline_mode<synchronous>, transform_indices = @transform_1, window_bounds = array<i64: 8, 128>}]} {
    %c0 = arith.constant 0 : index
    %c0_0 = arith.constant 0 : index
    %0 = vector.load %arg1[%c0, %c0_0] : memref<8x128xf32, #tpu.memory_space<vmem>>, vector<8x128xf32>
    %cst = arith.constant 1.000000e+00 : f32
    %1 = vector.broadcast %cst : f32 to vector<8x128xf32>
    %2 = arith.addf %0, %1 : vector<8x128xf32>
    %c0_1 = arith.constant 0 : index
    %c0_2 = arith.constant 0 : index
    %3 = vector.load %arg2[%c0_1, %c0_2] : memref<8x128xf32, #tpu.memory_space<vmem>>, vector<8x128xf32>
    tpu.vector_store %arg2[%c0_1, %c0_2], %2 {strides = array<i32>} : memref<8x128xf32, #tpu.memory_space<vmem>>, vector<8x128xf32>,
    return
  }
  func.func @transform_0(%arg0: i32) -> (i32, i32) {
    %c0_i32 = arith.constant 0 : i32
    %c0_i32_0 = arith.constant 0 : i32
    %c0_i32_1 = arith.constant 0 : i32
    return %c0_i32, %c0_i32_0 : i32, i32
  }
  func.func @transform_1(%arg0: i32) -> (i32, i32) {
    %c0_i32 = arith.constant 0 : i32
    %c0_i32_0 = arith.constant 0 : i32
    %c0_i32_1 = arith.constant 0 : i32
    return %c0_i32, %c0_i32_0 : i32, i32
  }
}

module attributes {stable_mosaic.version = 11 : i64} {
  func.func @_pos_ln_kernel(%arg0: i32, %arg1: memref<1x5x64xbf16, #tpu.memory_space<vmem>>, %arg2: memref<1x5x64xf32, #tpu.memory_space<vmem>>, %arg3: memref<1x64xf32, #tpu.memory_space<vmem>>, %arg4: memref<1x64xf32, #tpu.memory_space<vmem>>, %arg5: memref<1x5x64xbf16, #tpu.memory_space<vmem>>) attributes {dimension_semantics = [#tpu.dimension_semantics<parallel>], iteration_bounds = array<i64: 2>, scalar_prefetch = 0 : i64, scratch_operands = 0 : i64, tpu.core_type = #tpu.core_type<tc>, window_params = [{transform_indices = @transform_0, window_bounds = array<i64: 1, 5, 64>}, {pipeline_mode = #tpu.pipeline_mode<synchronous>, transform_indices = @transform_1, window_bounds = array<i64: 1, 5, 64>}, {pipeline_mode = #tpu.pipeline_mode<synchronous>, transform_indices = @transform_2, window_bounds = array<i64: 1, 64>}, {pipeline_mode = #tpu.pipeline_mode<synchronous>, transform_indices = @transform_3, window_bounds = array<i64: 1, 64>}, {transform_indices = @transform_4, window_bounds = array<i64: 1, 5, 64>}]} {
    %c0 = arith.constant 0 : index
    %c0_0 = arith.constant 0 : index
    %c0_1 = arith.constant 0 : index
    %0 = vector.load %arg1[%c0, %c0_0, %c0_1] : memref<1x5x64xbf16, #tpu.memory_space<vmem>>, vector<1x5x64xbf16>
    %1 = vector.shape_cast %0 : vector<1x5x64xbf16> to vector<5x64xbf16>
    %2 = arith.extf %1 : vector<5x64xbf16> to vector<5x64xf32>
    %c0_2 = arith.constant 0 : index
    %c0_3 = arith.constant 0 : index
    %c0_4 = arith.constant 0 : index
    %3 = vector.load %arg2[%c0_2, %c0_3, %c0_4] : memref<1x5x64xf32, #tpu.memory_space<vmem>>, vector<1x5x64xf32>
    %4 = vector.shape_cast %3 : vector<1x5x64xf32> to vector<5x64xf32>
    %5 = arith.addf %2, %4 : vector<5x64xf32>
    %cst = arith.constant dense<0.000000e+00> : vector<5xf32>
    %6 = vector.multi_reduction <add>, %5, %cst [1] : vector<5x64xf32> to vector<5xf32>
    %7 = vector.shape_cast %6 : vector<5xf32> to vector<5x1xf32>
    %cst_5 = arith.constant 6.400000e+01 : f32
    %8 = vector.broadcast %cst_5 : f32 to vector<5x1xf32>
    %9 = arith.divf %7, %8 : vector<5x1xf32>
    %10 = vector.broadcast %9 : vector<5x1xf32> to vector<5x64xf32>
    %11 = arith.subf %5, %10 : vector<5x64xf32>
    %12 = arith.mulf %11, %11 : vector<5x64xf32>
    %cst_6 = arith.constant dense<0.000000e+00> : vector<5xf32>
    %13 = vector.multi_reduction <add>, %12, %cst_6 [1] : vector<5x64xf32> to vector<5xf32>
    %14 = vector.shape_cast %13 : vector<5xf32> to vector<5x1xf32>
    %cst_7 = arith.constant 6.400000e+01 : f32
    %15 = vector.broadcast %cst_7 : f32 to vector<5x1xf32>
    %16 = arith.divf %14, %15 : vector<5x1xf32>
    %cst_8 = arith.constant 9.99999974E-6 : f32
    %17 = vector.broadcast %cst_8 : f32 to vector<5x1xf32>
    %18 = arith.addf %16, %17 : vector<5x1xf32>
    %19 = math.rsqrt %18 : vector<5x1xf32>
    %20 = vector.broadcast %19 : vector<5x1xf32> to vector<5x64xf32>
    %21 = arith.mulf %11, %20 : vector<5x64xf32>
    %c0_9 = arith.constant 0 : index
    %c0_10 = arith.constant 0 : index
    %22 = vector.load %arg3[%c0_9, %c0_10] : memref<1x64xf32, #tpu.memory_space<vmem>>, vector<1x64xf32>
    %23 = vector.broadcast %22 : vector<1x64xf32> to vector<5x64xf32>
    %24 = arith.mulf %21, %23 : vector<5x64xf32>
    %c0_11 = arith.constant 0 : index
    %c0_12 = arith.constant 0 : index
    %25 = vector.load %arg4[%c0_11, %c0_12] : memref<1x64xf32, #tpu.memory_space<vmem>>, vector<1x64xf32>
    %26 = vector.broadcast %25 : vector<1x64xf32> to vector<5x64xf32>
    %27 = arith.addf %24, %26 : vector<5x64xf32>
    %28 = arith.truncf %27 : vector<5x64xf32> to vector<5x64xbf16>
    %c0_13 = arith.constant 0 : index
    %c0_14 = arith.constant 0 : index
    %c0_15 = arith.constant 0 : index
    %29 = vector.load %arg5[%c0_13, %c0_14, %c0_15] : memref<1x5x64xbf16, #tpu.memory_space<vmem>>, vector<1x5x64xbf16>
    %30 = vector.shape_cast %29 : vector<1x5x64xbf16> to vector<5x64xbf16>
    %31 = vector.shape_cast %28 : vector<5x64xbf16> to vector<1x5x64xbf16>
    tpu.vector_store %arg5[%c0_13, %c0_14, %c0_15], %31 {strides = array<i32>} : memref<1x5x64xbf16, #tpu.memory_space<vmem>>, vector<1x5x64xbf16>,
    return
  }
  func.func @transform_0(%arg0: i32) -> (i32, i32, i32) {
    %c0_i32 = arith.constant 0 : i32
    %c0_i32_0 = arith.constant 0 : i32
    %c0_i32_1 = arith.constant 0 : i32
    return %arg0, %c0_i32, %c0_i32_0 : i32, i32, i32
  }
  func.func @transform_1(%arg0: i32) -> (i32, i32, i32) {
    %c0_i32 = arith.constant 0 : i32
    %c0_i32_0 = arith.constant 0 : i32
    %c0_i32_1 = arith.constant 0 : i32
    %c0_i32_2 = arith.constant 0 : i32
    return %c0_i32, %c0_i32_0, %c0_i32_1 : i32, i32, i32
  }
  func.func @transform_2(%arg0: i32) -> (i32, i32) {
    %c0_i32 = arith.constant 0 : i32
    %c0_i32_0 = arith.constant 0 : i32
    %c0_i32_1 = arith.constant 0 : i32
    return %c0_i32, %c0_i32_0 : i32, i32
  }
  func.func @transform_3(%arg0: i32) -> (i32, i32) {
    %c0_i32 = arith.constant 0 : i32
    %c0_i32_0 = arith.constant 0 : i32
    %c0_i32_1 = arith.constant 0 : i32
    return %c0_i32, %c0_i32_0 : i32, i32
  }
  func.func @transform_4(%arg0: i32) -> (i32, i32, i32) {
    %c0_i32 = arith.constant 0 : i32
    %c0_i32_0 = arith.constant 0 : i32
    %c0_i32_1 = arith.constant 0 : i32
    return %arg0, %c0_i32, %c0_i32_0 : i32, i32, i32
  }
}

module attributes {stable_mosaic.version = 11 : i64} {
  func.func @_patch_embed_kernel(%arg0: i32, %arg1: memref<1x4x192xbf16, #tpu.memory_space<vmem>>, %arg2: memref<192x64xbf16, #tpu.memory_space<vmem>>, %arg3: memref<1x4x64xbf16, #tpu.memory_space<vmem>>) attributes {dimension_semantics = [#tpu.dimension_semantics<parallel>], iteration_bounds = array<i64: 2>, scalar_prefetch = 0 : i64, scratch_operands = 0 : i64, tpu.core_type = #tpu.core_type<tc>, window_params = [{transform_indices = @transform_0, window_bounds = array<i64: 1, 4, 192>}, {pipeline_mode = #tpu.pipeline_mode<synchronous>, transform_indices = @transform_1, window_bounds = array<i64: 192, 64>}, {transform_indices = @transform_2, window_bounds = array<i64: 1, 4, 64>}]} {
    %c0 = arith.constant 0 : index
    %c0_0 = arith.constant 0 : index
    %c0_1 = arith.constant 0 : index
    %0 = vector.load %arg1[%c0, %c0_0, %c0_1] : memref<1x4x192xbf16, #tpu.memory_space<vmem>>, vector<1x4x192xbf16>
    %1 = vector.shape_cast %0 : vector<1x4x192xbf16> to vector<4x192xbf16>
    %c0_2 = arith.constant 0 : index
    %c0_3 = arith.constant 0 : index
    %2 = vector.load %arg2[%c0_2, %c0_3] : memref<192x64xbf16, #tpu.memory_space<vmem>>, vector<192x64xbf16>
    %cst = arith.constant dense<0.000000e+00> : vector<4x64xf32>
    %3 = tpu.matmul %1, %2, %cst {dimension_numbers = #tpu.dot_dimension_numbers<[1], [0], [0], [1], [0, 0, 1, 1], [], []>} : vector<4x192xbf16>, vector<192x64xbf16>, vector<4x64xf32> -> vector<4x64xf32>
    %4 = arith.truncf %3 : vector<4x64xf32> to vector<4x64xbf16>
    %c0_4 = arith.constant 0 : index
    %c0_5 = arith.constant 0 : index
    %c0_6 = arith.constant 0 : index
    %5 = vector.load %arg3[%c0_4, %c0_5, %c0_6] : memref<1x4x64xbf16, #tpu.memory_space<vmem>>, vector<1x4x64xbf16>
    %6 = vector.shape_cast %5 : vector<1x4x64xbf16> to vector<4x64xbf16>
    %7 = vector.shape_cast %4 : vector<4x64xbf16> to vector<1x4x64xbf16>
    tpu.vector_store %arg3[%c0_4, %c0_5, %c0_6], %7 {strides = array<i32>} : memref<1x4x64xbf16, #tpu.memory_space<vmem>>, vector<1x4x64xbf16>,
    return
  }
  func.func @transform_0(%arg0: i32) -> (i32, i32, i32) {
    %c0_i32 = arith.constant 0 : i32
    %c0_i32_0 = arith.constant 0 : i32
    %c0_i32_1 = arith.constant 0 : i32
    return %arg0, %c0_i32, %c0_i32_0 : i32, i32, i32
  }
  func.func @transform_1(%arg0: i32) -> (i32, i32) {
    %c0_i32 = arith.constant 0 : i32
    %c0_i32_0 = arith.constant 0 : i32
    %c0_i32_1 = arith.constant 0 : i32
    return %c0_i32, %c0_i32_0 : i32, i32
  }
  func.func @transform_2(%arg0: i32) -> (i32, i32, i32) {
    %c0_i32 = arith.constant 0 : i32
    %c0_i32_0 = arith.constant 0 : i32
    %c0_i32_1 = arith.constant 0 : i32
    return %arg0, %c0_i32, %c0_i32_0 : i32, i32, i32
  }
}

module attributes {stable_mosaic.version = 11 : i64} {
  func.func @_attn_block_kernel(%arg0: i32, %arg1: memref<1x5x64xbf16, #tpu.memory_space<vmem>>, %arg2: memref<1x64xf32, #tpu.memory_space<vmem>>, %arg3: memref<1x64xf32, #tpu.memory_space<vmem>>, %arg4: memref<64x192xbf16, #tpu.memory_space<vmem>>, %arg5: memref<1x192xf32, #tpu.memory_space<vmem>>, %arg6: memref<64x64xbf16, #tpu.memory_space<vmem>>, %arg7: memref<1x64xf32, #tpu.memory_space<vmem>>, %arg8: memref<1x5x64xbf16, #tpu.memory_space<vmem>>) attributes {dimension_semantics = [#tpu.dimension_semantics<parallel>], iteration_bounds = array<i64: 2>, scalar_prefetch = 0 : i64, scratch_operands = 0 : i64, tpu.core_type = #tpu.core_type<tc>, window_params = [{transform_indices = @transform_0, window_bounds = array<i64: 1, 5, 64>}, {pipeline_mode = #tpu.pipeline_mode<synchronous>, transform_indices = @transform_1, window_bounds = array<i64: 1, 64>}, {pipeline_mode = #tpu.pipeline_mode<synchronous>, transform_indices = @transform_2, window_bounds = array<i64: 1, 64>}, {pipeline_mode = #tpu.pipeline_mode<synchronous>, transform_indices = @transform_3, window_bounds = array<i64: 64, 192>}, {pipeline_mode = #tpu.pipeline_mode<synchronous>, transform_indices = @transform_4, window_bounds = array<i64: 1, 192>}, {pipeline_mode = #tpu.pipeline_mode<synchronous>, transform_indices = @transform_5, window_bounds = array<i64: 64, 64>}, {pipeline_mode = #tpu.pipeline_mode<synchronous>, transform_indices = @transform_6, window_bounds = array<i64: 1, 64>}, {transform_indices = @transform_7, window_bounds = array<i64: 1, 5, 64>}]} {
    %c0 = arith.constant 0 : index
    %c0_0 = arith.constant 0 : index
    %c0_1 = arith.constant 0 : index
    %0 = vector.load %arg1[%c0, %c0_0, %c0_1] : memref<1x5x64xbf16, #tpu.memory_space<vmem>>, vector<1x5x64xbf16>
    %1 = vector.shape_cast %0 : vector<1x5x64xbf16> to vector<5x64xbf16>
    %2 = arith.extf %1 : vector<5x64xbf16> to vector<5x64xf32>
    %cst = arith.constant dense<0.000000e+00> : vector<5xf32>
    %3 = vector.multi_reduction <add>, %2, %cst [1] : vector<5x64xf32> to vector<5xf32>
    %4 = vector.shape_cast %3 : vector<5xf32> to vector<5x1xf32>
    %cst_2 = arith.constant 6.400000e+01 : f32
    %5 = vector.broadcast %cst_2 : f32 to vector<5x1xf32>
    %6 = arith.divf %4, %5 : vector<5x1xf32>
    %7 = vector.broadcast %6 : vector<5x1xf32> to vector<5x64xf32>
    %8 = arith.subf %2, %7 : vector<5x64xf32>
    %9 = arith.mulf %8, %8 : vector<5x64xf32>
    %cst_3 = arith.constant dense<0.000000e+00> : vector<5xf32>
    %10 = vector.multi_reduction <add>, %9, %cst_3 [1] : vector<5x64xf32> to vector<5xf32>
    %11 = vector.shape_cast %10 : vector<5xf32> to vector<5x1xf32>
    %cst_4 = arith.constant 6.400000e+01 : f32
    %12 = vector.broadcast %cst_4 : f32 to vector<5x1xf32>
    %13 = arith.divf %11, %12 : vector<5x1xf32>
    %cst_5 = arith.constant 9.99999974E-6 : f32
    %14 = vector.broadcast %cst_5 : f32 to vector<5x1xf32>
    %15 = arith.addf %13, %14 : vector<5x1xf32>
    %16 = math.rsqrt %15 : vector<5x1xf32>
    %17 = vector.broadcast %16 : vector<5x1xf32> to vector<5x64xf32>
    %18 = arith.mulf %8, %17 : vector<5x64xf32>
    %c0_6 = arith.constant 0 : index
    %c0_7 = arith.constant 0 : index
    %19 = vector.load %arg2[%c0_6, %c0_7] : memref<1x64xf32, #tpu.memory_space<vmem>>, vector<1x64xf32>
    %20 = vector.broadcast %19 : vector<1x64xf32> to vector<5x64xf32>
    %21 = arith.mulf %18, %20 : vector<5x64xf32>
    %c0_8 = arith.constant 0 : index
    %c0_9 = arith.constant 0 : index
    %22 = vector.load %arg3[%c0_8, %c0_9] : memref<1x64xf32, #tpu.memory_space<vmem>>, vector<1x64xf32>
    %23 = vector.broadcast %22 : vector<1x64xf32> to vector<5x64xf32>
    %24 = arith.addf %21, %23 : vector<5x64xf32>
    %25 = arith.truncf %24 : vector<5x64xf32> to vector<5x64xbf16>
    %c0_10 = arith.constant 0 : index
    %c0_11 = arith.constant 0 : index
    %26 = vector.load %arg4[%c0_10, %c0_11] : memref<64x192xbf16, #tpu.memory_space<vmem>>, vector<64x192xbf16>
    %cst_12 = arith.constant dense<0.000000e+00> : vector<5x192xf32>
    %27 = tpu.matmul %25, %26, %cst_12 {dimension_numbers = #tpu.dot_dimension_numbers<[1], [0], [0], [1], [0, 0, 1, 1], [], []>} : vector<5x64xbf16>, vector<64x192xbf16>, vector<5x192xf32> -> vector<5x192xf32>
    %c0_13 = arith.constant 0 : index
    %c0_14 = arith.constant 0 : index
    %28 = vector.load %arg5[%c0_13, %c0_14] : memref<1x192xf32, #tpu.memory_space<vmem>>, vector<1x192xf32>
    %29 = vector.broadcast %28 : vector<1x192xf32> to vector<5x192xf32>
    %30 = arith.addf %27, %29 : vector<5x192xf32>
    %c0_15 = arith.constant 0 : index
    %c0_16 = arith.constant 0 : index
    %31 = vector.load %arg7[%c0_15, %c0_16] : memref<1x64xf32, #tpu.memory_space<vmem>>, vector<1x64xf32>
    %32 = vector.broadcast %31 : vector<1x64xf32> to vector<5x64xf32>
    %33 = arith.addf %2, %32 : vector<5x64xf32>
    %34 = vector.extract_strided_slice %30 {offsets = [0, 0], sizes = [5, 16], strides = [1, 1]} : vector<5x192xf32> to vector<5x16xf32>
    %35 = arith.truncf %34 : vector<5x16xf32> to vector<5x16xbf16>
    %36 = vector.extract_strided_slice %30 {offsets = [0, 64], sizes = [5, 16], strides = [1, 1]} : vector<5x192xf32> to vector<5x16xf32>
    %37 = arith.truncf %36 : vector<5x16xf32> to vector<5x16xbf16>
    %38 = vector.extract_strided_slice %30 {offsets = [0, 128], sizes = [5, 16], strides = [1, 1]} : vector<5x192xf32> to vector<5x16xf32>
    %39 = arith.truncf %38 : vector<5x16xf32> to vector<5x16xbf16>
    %cst_17 = arith.constant dense<0.000000e+00> : vector<5x5xf32>
    %40 = tpu.matmul %35, %37, %cst_17 {dimension_numbers = #tpu.dot_dimension_numbers<[1], [1], [0], [0], [0, 0, 1, 0], [], []>} : vector<5x16xbf16>, vector<5x16xbf16>, vector<5x5xf32> -> vector<5x5xf32>
    %cst_18 = arith.constant dense<0xFF800000> : vector<5xf32>
    %41 = vector.multi_reduction <maximumf>, %40, %cst_18 [1] : vector<5x5xf32> to vector<5xf32>
    %42 = vector.shape_cast %41 : vector<5xf32> to vector<5x1xf32>
    %43 = vector.broadcast %42 : vector<5x1xf32> to vector<5x5xf32>
    %44 = arith.subf %40, %43 : vector<5x5xf32>
    %45 = math.exp %44 : vector<5x5xf32>
    %cst_19 = arith.constant dense<0.000000e+00> : vector<5xf32>
    %46 = vector.multi_reduction <add>, %45, %cst_19 [1] : vector<5x5xf32> to vector<5xf32>
    %47 = vector.shape_cast %46 : vector<5xf32> to vector<5x1xf32>
    %48 = tpu.reciprocal %47 {approx = true} : vector<5x1xf32> -> vector<5x1xf32>
    %49 = vector.broadcast %48 : vector<5x1xf32> to vector<5x5xf32>
    %50 = arith.mulf %45, %49 : vector<5x5xf32>
    %51 = arith.truncf %50 : vector<5x5xf32> to vector<5x5xbf16>
    %cst_20 = arith.constant dense<0.000000e+00> : vector<5x16xf32>
    %52 = tpu.matmul %51, %39, %cst_20 {dimension_numbers = #tpu.dot_dimension_numbers<[1], [0], [0], [1], [0, 0, 1, 1], [], []>} : vector<5x5xbf16>, vector<5x16xbf16>, vector<5x16xf32> -> vector<5x16xf32>
    %53 = arith.truncf %52 : vector<5x16xf32> to vector<5x16xbf16>
    %c0_21 = arith.constant 0 : index
    %c0_22 = arith.constant 0 : index
    %54 = vector.load %arg6[%c0_21, %c0_22] : memref<64x64xbf16, #tpu.memory_space<vmem>>, vector<16x64xbf16>
    %cst_23 = arith.constant dense<0.000000e+00> : vector<5x64xf32>
    %55 = tpu.matmul %53, %54, %cst_23 {dimension_numbers = #tpu.dot_dimension_numbers<[1], [0], [0], [1], [0, 0, 1, 1], [], []>} : vector<5x16xbf16>, vector<16x64xbf16>, vector<5x64xf32> -> vector<5x64xf32>
    %56 = arith.addf %33, %55 : vector<5x64xf32>
    %57 = vector.extract_strided_slice %30 {offsets = [0, 16], sizes = [5, 16], strides = [1, 1]} : vector<5x192xf32> to vector<5x16xf32>
    %58 = arith.truncf %57 : vector<5x16xf32> to vector<5x16xbf16>
    %59 = vector.extract_strided_slice %30 {offsets = [0, 80], sizes = [5, 16], strides = [1, 1]} : vector<5x192xf32> to vector<5x16xf32>
    %60 = arith.truncf %59 : vector<5x16xf32> to vector<5x16xbf16>
    %61 = vector.extract_strided_slice %30 {offsets = [0, 144], sizes = [5, 16], strides = [1, 1]} : vector<5x192xf32> to vector<5x16xf32>
    %62 = arith.truncf %61 : vector<5x16xf32> to vector<5x16xbf16>
    %cst_24 = arith.constant dense<0.000000e+00> : vector<5x5xf32>
    %63 = tpu.matmul %58, %60, %cst_24 {dimension_numbers = #tpu.dot_dimension_numbers<[1], [1], [0], [0], [0, 0, 1, 0], [], []>} : vector<5x16xbf16>, vector<5x16xbf16>, vector<5x5xf32> -> vector<5x5xf32>
    %cst_25 = arith.constant dense<0xFF800000> : vector<5xf32>
    %64 = vector.multi_reduction <maximumf>, %63, %cst_25 [1] : vector<5x5xf32> to vector<5xf32>
    %65 = vector.shape_cast %64 : vector<5xf32> to vector<5x1xf32>
    %66 = vector.broadcast %65 : vector<5x1xf32> to vector<5x5xf32>
    %67 = arith.subf %63, %66 : vector<5x5xf32>
    %68 = math.exp %67 : vector<5x5xf32>
    %cst_26 = arith.constant dense<0.000000e+00> : vector<5xf32>
    %69 = vector.multi_reduction <add>, %68, %cst_26 [1] : vector<5x5xf32> to vector<5xf32>
    %70 = vector.shape_cast %69 : vector<5xf32> to vector<5x1xf32>
    %71 = tpu.reciprocal %70 {approx = true} : vector<5x1xf32> -> vector<5x1xf32>
    %72 = vector.broadcast %71 : vector<5x1xf32> to vector<5x5xf32>
    %73 = arith.mulf %68, %72 : vector<5x5xf32>
    %74 = arith.truncf %73 : vector<5x5xf32> to vector<5x5xbf16>
    %cst_27 = arith.constant dense<0.000000e+00> : vector<5x16xf32>
    %75 = tpu.matmul %74, %62, %cst_27 {dimension_numbers = #tpu.dot_dimension_numbers<[1], [0], [0], [1], [0, 0, 1, 1], [], []>} : vector<5x5xbf16>, vector<5x16xbf16>, vector<5x16xf32> -> vector<5x16xf32>
    %76 = arith.truncf %75 : vector<5x16xf32> to vector<5x16xbf16>
    %c16 = arith.constant 16 : index
    %c0_28 = arith.constant 0 : index
    %77 = vector.load %arg6[%c16, %c0_28] : memref<64x64xbf16, #tpu.memory_space<vmem>>, vector<16x64xbf16>
    %cst_29 = arith.constant dense<0.000000e+00> : vector<5x64xf32>
    %78 = tpu.matmul %76, %77, %cst_29 {dimension_numbers = #tpu.dot_dimension_numbers<[1], [0], [0], [1], [0, 0, 1, 1], [], []>} : vector<5x16xbf16>, vector<16x64xbf16>, vector<5x64xf32> -> vector<5x64xf32>
    %79 = arith.addf %56, %78 : vector<5x64xf32>
    %80 = vector.extract_strided_slice %30 {offsets = [0, 32], sizes = [5, 16], strides = [1, 1]} : vector<5x192xf32> to vector<5x16xf32>
    %81 = arith.truncf %80 : vector<5x16xf32> to vector<5x16xbf16>
    %82 = vector.extract_strided_slice %30 {offsets = [0, 96], sizes = [5, 16], strides = [1, 1]} : vector<5x192xf32> to vector<5x16xf32>
    %83 = arith.truncf %82 : vector<5x16xf32> to vector<5x16xbf16>
    %84 = vector.extract_strided_slice %30 {offsets = [0, 160], sizes = [5, 16], strides = [1, 1]} : vector<5x192xf32> to vector<5x16xf32>
    %85 = arith.truncf %84 : vector<5x16xf32> to vector<5x16xbf16>
    %cst_30 = arith.constant dense<0.000000e+00> : vector<5x5xf32>
    %86 = tpu.matmul %81, %83, %cst_30 {dimension_numbers = #tpu.dot_dimension_numbers<[1], [1], [0], [0], [0, 0, 1, 0], [], []>} : vector<5x16xbf16>, vector<5x16xbf16>, vector<5x5xf32> -> vector<5x5xf32>
    %cst_31 = arith.constant dense<0xFF800000> : vector<5xf32>
    %87 = vector.multi_reduction <maximumf>, %86, %cst_31 [1] : vector<5x5xf32> to vector<5xf32>
    %88 = vector.shape_cast %87 : vector<5xf32> to vector<5x1xf32>
    %89 = vector.broadcast %88 : vector<5x1xf32> to vector<5x5xf32>
    %90 = arith.subf %86, %89 : vector<5x5xf32>
    %91 = math.exp %90 : vector<5x5xf32>
    %cst_32 = arith.constant dense<0.000000e+00> : vector<5xf32>
    %92 = vector.multi_reduction <add>, %91, %cst_32 [1] : vector<5x5xf32> to vector<5xf32>
    %93 = vector.shape_cast %92 : vector<5xf32> to vector<5x1xf32>
    %94 = tpu.reciprocal %93 {approx = true} : vector<5x1xf32> -> vector<5x1xf32>
    %95 = vector.broadcast %94 : vector<5x1xf32> to vector<5x5xf32>
    %96 = arith.mulf %91, %95 : vector<5x5xf32>
    %97 = arith.truncf %96 : vector<5x5xf32> to vector<5x5xbf16>
    %cst_33 = arith.constant dense<0.000000e+00> : vector<5x16xf32>
    %98 = tpu.matmul %97, %85, %cst_33 {dimension_numbers = #tpu.dot_dimension_numbers<[1], [0], [0], [1], [0, 0, 1, 1], [], []>} : vector<5x5xbf16>, vector<5x16xbf16>, vector<5x16xf32> -> vector<5x16xf32>
    %99 = arith.truncf %98 : vector<5x16xf32> to vector<5x16xbf16>
    %c32 = arith.constant 32 : index
    %c0_34 = arith.constant 0 : index
    %100 = vector.load %arg6[%c32, %c0_34] : memref<64x64xbf16, #tpu.memory_space<vmem>>, vector<16x64xbf16>
    %cst_35 = arith.constant dense<0.000000e+00> : vector<5x64xf32>
    %101 = tpu.matmul %99, %100, %cst_35 {dimension_numbers = #tpu.dot_dimension_numbers<[1], [0], [0], [1], [0, 0, 1, 1], [], []>} : vector<5x16xbf16>, vector<16x64xbf16>, vector<5x64xf32> -> vector<5x64xf32>
    %102 = arith.addf %79, %101 : vector<5x64xf32>
    %103 = vector.extract_strided_slice %30 {offsets = [0, 48], sizes = [5, 16], strides = [1, 1]} : vector<5x192xf32> to vector<5x16xf32>
    %104 = arith.truncf %103 : vector<5x16xf32> to vector<5x16xbf16>
    %105 = vector.extract_strided_slice %30 {offsets = [0, 112], sizes = [5, 16], strides = [1, 1]} : vector<5x192xf32> to vector<5x16xf32>
    %106 = arith.truncf %105 : vector<5x16xf32> to vector<5x16xbf16>
    %107 = vector.extract_strided_slice %30 {offsets = [0, 176], sizes = [5, 16], strides = [1, 1]} : vector<5x192xf32> to vector<5x16xf32>
    %108 = arith.truncf %107 : vector<5x16xf32> to vector<5x16xbf16>
    %cst_36 = arith.constant dense<0.000000e+00> : vector<5x5xf32>
    %109 = tpu.matmul %104, %106, %cst_36 {dimension_numbers = #tpu.dot_dimension_numbers<[1], [1], [0], [0], [0, 0, 1, 0], [], []>} : vector<5x16xbf16>, vector<5x16xbf16>, vector<5x5xf32> -> vector<5x5xf32>
    %cst_37 = arith.constant dense<0xFF800000> : vector<5xf32>
    %110 = vector.multi_reduction <maximumf>, %109, %cst_37 [1] : vector<5x5xf32> to vector<5xf32>
    %111 = vector.shape_cast %110 : vector<5xf32> to vector<5x1xf32>
    %112 = vector.broadcast %111 : vector<5x1xf32> to vector<5x5xf32>
    %113 = arith.subf %109, %112 : vector<5x5xf32>
    %114 = math.exp %113 : vector<5x5xf32>
    %cst_38 = arith.constant dense<0.000000e+00> : vector<5xf32>
    %115 = vector.multi_reduction <add>, %114, %cst_38 [1] : vector<5x5xf32> to vector<5xf32>
    %116 = vector.shape_cast %115 : vector<5xf32> to vector<5x1xf32>
    %117 = tpu.reciprocal %116 {approx = true} : vector<5x1xf32> -> vector<5x1xf32>
    %118 = vector.broadcast %117 : vector<5x1xf32> to vector<5x5xf32>
    %119 = arith.mulf %114, %118 : vector<5x5xf32>
    %120 = arith.truncf %119 : vector<5x5xf32> to vector<5x5xbf16>
    %cst_39 = arith.constant dense<0.000000e+00> : vector<5x16xf32>
    %121 = tpu.matmul %120, %108, %cst_39 {dimension_numbers = #tpu.dot_dimension_numbers<[1], [0], [0], [1], [0, 0, 1, 1], [], []>} : vector<5x5xbf16>, vector<5x16xbf16>, vector<5x16xf32> -> vector<5x16xf32>
    %122 = arith.truncf %121 : vector<5x16xf32> to vector<5x16xbf16>
    %c48 = arith.constant 48 : index
    %c0_40 = arith.constant 0 : index
    %123 = vector.load %arg6[%c48, %c0_40] : memref<64x64xbf16, #tpu.memory_space<vmem>>, vector<16x64xbf16>
    %cst_41 = arith.constant dense<0.000000e+00> : vector<5x64xf32>
    %124 = tpu.matmul %122, %123, %cst_41 {dimension_numbers = #tpu.dot_dimension_numbers<[1], [0], [0], [1], [0, 0, 1, 1], [], []>} : vector<5x16xbf16>, vector<16x64xbf16>, vector<5x64xf32> -> vector<5x64xf32>
    %125 = arith.addf %102, %124 : vector<5x64xf32>
    %126 = arith.truncf %125 : vector<5x64xf32> to vector<5x64xbf16>
    %c0_42 = arith.constant 0 : index
    %c0_43 = arith.constant 0 : index
    %c0_44 = arith.constant 0 : index
    %127 = vector.load %arg8[%c0_42, %c0_43, %c0_44] : memref<1x5x64xbf16, #tpu.memory_space<vmem>>, vector<1x5x64xbf16>
    %128 = vector.shape_cast %127 : vector<1x5x64xbf16> to vector<5x64xbf16>
    %129 = vector.shape_cast %126 : vector<5x64xbf16> to vector<1x5x64xbf16>
    tpu.vector_store %arg8[%c0_42, %c0_43, %c0_44], %129 {strides = array<i32>} : memref<1x5x64xbf16, #tpu.memory_space<vmem>>, vector<1x5x64xbf16>,
    return
  }
  func.func @transform_0(%arg0: i32) -> (i32, i32, i32) {
    %c0_i32 = arith.constant 0 : i32
    %c0_i32_0 = arith.constant 0 : i32
    %c0_i32_1 = arith.constant 0 : i32
    return %arg0, %c0_i32, %c0_i32_0 : i32, i32, i32
  }
  func.func @transform_1(%arg0: i32) -> (i32, i32) {
    %c0_i32 = arith.constant 0 : i32
    %c0_i32_0 = arith.constant 0 : i32
    %c0_i32_1 = arith.constant 0 : i32
    return %c0_i32, %c0_i32_0 : i32, i32
  }
  func.func @transform_2(%arg0: i32) -> (i32, i32) {
    %c0_i32 = arith.constant 0 : i32
    %c0_i32_0 = arith.constant 0 : i32
    %c0_i32_1 = arith.constant 0 : i32
    return %c0_i32, %c0_i32_0 : i32, i32
  }
  func.func @transform_3(%arg0: i32) -> (i32, i32) {
    %c0_i32 = arith.constant 0 : i32
    %c0_i32_0 = arith.constant 0 : i32
    %c0_i32_1 = arith.constant 0 : i32
    return %c0_i32, %c0_i32_0 : i32, i32
  }
  func.func @transform_4(%arg0: i32) -> (i32, i32) {
    %c0_i32 = arith.constant 0 : i32
    %c0_i32_0 = arith.constant 0 : i32
    %c0_i32_1 = arith.constant 0 : i32
    return %c0_i32, %c0_i32_0 : i32, i32
  }
  func.func @transform_5(%arg0: i32) -> (i32, i32) {
    %c0_i32 = arith.constant 0 : i32
    %c0_i32_0 = arith.constant 0 : i32
    %c0_i32_1 = arith.constant 0 : i32
    return %c0_i32, %c0_i32_0 : i32, i32
  }
  func.func @transform_6(%arg0: i32) -> (i32, i32) {
    %c0_i32 = arith.constant 0 : i32
    %c0_i32_0 = arith.constant 0 : i32
    %c0_i32_1 = arith.constant 0 : i32
    return %c0_i32, %c0_i32_0 : i32, i32
  }
  func.func @transform_7(%arg0: i32) -> (i32, i32, i32) {
    %c0_i32 = arith.constant 0 : i32
    %c0_i32_0 = arith.constant 0 : i32
    %c0_i32_1 = arith.constant 0 : i32
    return %arg0, %c0_i32, %c0_i32_0 : i32, i32, i32
  }
}

module attributes {stable_mosaic.version = 11 : i64} {
  func.func @_mlp_block_kernel(%arg0: i32, %arg1: memref<1x5x64xbf16, #tpu.memory_space<vmem>>, %arg2: memref<1x64xf32, #tpu.memory_space<vmem>>, %arg3: memref<1x64xf32, #tpu.memory_space<vmem>>, %arg4: memref<64x128xbf16, #tpu.memory_space<vmem>>, %arg5: memref<1x128xf32, #tpu.memory_space<vmem>>, %arg6: memref<128x64xbf16, #tpu.memory_space<vmem>>, %arg7: memref<1x64xf32, #tpu.memory_space<vmem>>, %arg8: memref<1x5x64xbf16, #tpu.memory_space<vmem>>) attributes {dimension_semantics = [#tpu.dimension_semantics<parallel>], iteration_bounds = array<i64: 2>, scalar_prefetch = 0 : i64, scratch_operands = 0 : i64, tpu.core_type = #tpu.core_type<tc>, window_params = [{transform_indices = @transform_0, window_bounds = array<i64: 1, 5, 64>}, {pipeline_mode = #tpu.pipeline_mode<synchronous>, transform_indices = @transform_1, window_bounds = array<i64: 1, 64>}, {pipeline_mode = #tpu.pipeline_mode<synchronous>, transform_indices = @transform_2, window_bounds = array<i64: 1, 64>}, {pipeline_mode = #tpu.pipeline_mode<synchronous>, transform_indices = @transform_3, window_bounds = array<i64: 64, 128>}, {pipeline_mode = #tpu.pipeline_mode<synchronous>, transform_indices = @transform_4, window_bounds = array<i64: 1, 128>}, {pipeline_mode = #tpu.pipeline_mode<synchronous>, transform_indices = @transform_5, window_bounds = array<i64: 128, 64>}, {pipeline_mode = #tpu.pipeline_mode<synchronous>, transform_indices = @transform_6, window_bounds = array<i64: 1, 64>}, {transform_indices = @transform_7, window_bounds = array<i64: 1, 5, 64>}]} {
    %c0 = arith.constant 0 : index
    %c0_0 = arith.constant 0 : index
    %c0_1 = arith.constant 0 : index
    %0 = vector.load %arg1[%c0, %c0_0, %c0_1] : memref<1x5x64xbf16, #tpu.memory_space<vmem>>, vector<1x5x64xbf16>
    %1 = vector.shape_cast %0 : vector<1x5x64xbf16> to vector<5x64xbf16>
    %2 = arith.extf %1 : vector<5x64xbf16> to vector<5x64xf32>
    %cst = arith.constant dense<0.000000e+00> : vector<5xf32>
    %3 = vector.multi_reduction <add>, %2, %cst [1] : vector<5x64xf32> to vector<5xf32>
    %4 = vector.shape_cast %3 : vector<5xf32> to vector<5x1xf32>
    %cst_2 = arith.constant 6.400000e+01 : f32
    %5 = vector.broadcast %cst_2 : f32 to vector<5x1xf32>
    %6 = arith.divf %4, %5 : vector<5x1xf32>
    %7 = vector.broadcast %6 : vector<5x1xf32> to vector<5x64xf32>
    %8 = arith.subf %2, %7 : vector<5x64xf32>
    %9 = arith.mulf %8, %8 : vector<5x64xf32>
    %cst_3 = arith.constant dense<0.000000e+00> : vector<5xf32>
    %10 = vector.multi_reduction <add>, %9, %cst_3 [1] : vector<5x64xf32> to vector<5xf32>
    %11 = vector.shape_cast %10 : vector<5xf32> to vector<5x1xf32>
    %cst_4 = arith.constant 6.400000e+01 : f32
    %12 = vector.broadcast %cst_4 : f32 to vector<5x1xf32>
    %13 = arith.divf %11, %12 : vector<5x1xf32>
    %cst_5 = arith.constant 9.99999974E-6 : f32
    %14 = vector.broadcast %cst_5 : f32 to vector<5x1xf32>
    %15 = arith.addf %13, %14 : vector<5x1xf32>
    %16 = math.rsqrt %15 : vector<5x1xf32>
    %17 = vector.broadcast %16 : vector<5x1xf32> to vector<5x64xf32>
    %18 = arith.mulf %8, %17 : vector<5x64xf32>
    %c0_6 = arith.constant 0 : index
    %c0_7 = arith.constant 0 : index
    %19 = vector.load %arg2[%c0_6, %c0_7] : memref<1x64xf32, #tpu.memory_space<vmem>>, vector<1x64xf32>
    %20 = vector.broadcast %19 : vector<1x64xf32> to vector<5x64xf32>
    %21 = arith.mulf %18, %20 : vector<5x64xf32>
    %c0_8 = arith.constant 0 : index
    %c0_9 = arith.constant 0 : index
    %22 = vector.load %arg3[%c0_8, %c0_9] : memref<1x64xf32, #tpu.memory_space<vmem>>, vector<1x64xf32>
    %23 = vector.broadcast %22 : vector<1x64xf32> to vector<5x64xf32>
    %24 = arith.addf %21, %23 : vector<5x64xf32>
    %25 = arith.truncf %24 : vector<5x64xf32> to vector<5x64xbf16>
    %c0_10 = arith.constant 0 : index
    %c0_11 = arith.constant 0 : index
    %26 = vector.load %arg7[%c0_10, %c0_11] : memref<1x64xf32, #tpu.memory_space<vmem>>, vector<1x64xf32>
    %27 = vector.broadcast %26 : vector<1x64xf32> to vector<5x64xf32>
    %28 = arith.addf %2, %27 : vector<5x64xf32>
    %c0_12 = arith.constant 0 : index
    %c0_13 = arith.constant 0 : index
    %29 = vector.load %arg4[%c0_12, %c0_13] : memref<64x128xbf16, #tpu.memory_space<vmem>>, vector<64x128xbf16>
    %cst_14 = arith.constant dense<0.000000e+00> : vector<5x128xf32>
    %30 = tpu.matmul %25, %29, %cst_14 {dimension_numbers = #tpu.dot_dimension_numbers<[1], [0], [0], [1], [0, 0, 1, 1], [], []>} : vector<5x64xbf16>, vector<64x128xbf16>, vector<5x128xf32> -> vector<5x128xf32>
    %c0_15 = arith.constant 0 : index
    %c0_16 = arith.constant 0 : index
    %31 = vector.load %arg5[%c0_15, %c0_16] : memref<1x128xf32, #tpu.memory_space<vmem>>, vector<1x128xf32>
    %32 = vector.broadcast %31 : vector<1x128xf32> to vector<5x128xf32>
    %33 = arith.addf %30, %32 : vector<5x128xf32>
    %cst_17 = arith.constant 1.702000e+00 : f32
    %34 = vector.broadcast %cst_17 : f32 to vector<5x128xf32>
    %35 = arith.mulf %34, %33 : vector<5x128xf32>
    %36 = arith.negf %35 : vector<5x128xf32>
    %37 = math.exp %36 : vector<5x128xf32>
    %cst_18 = arith.constant 1.000000e+00 : f32
    %38 = vector.broadcast %cst_18 : f32 to vector<5x128xf32>
    %39 = arith.addf %38, %37 : vector<5x128xf32>
    %40 = arith.divf %38, %39 : vector<5x128xf32>
    %41 = arith.mulf %33, %40 : vector<5x128xf32>
    %42 = arith.truncf %41 : vector<5x128xf32> to vector<5x128xbf16>
    %c0_19 = arith.constant 0 : index
    %c0_20 = arith.constant 0 : index
    %43 = vector.load %arg6[%c0_19, %c0_20] : memref<128x64xbf16, #tpu.memory_space<vmem>>, vector<128x64xbf16>
    %cst_21 = arith.constant dense<0.000000e+00> : vector<5x64xf32>
    %44 = tpu.matmul %42, %43, %cst_21 {dimension_numbers = #tpu.dot_dimension_numbers<[1], [0], [0], [1], [0, 0, 1, 1], [], []>} : vector<5x128xbf16>, vector<128x64xbf16>, vector<5x64xf32> -> vector<5x64xf32>
    %45 = arith.addf %28, %44 : vector<5x64xf32>
    %46 = arith.truncf %45 : vector<5x64xf32> to vector<5x64xbf16>
    %c0_22 = arith.constant 0 : index
    %c0_23 = arith.constant 0 : index
    %c0_24 = arith.constant 0 : index
    %47 = vector.load %arg8[%c0_22, %c0_23, %c0_24] : memref<1x5x64xbf16, #tpu.memory_space<vmem>>, vector<1x5x64xbf16>
    %48 = vector.shape_cast %47 : vector<1x5x64xbf16> to vector<5x64xbf16>
    %49 = vector.shape_cast %46 : vector<5x64xbf16> to vector<1x5x64xbf16>
    tpu.vector_store %arg8[%c0_22, %c0_23, %c0_24], %49 {strides = array<i32>} : memref<1x5x64xbf16, #tpu.memory_space<vmem>>, vector<1x5x64xbf16>,
    return
  }
  func.func @transform_0(%arg0: i32) -> (i32, i32, i32) {
    %c0_i32 = arith.constant 0 : i32
    %c0_i32_0 = arith.constant 0 : i32
    %c0_i32_1 = arith.constant 0 : i32
    return %arg0, %c0_i32, %c0_i32_0 : i32, i32, i32
  }
  func.func @transform_1(%arg0: i32) -> (i32, i32) {
    %c0_i32 = arith.constant 0 : i32
    %c0_i32_0 = arith.constant 0 : i32
    %c0_i32_1 = arith.constant 0 : i32
    return %c0_i32, %c0_i32_0 : i32, i32
  }
  func.func @transform_2(%arg0: i32) -> (i32, i32) {
    %c0_i32 = arith.constant 0 : i32
    %c0_i32_0 = arith.constant 0 : i32
    %c0_i32_1 = arith.constant 0 : i32
    return %c0_i32, %c0_i32_0 : i32, i32
  }
  func.func @transform_3(%arg0: i32) -> (i32, i32) {
    %c0_i32 = arith.constant 0 : i32
    %c0_i32_0 = arith.constant 0 : i32
    %c0_i32_1 = arith.constant 0 : i32
    return %c0_i32, %c0_i32_0 : i32, i32
  }
  func.func @transform_4(%arg0: i32) -> (i32, i32) {
    %c0_i32 = arith.constant 0 : i32
    %c0_i32_0 = arith.constant 0 : i32
    %c0_i32_1 = arith.constant 0 : i32
    return %c0_i32, %c0_i32_0 : i32, i32
  }
  func.func @transform_5(%arg0: i32) -> (i32, i32) {
    %c0_i32 = arith.constant 0 : i32
    %c0_i32_0 = arith.constant 0 : i32
    %c0_i32_1 = arith.constant 0 : i32
    return %c0_i32, %c0_i32_0 : i32, i32
  }
  func.func @transform_6(%arg0: i32) -> (i32, i32) {
    %c0_i32 = arith.constant 0 : i32
    %c0_i32_0 = arith.constant 0 : i32
    %c0_i32_1 = arith.constant 0 : i32
    return %c0_i32, %c0_i32_0 : i32, i32
  }
  func.func @transform_7(%arg0: i32) -> (i32, i32, i32) {
    %c0_i32 = arith.constant 0 : i32
    %c0_i32_0 = arith.constant 0 : i32
    %c0_i32_1 = arith.constant 0 : i32
    return %arg0, %c0_i32, %c0_i32_0 : i32, i32, i32
  }
}

module attributes {stable_mosaic.version = 11 : i64} {
  func.func @_ln_head_kernel(%arg0: i32, %arg1: memref<2x64xbf16, #tpu.memory_space<vmem>>, %arg2: memref<1x64xf32, #tpu.memory_space<vmem>>, %arg3: memref<1x64xf32, #tpu.memory_space<vmem>>, %arg4: memref<64x128xbf16, #tpu.memory_space<vmem>>, %arg5: memref<1x128xf32, #tpu.memory_space<vmem>>, %arg6: memref<2x128xf32, #tpu.memory_space<vmem>>) attributes {dimension_semantics = [#tpu.dimension_semantics<parallel>], iteration_bounds = array<i64: 1>, scalar_prefetch = 0 : i64, scratch_operands = 0 : i64, tpu.core_type = #tpu.core_type<tc>, window_params = [{pipeline_mode = #tpu.pipeline_mode<synchronous>, transform_indices = @transform_0, window_bounds = array<i64: 2, 64>}, {pipeline_mode = #tpu.pipeline_mode<synchronous>, transform_indices = @transform_1, window_bounds = array<i64: 1, 64>}, {pipeline_mode = #tpu.pipeline_mode<synchronous>, transform_indices = @transform_2, window_bounds = array<i64: 1, 64>}, {pipeline_mode = #tpu.pipeline_mode<synchronous>, transform_indices = @transform_3, window_bounds = array<i64: 64, 128>}, {pipeline_mode = #tpu.pipeline_mode<synchronous>, transform_indices = @transform_4, window_bounds = array<i64: 1, 128>}, {pipeline_mode = #tpu.pipeline_mode<synchronous>, transform_indices = @transform_5, window_bounds = array<i64: 2, 128>}]} {
    %c0 = arith.constant 0 : index
    %c0_0 = arith.constant 0 : index
    %0 = vector.load %arg1[%c0, %c0_0] : memref<2x64xbf16, #tpu.memory_space<vmem>>, vector<2x64xbf16>
    %1 = arith.extf %0 : vector<2x64xbf16> to vector<2x64xf32>
    %cst = arith.constant dense<0.000000e+00> : vector<2xf32>
    %2 = vector.multi_reduction <add>, %1, %cst [1] : vector<2x64xf32> to vector<2xf32>
    %3 = vector.shape_cast %2 : vector<2xf32> to vector<2x1xf32>
    %cst_1 = arith.constant 6.400000e+01 : f32
    %4 = vector.broadcast %cst_1 : f32 to vector<2x1xf32>
    %5 = arith.divf %3, %4 : vector<2x1xf32>
    %6 = vector.broadcast %5 : vector<2x1xf32> to vector<2x64xf32>
    %7 = arith.subf %1, %6 : vector<2x64xf32>
    %8 = arith.mulf %7, %7 : vector<2x64xf32>
    %cst_2 = arith.constant dense<0.000000e+00> : vector<2xf32>
    %9 = vector.multi_reduction <add>, %8, %cst_2 [1] : vector<2x64xf32> to vector<2xf32>
    %10 = vector.shape_cast %9 : vector<2xf32> to vector<2x1xf32>
    %cst_3 = arith.constant 6.400000e+01 : f32
    %11 = vector.broadcast %cst_3 : f32 to vector<2x1xf32>
    %12 = arith.divf %10, %11 : vector<2x1xf32>
    %cst_4 = arith.constant 9.99999974E-6 : f32
    %13 = vector.broadcast %cst_4 : f32 to vector<2x1xf32>
    %14 = arith.addf %12, %13 : vector<2x1xf32>
    %15 = math.rsqrt %14 : vector<2x1xf32>
    %16 = vector.broadcast %15 : vector<2x1xf32> to vector<2x64xf32>
    %17 = arith.mulf %7, %16 : vector<2x64xf32>
    %c0_5 = arith.constant 0 : index
    %c0_6 = arith.constant 0 : index
    %18 = vector.load %arg2[%c0_5, %c0_6] : memref<1x64xf32, #tpu.memory_space<vmem>>, vector<1x64xf32>
    %19 = vector.broadcast %18 : vector<1x64xf32> to vector<2x64xf32>
    %20 = arith.mulf %17, %19 : vector<2x64xf32>
    %c0_7 = arith.constant 0 : index
    %c0_8 = arith.constant 0 : index
    %21 = vector.load %arg3[%c0_7, %c0_8] : memref<1x64xf32, #tpu.memory_space<vmem>>, vector<1x64xf32>
    %22 = vector.broadcast %21 : vector<1x64xf32> to vector<2x64xf32>
    %23 = arith.addf %20, %22 : vector<2x64xf32>
    %24 = arith.truncf %23 : vector<2x64xf32> to vector<2x64xbf16>
    %c0_9 = arith.constant 0 : index
    %c0_10 = arith.constant 0 : index
    %25 = vector.load %arg4[%c0_9, %c0_10] : memref<64x128xbf16, #tpu.memory_space<vmem>>, vector<64x128xbf16>
    %cst_11 = arith.constant dense<0.000000e+00> : vector<2x128xf32>
    %26 = tpu.matmul %24, %25, %cst_11 {dimension_numbers = #tpu.dot_dimension_numbers<[1], [0], [0], [1], [0, 0, 1, 1], [], []>} : vector<2x64xbf16>, vector<64x128xbf16>, vector<2x128xf32> -> vector<2x128xf32>
    %c0_12 = arith.constant 0 : index
    %c0_13 = arith.constant 0 : index
    %27 = vector.load %arg5[%c0_12, %c0_13] : memref<1x128xf32, #tpu.memory_space<vmem>>, vector<1x128xf32>
    %28 = vector.broadcast %27 : vector<1x128xf32> to vector<2x128xf32>
    %29 = arith.addf %26, %28 : vector<2x128xf32>
    %c0_14 = arith.constant 0 : index
    %c0_15 = arith.constant 0 : index
    %30 = vector.load %arg6[%c0_14, %c0_15] : memref<2x128xf32, #tpu.memory_space<vmem>>, vector<2x128xf32>
    tpu.vector_store %arg6[%c0_14, %c0_15], %29 {strides = array<i32>} : memref<2x128xf32, #tpu.memory_space<vmem>>, vector<2x128xf32>,
    return
  }
  func.func @transform_0(%arg0: i32) -> (i32, i32) {
    %c0_i32 = arith.constant 0 : i32
    %c0_i32_0 = arith.constant 0 : i32
    %c0_i32_1 = arith.constant 0 : i32
    return %c0_i32, %c0_i32_0 : i32, i32
  }
  func.func @transform_1(%arg0: i32) -> (i32, i32) {
    %c0_i32 = arith.constant 0 : i32
    %c0_i32_0 = arith.constant 0 : i32
    %c0_i32_1 = arith.constant 0 : i32
    return %c0_i32, %c0_i32_0 : i32, i32
  }
  func.func @transform_2(%arg0: i32) -> (i32, i32) {
    %c0_i32 = arith.constant 0 : i32
    %c0_i32_0 = arith.constant 0 : i32
    %c0_i32_1 = arith.constant 0 : i32
    return %c0_i32, %c0_i32_0 : i32, i32
  }
  func.func @transform_3(%arg0: i32) -> (i32, i32) {
    %c0_i32 = arith.constant 0 : i32
    %c0_i32_0 = arith.constant 0 : i32
    %c0_i32_1 = arith.constant 0 : i32
    return %c0_i32, %c0_i32_0 : i32, i32
  }
  func.func @transform_4(%arg0: i32) -> (i32, i32) {
    %c0_i32 = arith.constant 0 : i32
    %c0_i32_0 = arith.constant 0 : i32
    %c0_i32_1 = arith.constant 0 : i32
    return %c0_i32, %c0_i32_0 : i32, i32
  }
  func.func @transform_5(%arg0: i32) -> (i32, i32) {
    %c0_i32 = arith.constant 0 : i32
    %c0_i32_0 = arith.constant 0 : i32
    %c0_i32_1 = arith.constant 0 : i32
    return %c0_i32, %c0_i32_0 : i32, i32
  }
}

</mosaic_0001>

<bundles_post_ra>
// kernel: tpu_custom_call.1
= control target key start
LH: loop header
LB: loop body
LE: loop exit
PB: predicated region body
PF: predicated region fallthrough
CT: control target
= control target key end

     0   :  { %6 = vsyncpa [#allocation3], 0  ;;  %s125_s0 = inlined_call_operand.hbm [shape: f32[8,128], index: 0, kind: input, shape index: {}]   ;;  %s126_s1 = inlined_call_operand.hbm [shape: f32[8,128], index: 1, kind: output, shape index: {}]  }
   0x1   :  { %7 = vsyncpa [#allocation4], 0  ;;  %s89_s6 = smov [#allocation2]   ;;  %s41_s10 = scalar_lea.hbm %s125_s0, 128 }
   0x2   :  { %s14_s7 = sshll.u32 %s89_s6, 4  ;;  %p42_p0 = scmp.ne.s32.totalorder %s125_s0, %s41_s10  ;;  %s15_s7 = int_to_ptr.vmem [resolvable:$true] %s14_s7 }
   0x3   :  { %p45_p1 = scmp.lt.u32.totalorder %s41_s10, %s125_s0 }
   0x5   :  { %p47_p2 = pnand %p45_p1, %p42_p0 }
   0x7   :  { %50 = shalt.err (!%p47_p2)
}
   0x8   :  { %s51_s15 = scalar_lea.vmem %s15_s7, 128  ;;  %p56_p4 = scmp.lt.s32.totalorder %s15_s7, %s15_s7 }
   0x9   :  { %p52_p3 = scmp.ne.s32.totalorder %s15_s7, %s51_s15  ;;  %p57_p5 = scmp.lt.s32.totalorder %s51_s15, %s51_s15 }
   0xb   :  { %p58_p6 = por %p57_p5, %p56_p4 }
   0xd   :  { %p59_p7 = pnand %p58_p6, %p52_p3 }
   0xf   :  { %62 = shalt.err (!%p59_p7)
}
  0x10   :  { %17 = dma.hbm_to_vmem [thread:$0]  %s125_s0, 128, %s15_s7, [#allocation3]  }
  0x11   :  { %85 = dma.done.wait [#allocation3], 128  }
  0x12   :  { %86 = vsyncadd [#allocation3], 4294967168  ;;  %s90_s18 = smov [#allocation5]   ;;  %v21_v0 = vld [vmem:[#allocation2] sm:$0xff] }
  0x13   :  { %s30_s19 = sshll.u32 %s90_s18, 4  ;;  %v22_v1 = vadd.f32 1.0, %v21_v0  ;;  %s31_s19 = int_to_ptr.vmem [resolvable:$true] %s30_s19 }
  0x14   :  { %s63_s20 = scalar_lea.vmem %s31_s19, 128  ;;  %p68_p9 = scmp.lt.s32.totalorder %s31_s19, %s31_s19 }
  0x15   :  { %23 = vst [vmem:[#allocation5] sm:$0xff] %v22_v1  ;;  %p64_p8 = scmp.ne.s32.totalorder %s31_s19, %s63_s20  ;;  %p69_p10 = scmp.lt.s32.totalorder %s63_s20, %s63_s20 }
  0x17   :  { %p70_p11 = por %p69_p10, %p68_p9 }
  0x19   :  { %p71_p12 = pnand %p70_p11, %p64_p8 }
  0x1b   :  { %74 = shalt.err (!%p71_p12)
}
  0x1c   :  { %s75_s23 = scalar_lea.hbm %s126_s1, 128 }
  0x1d   :  { %p76_p13 = scmp.ne.s32.totalorder %s126_s1, %s75_s23  ;;  %p79_p0 = scmp.lt.u32.totalorder %s75_s23, %s126_s1 }
  0x1f   :  { %p81_p1 = pnand %p79_p0, %p76_p13 }
  0x21   :  { %84 = shalt.err (!%p81_p1)
}
  0x22   :  { %33 = dma.vmem_to_hbm [thread:$0]  %s31_s19, 128, %s126_s1, [#allocation4]  }
  0x23   :  { %87 = dma.done.wait [#allocation4], 128  }
  0x24   :  { %88 = vsyncadd [#allocation4], 4294967168 }
  0x25   :  { %37 = vsyncpa [#allocation3], 1 }
  0x26   :  { %38 = vsyncpa [#allocation4], 1 }

// kernel: clip_classifier_forward.8
= control target key start
LH: loop header
LB: loop body
LE: loop exit
PB: predicated region body
PF: predicated region fallthrough
CT: control target
= control target key end

     0   :  { %9 = vsyncpa [#allocation3], 0  ;;  %s982_s0 = inlined_call_operand.hbm [shape: bf16[2,5,64], index: 0, kind: input, shape index: {}]   ;;  %s983_s1 = inlined_call_operand.hbm [shape: f32[1,5,64], index: 1, kind: input, shape index: {}]   ;;  %s984_s2 = inlined_call_operand.hbm [shape: f32[1,64], index: 2, kind: input, shape index: {}]   ;;  %s985_s3 = inlined_call_operand.hbm [shape: f32[1,64], index: 3, kind: input, shape index: {}]   ;;  %s986_s4 = inlined_call_operand.hbm [shape: bf16[2,5,64], index: 4, kind: output, shape index: {}]  }
   0x1   :  { %11 = vsyncpa [#allocation3 + $0x1], 0 }
   0x2   :  { %12 = vsyncpa [#allocation6], 0 }
   0x3   :  { %13 = vsyncpa [#allocation9], 0 }
   0x4   :  { %14 = vsyncpa [#allocation4], 0 }
   0x5   :  { %16 = vsyncpa [#allocation4 + $0x1], 0  ;;  %s725_s15 = smov 0   ;;  %s727_s16 = smov 0  }
   0x6   :  { %s729_s17 = smov 0   ;;  %s731_s18 = smov 0  }
   0x7 LB: > { %s746_s19 = sadd.s32 4294967295, %s693_s18   ;;  %s406_s20 = sadd.s32 4294967294, %s693_s18   ;;  %s693_s18 = sphi %s731_s18, %s1009_s18   ;;  %s689_s17 = sphi %s729_s17, %s1008_s17   ;;  %s685_s16 = sphi %s727_s16, %s1007_s16   ;;  %s681_s15 = sphi %s725_s15, %s1006_s15  }
   0x8   : > { %p42_p0 = scmp.ne.s32.totalorder %s685_s16, %s681_s15  ;;  %p987_p1 = scmp.eq.s32.totalorder %s746_s19, 0 }
   0x9   : > { %p135_p3 = scmp.eq.s32.totalorder %s406_s20, 1  ;;  %p407_p5 = scmp.ge.s32.totalorder %s693_s18, 1 }
   0xa   : > { %p755_p4 = por %p987_p1, %p42_p0  ;;  %p142_p7 = scmp.lt.s32.totalorder %s693_s18, 3 }
   0xb   : > { %p760_p6 = por %p135_p3, %p42_p0  ;;  %s695_s24 = smov [#allocation5]  }
   0xc   : > { %s990_s21 = scalar_select %p755_p4, 1, 0 }
   0xd   : > { %s991_s22 = scalar_select %p760_p6, 1, 0 }
   0xe   : > { %p765_p8 = pnand %p407_p5, %p142_p7  ;;  %s155_s25 = sshll.u32 %s695_s24, 4  ;;  %s156_s25 = int_to_ptr.vmem [resolvable:$true] %s155_s25 }
   0xf   : > { %s696_s26 = smov [#allocation7]   ;;  %s697_s29 = smov [#allocation8]  }
  0x10   : > { %s992_s23 = scalar_select %p765_p8, 1, 0 }
  0x11   : > { %p442_p10 = pneg %p765_p8  ;;  %s166_s27 = sshll.u32 %s696_s26, 4  ;;  %s778_s27 = int_to_ptr.vmem [resolvable:$true] %s166_s27 }
  0x12   : > { %s177_s30 = sshll.u32 %s697_s29, 4  ;;  %s505_s7 = scalar_lea.hbm %s983_s1, 128  ;;  %s780_s30 = int_to_ptr.vmem [resolvable:$true] %s177_s30 }
  0x13   : > { %p774_p11 = pnand %p442_p10, %p987_p1  ;;  %p506_p12 = scmp.ne.s32.totalorder %s983_s1, %s505_s7 }
  0x14   : > { %p512_p5 = scmp.lt.u32.totalorder %s505_s7, %s983_s1 }
  0x15   : > { %p790_p13 = pneg %p774_p11 }
  0x17   : > { %p508_p0 = pnand %p790_p13, %p506_p12 }
  0x19   : > { %p509_p3 = pneg %p508_p0 }
  0x1b   : > { %p514_p7 = pnand %p512_p5, %p509_p3 }
  0x1d   : > { %517 = shalt.err (!%p514_p7)
}
  0x1e   : > { %s518_s13 = scalar_lea.vmem %s156_s25, 128  ;;  %p526_p2 = scmp.lt.s32.totalorder %s156_s25, %s156_s25 }
  0x1f   : > { %p519_p10 = scmp.ne.s32.totalorder %s156_s25, %s518_s13  ;;  %p527_p6 = scmp.lt.s32.totalorder %s518_s13, %s518_s13 }
  0x21   : > { %p521_p9 = pnand %p519_p10, %p790_p13  ;;  %p528_p4 = por %p527_p6, %p526_p2 }
  0x23   : > { %p522_p1 = pneg %p521_p9 }
  0x25   : > { %p529_p8 = pnand %p528_p4, %p522_p1 }
  0x27   : > { %532 = shalt.err (!%p529_p8)
}
  0x28   : > { %445 = dma.hbm_to_vmem [thread:$0]  (!%p774_p11), %s983_s1, 128, %s156_s25, [#allocation6]  }
  0x29   : > { %s533_s29 = scalar_lea.hbm %s984_s2, 16 }
  0x2a   : > { %p534_p9 = scmp.ne.s32.totalorder %s984_s2, %s533_s29  ;;  %p540_p1 = scmp.lt.u32.totalorder %s533_s29, %s984_s2 }
  0x2c   : > { %p536_p12 = pnand %p534_p9, %p790_p13 }
  0x2e   : > { %p537_p2 = pneg %p536_p12 }
  0x30   : > { %p542_p4 = pnand %p540_p1, %p537_p2 }
  0x32   : > { %545 = shalt.err (!%p542_p4)
}
  0x33   : > { %s546_s25 = scalar_lea.vmem %s778_s27, 16  ;;  %s553_s9 = scalar_lea.vmem %s778_s27, 32 }
  0x34   : > { %p547_p6 = scmp.ne.s32.totalorder %s778_s27, %s546_s25  ;;  %p554_p3 = scmp.lt.s32.totalorder %s778_s27, %s778_s27 }
  0x35   : > { %p555_p5 = scmp.lt.s32.totalorder %s553_s9, %s546_s25 }
  0x36   : > { %p549_p8 = pnand %p547_p6, %p790_p13 }
  0x37   : > { %p556_p7 = por %p555_p5, %p554_p3 }
  0x38   : > { %p550_p0 = pneg %p549_p8 }
  0x3a   : > { %p557_p10 = pnand %p556_p7, %p550_p0 }
  0x3c   : > { %560 = shalt.err (!%p557_p10)
}
  0x3d   : > { %448 = dma.hbm_to_vmem [thread:$0]  (!%p774_p11), %s984_s2, 16, %s778_s27, [#allocation6]  }
  0x3e   : > { %s561_s20 = scalar_lea.hbm %s985_s3, 16 }
  0x3f   : > { %p562_p9 = scmp.ne.s32.totalorder %s985_s3, %s561_s20  ;;  %p568_p1 = scmp.lt.u32.totalorder %s561_s20, %s985_s3 }
  0x41   : > { %p564_p12 = pnand %p562_p9, %p790_p13 }
  0x43   : > { %p565_p2 = pneg %p564_p12 }
  0x45   : > { %p570_p4 = pnand %p568_p1, %p565_p2 }
  0x47   : > { %573 = shalt.err (!%p570_p4)
}
  0x48   : > { %s574_s27 = scalar_lea.vmem %s780_s30, 16  ;;  %s581_s6 = scalar_lea.vmem %s780_s30, 32 }
  0x49   : > { %p575_p6 = scmp.ne.s32.totalorder %s780_s30, %s574_s27  ;;  %p582_p3 = scmp.lt.s32.totalorder %s780_s30, %s780_s30 }
  0x4a   : > { %p583_p5 = scmp.lt.s32.totalorder %s581_s6, %s574_s27 }
  0x4b   : > { %p577_p8 = pnand %p575_p6, %p790_p13 }
  0x4c   : > { %p584_p7 = por %p583_p5, %p582_p3 }
  0x4d   : > { %p578_p0 = pneg %p577_p8 }
  0x4f   : > { %p585_p10 = pnand %p584_p7, %p578_p0 }
  0x51   : > { %588 = shalt.err (!%p585_p10)
}
  0x52   : > { %451 = dma.hbm_to_vmem [thread:$0]  (!%p774_p11), %s985_s3, 16, %s780_s30, [#allocation9]  }
  0x53   : > { %s855_s10 = sadd.s32 1, %s693_s18   ;;  %s29_s25 = sadd.s32 1, %s689_s17 }
  0x54   : > { %s26_s28 = ssub.s32 %s693_s18, %s855_s10  ;;  %p36_p9 = scmp.ne.s32.totalorder %s689_s17, %s685_s16 }
  0x55   : > { %p27_p13 = scmp.eq.s32.totalorder %s26_s28, 0  ;;  %p37_p12 = scmp.eq.s32.totalorder %s693_s18, 0 }
  0x56   : > { %p463_p2 = scmp.lt.s32.totalorder %s693_s18, 2  ;;  %p995_p4 = scmp.eq.s32.totalorder %s746_s19, 1 }
  0x57   : > { %s865_s9 = scalar_select %p27_p13, %s689_s17, %s29_s25  }
  0x58   : > { %p38_p1 = por %p37_p12, %p36_p9  ;;  %p869_p6 = por %p995_p4, %p36_p9 }
  0x59   : > { %s188_s12 = sand.u32 1, %s689_s17   ;;  %s413_s13 = sshll.u32 %s693_s18, 6 }
  0x5a   : > { %s412_s30 = sshll.u32 %s188_s12, 2  ;;  %s878_s24 = scalar_lea.hbm %s982_s0, %s413_s13 }
  0x5b   : > { %s192_s26 = scalar_lea.vmem [#allocation2], %s412_s30  ;;  %p880_p11 = pnand %p463_p2, %p38_p1 }
  0x5c   : > { %s199_s29 = sshll.u32 %s192_s26, 4  ;;  %s189_s27 = scalar_lea.sflag [#allocation3], %s188_s12  ;;  %s884_s29 = int_to_ptr.vmem [resolvable:$true] %s199_s29 }
  0x5d   : > { %s589_s6 = scalar_lea.hbm %s878_s24, 64  ;;  %p591_p0 = pneg %p880_p11 }
  0x5e   : > { %p590_p8 = scmp.ne.s32.totalorder %s878_s24, %s589_s6  ;;  %s594_s28 = scalar_lea.hbm %s982_s0, 128 }
  0x5f   : > { %p595_p7 = scmp.lt.u32.totalorder %s878_s24, %s982_s0  ;;  %p596_p10 = scmp.lt.u32.totalorder %s594_s28, %s589_s6 }
  0x60   : > { %p592_p3 = pnand %p591_p0, %p590_p8  ;;  %p598_p9 = scmp.lt.u32.totalorder %s589_s6, %s878_s24 }
  0x61   : > { %p597_p13 = por %p596_p10, %p595_p7 }
  0x62   : > { %p593_p5 = pneg %p592_p3 }
  0x63   : > { %p599_p12 = por %p598_p9, %p597_p13 }
  0x65   : > { %p600_p2 = pnand %p599_p12, %p593_p5 }
  0x67   : > { %603 = shalt.err (!%p600_p2)
}
  0x68   : > { %s604_s12 = scalar_lea.vmem %s884_s29, 64  ;;  %s698_s30 = smov [#allocation2]  }
  0x69   : > { %p605_p1 = scmp.ne.s32.totalorder %s884_s29, %s604_s12  ;;  %s609_s14 = sshll.u32 %s698_s30, 4  ;;  %s610_s14 = int_to_ptr.vmem [resolvable:$false] %s609_s14 }
  0x6a   : > { %s611_s20 = scalar_lea.vmem %s610_s14, 128  ;;  %p612_p3 = scmp.lt.s32.totalorder %s884_s29, %s610_s14 }
  0x6b   : > { %p607_p4 = pnand %p605_p1, %p591_p0  ;;  %p613_p7 = scmp.lt.s32.totalorder %s611_s20, %s604_s12 }
  0x6d   : > { %p608_p8 = pneg %p607_p4  ;;  %p614_p10 = por %p613_p7, %p612_p3 }
  0x6f   : > { %p615_p13 = pnand %p614_p10, %p608_p8 }
  0x71   : > { %618 = shalt.err (!%p615_p13)
}
  0x72   : > { %455 = dma.hbm_to_vmem [thread:$0]  (!%p880_p11), %s878_s24, 64, %s884_s29, %s189_s27  }
  0x73   : > { %p998_p5 = scmp.ne.s32.totalorder %s992_s23, 0 }
  0x74   : > { %s914_s26 = sand.u32 (!%p998_p5), 1, %s685_s16   ;;  %p999_p0 = scmp.ne.s32.totalorder (!%p998_p5), %s990_s21, 0 }
  0x75   : > { %208 = sbr.rel (%p998_p5) target bundleno = 467 (0x1d3), region = 36  ;;  %s415_s6 = sshll.u32 (!%p998_p5), %s914_s26, 2 }
  0x76   : > { %s211_s7 = scalar_lea.sflag (!%p998_p5), [#allocation3], %s914_s26  ;;  %s214_s8 = scalar_lea.vmem (!%p998_p5), [#allocation2], %s415_s6 }
  0x7c   : > { %664 = dma.done.wait (%p999_p0), %s211_s7, 64  }
  0x7d   : > { %666 = vsyncadd (%p999_p0), %s211_s7, 4294967232  ;;  %p1000_p11 = scmp.eq.s32.totalorder %s746_s19, 0 }
  0x7f   : > { %668 = dma.done.wait (%p1000_p11), [#allocation6], 144   ;;  %p1001_p9 = pmov %p1000_p11 }
  0x81   : > { %670 = vsyncadd (%p1001_p9), [#allocation6], 4294967152  ;;  %p1002_p12 = pmov %p1001_p9 }
  0x82   : > { %p1003_p2 = pmov %p1001_p9 }
  0x83   : > { %672 = dma.done.wait (%p1002_p12), [#allocation9], 16  }
  0x84   : > { %674 = vsyncadd (%p1003_p2), [#allocation9], 4294967280  ;;  %v251_v0 = vld [vmem:[%s214_s8] sm:$0x7]  ;;  %v253_v1 = vld [vmem:[#allocation5] sm:$0x1f] }
  0x85   : > { %v252_v2 = vunpack.c.l.bf16 %v251_v0  ;;  %vm255_vm0 = vcmask 520192   ;;  %v420_v14 = vld [vmem:[#allocation7] ss:$0 sm:$0xff]  ;;  %v421_v16 = vld [vmem:[#allocation8] ss:$0 sm:$0xff]  ;;  %vm287_vm1 = vcmask 518144  }
  0x86   : > { %vm288_vm2 = vsmask.f32 2304  ;;  %s423_s21 = sshll.u32 %s746_s19, 6  ;;  %s250_s23 = scalar_lea.vmem [#allocation10], %s415_s6 }
  0x87   : > { %v254_v3 = vadd.f32 %v253_v1, %v252_v2  ;;  %s307_s24 = sshll.u32 %s250_s23, 4  ;;  %vm289_vm3 = vmand %vm287_vm1, %vm288_vm2  ;;  %v290_v19 = vld [vmem:[%s250_s23] sm:$0x7]  ;;  %s938_s27 = scalar_lea.hbm %s986_s4, %s423_s21  ;;  %s940_s24 = int_to_ptr.vmem [resolvable:$true] %s307_s24 }
  0x88   : > { %s294_s28 = scalar_lea.sflag [#allocation4], %s914_s26  ;;  %s619_s19 = scalar_lea.vmem %s940_s24, 64 }
  0x89   : > { %v256_v4 = vsel %vm255_vm0, %v254_v3, 0.0  ;;  %p620_p1 = scmp.ne.s32.totalorder %s940_s24, %s619_s19  ;;  %s699_s25 = smov [#allocation10]  }
  0x8a   : > { %257 = vadd.xlane.f32.xlu0 %v256_v4  ;;  %s623_s13 = sshll.u32 %s699_s25, 4  ;;  %s624_s13 = int_to_ptr.vmem [resolvable:$false] %s623_s13 }
  0x8b   : > { %p621_p4 = pnand %p620_p1, %p869_p6  ;;  %s625_s12 = scalar_lea.vmem %s624_s13, 128 }
  0x8c   : > { %p626_p3 = scmp.lt.s32.totalorder %s940_s24, %s624_s13  ;;  %p627_p7 = scmp.lt.s32.totalorder %s625_s12, %s619_s19 }
  0x8d   : > { %p622_p8 = pneg %p621_p4 }
  0x8e   : > { %p628_p10 = por %p627_p7, %p626_p3 }
  0x90   : > { %p629_p13 = pnand %p628_p10, %p622_p8 }
 0x117   : > { %v258_v5 = vpop.xlane.xlu0 %257 }
 0x118   : > { %v260_v6 = vmul.f32 0.015625, %v258_v5 }
 0x11a   : > { %v261_v7 = vsub.f32 %v254_v3, %v260_v6 }
 0x11c   : > { %v262_v8 = vmul.f32 %v261_v7, %v261_v7 }
 0x11e   : > { %v263_v9 = vsel %vm255_vm0, %v262_v8, 0.0 }
 0x11f   : > { %264 = vadd.xlane.f32.xlu0 %v263_v9 }
 0x1ac   : > { %v265_v10 = vpop.xlane.xlu0 %264 }
 0x1ad   : > { %v266_v11 = vmul.f32 0.015625, %v265_v10 }
 0x1af   : > { %v267_v12 = vadd.f32 1e-05, %v266_v11 }
 0x1b1   : > { %503 = vrsqrt.f32 %v267_v12 }
 0x1bb   : > { %v504_v13 = vpop.eup %503 }
 0x1bc   : > { %v269_v15 = vmul.f32 %v504_v13, %v261_v7 }
 0x1be   : > { %v277_v17 = vmul.f32 %v420_v14, %v269_v15 }
 0x1c0   : > { %v285_v18 = vadd.f32 %v421_v16, %v277_v17 }
 0x1c2   : > { %v286_v20 = vpack.c.bf16 %v285_v18, %v285_v18 }
 0x1c4   : > { %v291_v21 = vsel %vm289_vm3, %v286_v20, %v290_v19 }
 0x1c5   : > { %292 = vst [vmem:[%s250_s23] sm:$0x7] %v291_v21 }
 0x1c6   : > { %632 = shalt.err (!%p629_p13)
}
 0x1c7   : > { %s633_s30 = scalar_lea.hbm %s938_s27, 64  ;;  %s637_s26 = scalar_lea.hbm %s986_s4, 128 }
 0x1c8   : > { %p634_p5 = scmp.ne.s32.totalorder %s938_s27, %s633_s30  ;;  %p638_p9 = scmp.lt.u32.totalorder %s938_s27, %s986_s4 }
 0x1c9   : > { %p639_p12 = scmp.lt.u32.totalorder %s637_s26, %s633_s30  ;;  %p641_p1 = scmp.lt.u32.totalorder %s633_s30, %s938_s27 }
 0x1ca   : > { %p635_p0 = pnand %p634_p5, %p869_p6 }
 0x1cb   : > { %p640_p2 = por %p639_p12, %p638_p9 }
 0x1cc   : > { %p636_p11 = pneg %p635_p0 }
 0x1cd   : > { %p642_p4 = por %p641_p1, %p640_p2 }
 0x1cf   : > { %p643_p8 = pnand %p642_p4, %p636_p11 }
 0x1d1   : > { %646 = shalt.err (!%p643_p8)
}
 0x1d2   : > { %440 = dma.vmem_to_hbm [thread:$0]  (%p869_p6), %s940_s24, 64, %s938_s27, %s294_s28  }
 0x1d3 PF: > { %s319_s8 = sand.u32 1, %s681_s15   ;;  %p1004_p3 = scmp.ne.s32.totalorder %s991_s22, 0 }
 0x1d4   : > { %p1005_p7 = scmp.ge.s32.totalorder %s693_s18, 2  ;;  %s320_s21 = scalar_lea.sflag [#allocation4], %s319_s8 }
 0x1d6   : > { %p457_p10 = pnand %p1005_p7, %p1004_p3 }
 0x1d8   : > { %676 = dma.done.wait (!%p457_p10), %s320_s21, 64  }
 0x1d9   : > { %678 = vsyncadd (!%p457_p10), %s320_s21, 4294967232  ;;  %p19_p13 = scmp.ge.s32.totalorder %s855_s10, 4   ;;  %s1006_s15 = smov %s685_s16 }
 0x1da   : > { %s1007_s16 = smov %s689_s17  ;;  %s1008_s17 = smov %s865_s9 }
 0x1db   : > { %s1009_s18 = smov %s855_s10  ;;  %21 = sbr.rel (!%p19_p13) target bundleno = 7 (0x7), region = 93 }
 0x1e2   :  { %325 = vsyncpa [#allocation3], 1 }
 0x1e3   :  { %327 = vsyncpa [#allocation3 + $0x1], 1 }
 0x1e4   :  { %328 = vsyncpa [#allocation6], 1 }
 0x1e5   :  { %329 = vsyncpa [#allocation9], 1 }
 0x1e6   :  { %330 = vsyncpa [#allocation4], 1 }
 0x1e7   :  { %332 = vsyncpa [#allocation4 + $0x1], 1 }

// kernel: clip_classifier_forward.7
= control target key start
LH: loop header
LB: loop body
LE: loop exit
PB: predicated region body
PF: predicated region fallthrough
CT: control target
= control target key end

     0   :  { %7 = vsyncpa [#allocation3], 0  ;;  %s874_s0 = inlined_call_operand.hbm [shape: bf16[2,4,192], index: 0, kind: input, shape index: {}]   ;;  %s875_s1 = inlined_call_operand.hbm [shape: bf16[192,64], index: 1, kind: input, shape index: {}]   ;;  %s876_s2 = inlined_call_operand.hbm [shape: bf16[2,4,64], index: 2, kind: output, shape index: {}]  }
   0x1   :  { %9 = vsyncpa [#allocation3 + $0x1], 0 }
   0x2   :  { %10 = vsyncpa [#allocation6], 0 }
   0x3   :  { %11 = vsyncpa [#allocation4], 0 }
   0x4   :  { %13 = vsyncpa [#allocation4 + $0x1], 0  ;;  %s677_s9 = smov 0   ;;  %s679_s10 = smov 0  }
   0x5   :  { %s681_s11 = smov 0   ;;  %s683_s12 = smov 0  }
   0x6 LB: > { %s698_s13 = sadd.s32 4294967295, %s654_s12   ;;  %s424_s14 = sadd.s32 4294967294, %s654_s12   ;;  %s654_s12 = sphi %s683_s12, %s896_s12   ;;  %s650_s11 = sphi %s681_s11, %s895_s11   ;;  %s646_s10 = sphi %s679_s10, %s894_s10   ;;  %s642_s9 = sphi %s677_s9, %s893_s9  }
   0x7   : > { %p39_p0 = scmp.ne.s32.totalorder %s646_s10, %s642_s9  ;;  %p877_p1 = scmp.eq.s32.totalorder %s698_s13, 0 }
   0x8   : > { %p90_p3 = scmp.eq.s32.totalorder %s424_s14, 1  ;;  %p425_p5 = scmp.ge.s32.totalorder %s654_s12, 1 }
   0x9   : > { %p707_p4 = por %p877_p1, %p39_p0  ;;  %p97_p7 = scmp.lt.s32.totalorder %s654_s12, 3 }
   0xa   : > { %p712_p6 = por %p90_p3, %p39_p0  ;;  %s656_s18 = smov [#allocation5]  }
   0xb   : > { %s880_s15 = scalar_select %p707_p4, 1, 0 }
   0xc   : > { %s881_s16 = scalar_select %p712_p6, 1, 0 }
   0xd   : > { %p717_p8 = pnand %p425_p5, %p97_p7  ;;  %s109_s19 = sshll.u32 %s656_s18, 4  ;;  %s721_s19 = int_to_ptr.vmem [resolvable:$true] %s109_s19 }
   0xe   : > { %s733_s21 = sadd.s32 1, %s654_s12   ;;  %s26_s22 = sadd.s32 1, %s650_s11 }
   0xf   : > { %s882_s17 = scalar_select %p717_p8, 1, 0 }
  0x10   : > { %p462_p9 = pneg %p717_p8  ;;  %s23_s23 = ssub.s32 %s654_s12, %s733_s21 }
  0x11   : > { %s526_s26 = scalar_lea.hbm %s875_s1, 1536 }
  0x12   : > { %p728_p11 = pnand %p462_p9, %p877_p1  ;;  %p527_p12 = scmp.ne.s32.totalorder %s875_s1, %s526_s26 }
  0x13   : > { %p533_p5 = scmp.lt.u32.totalorder %s526_s26, %s875_s1 }
  0x14   : > { %p528_p13 = pneg %p728_p11 }
  0x16   : > { %p529_p0 = pnand %p528_p13, %p527_p12 }
  0x18   : > { %p530_p3 = pneg %p529_p0 }
  0x1a   : > { %p535_p7 = pnand %p533_p5, %p530_p3 }
  0x1c   : > { %538 = shalt.err (!%p535_p7)
}
  0x1d   : > { %s539_s3 = scalar_lea.vmem %s721_s19, 1536  ;;  %p547_p2 = scmp.lt.s32.totalorder %s721_s19, %s721_s19 }
  0x1e   : > { %p540_p9 = scmp.ne.s32.totalorder %s721_s19, %s539_s3  ;;  %p548_p6 = scmp.lt.s32.totalorder %s539_s3, %s539_s3 }
  0x20   : > { %p542_p10 = pnand %p540_p9, %p528_p13  ;;  %p549_p4 = por %p548_p6, %p547_p2 }
  0x22   : > { %p543_p1 = pneg %p542_p10 }
  0x24   : > { %p550_p8 = pnand %p549_p4, %p543_p1 }
  0x26   : > { %553 = shalt.err (!%p550_p8)
}
  0x27   : > { %s657_s4 = smov 64   ;;  %s658_s5 = smov 4  }
  0x28   : > { %465 = dma.hbm_to_vmem [thread:$0]  (!%p728_p11), %s875_s1, 1536, %s721_s19, [#allocation6], %s657_s4, %s657_s4, %s658_s5  }
  0x29   : > { %p24_p2 = scmp.eq.s32.totalorder %s23_s23, 0  ;;  %p33_p1 = scmp.ne.s32.totalorder %s650_s11, %s646_s10 }
  0x2a   : > { %p34_p4 = scmp.eq.s32.totalorder %s654_s12, 0  ;;  %p475_p6 = scmp.lt.s32.totalorder %s654_s12, 2 }
  0x2b   : > { %s764_s8 = scalar_select %p24_p2, %s650_s11, %s26_s22  }
  0x2c   : > { %p35_p8 = por %p34_p4, %p33_p1  ;;  %p884_p10 = scmp.eq.s32.totalorder %s698_s13, 1 }
  0x2d   : > { %s123_s18 = sand.u32 1, %s650_s11   ;;  %s453_s24 = sshll.u32 %s654_s12, 6 }
  0x2e   : > { %p768_p12 = por %p884_p10, %p33_p1  ;;  %s428_s25 = sshll.u32 %s123_s18, 2 }
  0x2f   : > { %s777_s27 = scalar_lea.hbm %s874_s0, %s453_s24  ;;  %s127_s19 = scalar_lea.vmem [#allocation2], %s428_s25 }
  0x30   : > { %s135_s22 = sshll.u32 %s127_s19, 4  ;;  %p779_p11 = pnand %p475_p6, %p35_p8  ;;  %s783_s22 = int_to_ptr.vmem [resolvable:$true] %s135_s22 }
  0x31   : > { %s124_s28 = scalar_lea.sflag [#allocation3], %s123_s18  ;;  %s554_s29 = scalar_lea.hbm %s777_s27, 64 }
  0x32   : > { %p555_p13 = scmp.ne.s32.totalorder %s777_s27, %s554_s29  ;;  %p556_p0 = pneg %p779_p11 }
  0x33   : > { %s559_s4 = scalar_lea.hbm %s874_s0, 128  ;;  %p560_p7 = scmp.lt.u32.totalorder %s777_s27, %s874_s0 }
  0x34   : > { %p557_p3 = pnand %p556_p0, %p555_p13  ;;  %p561_p9 = scmp.lt.u32.totalorder %s559_s4, %s554_s29 }
  0x35   : > { %p563_p1 = scmp.lt.u32.totalorder %s554_s29, %s777_s27 }
  0x36   : > { %p558_p5 = pneg %p557_p3  ;;  %p562_p2 = por %p561_p9, %p560_p7 }
  0x38   : > { %p564_p4 = por %p563_p1, %p562_p2 }
  0x3a   : > { %p565_p6 = pnand %p564_p4, %p558_p5 }
  0x3c   : > { %568 = shalt.err (!%p565_p6)
}
  0x3d   : > { %s569_s7 = scalar_lea.vmem %s783_s22, 64  ;;  %s659_s18 = smov [#allocation2]  }
  0x3e   : > { %p570_p8 = scmp.ne.s32.totalorder %s783_s22, %s569_s7  ;;  %s574_s24 = sshll.u32 %s659_s18, 4  ;;  %s575_s24 = int_to_ptr.vmem [resolvable:$false] %s574_s24 }
  0x3f   : > { %s576_s25 = scalar_lea.vmem %s575_s24, 128  ;;  %p577_p3 = scmp.lt.s32.totalorder %s783_s22, %s575_s24 }
  0x40   : > { %p572_p10 = pnand %p570_p8, %p556_p0  ;;  %p578_p7 = scmp.lt.s32.totalorder %s576_s25, %s569_s7 }
  0x42   : > { %p573_p13 = pneg %p572_p10  ;;  %p579_p9 = por %p578_p7, %p577_p3 }
  0x44   : > { %p580_p2 = pnand %p579_p9, %p573_p13 }
  0x46   : > { %583 = shalt.err (!%p580_p2)
}
  0x47   : > { %469 = dma.hbm_to_vmem [thread:$0]  (!%p779_p11), %s777_s27, 64, %s783_s22, %s124_s28  }
  0x48   : > { %p887_p5 = scmp.ne.s32.totalorder %s882_s17, 0 }
  0x49   : > { %s813_s20 = sand.u32 (!%p887_p5), 1, %s646_s10   ;;  %p888_p0 = scmp.ne.s32.totalorder (!%p887_p5), %s880_s15, 0 }
  0x4a   : > { %144 = sbr.rel (%p887_p5) target bundleno = 362 (0x16a), region = 28  ;;  %s432_s26 = sshll.u32 (!%p887_p5), %s813_s20, 2 }
  0x4b   : > { %s147_s19 = scalar_lea.sflag (!%p887_p5), [#allocation3], %s813_s20  ;;  %s150_s29 = scalar_lea.vmem (!%p887_p5), [#allocation2], %s432_s26 }
  0x51   : > { %629 = dma.done.wait (%p888_p0), %s147_s19, 64  }
  0x52   : > { %631 = vsyncadd (%p888_p0), %s147_s19, 4294967232  ;;  %p889_p1 = scmp.eq.s32.totalorder %s698_s13, 0 }
  0x54   : > { %633 = dma.done.wait (%p889_p1), [#allocation6], 1536   ;;  %p890_p11 = pmov %p889_p1 }
  0x55   : > { %v660_v0 = vmov 0   ;;  %v514_v1 = vld [vmem:[#allocation5] sm:$0xff]   ;;  %v515_v2 = vld [vmem:[#allocation5 + $0x8] sm:$0xff]   ;;  %v516_v3 = vld [vmem:[#allocation5 + $0x10] sm:$0xff]   ;;  %vm283_vm0 = vcmask 523264   ;;  %s434_s15 = sshll.u32 %s813_s20, 1 }
  0x56   : > { %635 = vsyncadd (%p890_p11), [#allocation6], 4294965760  ;;  %287 = vmatprep.subr.bf16.mxu0 %v660_v0  ;;  %v517_v4 = vld [vmem:[#allocation5 + $0x18] sm:$0xff]   ;;  %v518_v7 = vld [vmem:[#allocation5 + $0x20] sm:$0xff]   ;;  %s450_s17 = sshll.u32 %s698_s13, 5  ;;  %s174_s27 = scalar_lea.vmem [#allocation7], %s434_s15 }
  0x57   : > { %288 = vmatpush1.bf16.msra.mxu0 %v514_v1  ;;  %v435_v5 = vld.sshfl [vmem:[%s150_s29] sm:$0x33 pattern:$0x76325410]  ;;  %v519_v8 = vld [vmem:[#allocation5 + $0x28] sm:$0xff]   ;;  %v520_v9 = vld [vmem:[#allocation5 + $0x30] sm:$0xff]   ;;  %s830_s30 = scalar_lea.hbm %s876_s2, %s450_s17 }
  0x58   : > { %289 = vmatprep.subr.bf16.mxu0 %v660_v0  ;;  %v209_v6 = vcombine.high %v435_v5, %v435_v5  ;;  %v521_v10 = vld [vmem:[#allocation5 + $0x38] sm:$0xff]   ;;  %v522_v11 = vld [vmem:[#allocation5 + $0x40] sm:$0xff]   ;;  %v523_v12 = vld [vmem:[#allocation5 + $0x48] sm:$0xff]   ;;  %s344_s22 = sshll.u32 %s174_s27, 4  ;;  %vm328_vm1 = vcmask 517120   ;;  %s331_s13 = scalar_lea.sflag [#allocation4], %s813_s20  ;;  %s832_s22 = int_to_ptr.vmem [resolvable:$true] %s344_s22 }
  0x59   : > { %v524_v13 = vld [vmem:[#allocation5 + $0x50] sm:$0xff]   ;;  %v525_v14 = vld [vmem:[#allocation5 + $0x58] sm:$0xff]   ;;  %s584_s3 = scalar_lea.vmem %s832_s22, 32  ;;  %s661_s4 = smov [#allocation7]  }
  0x5a   : > { %448 = vmatprep.mubr.msk.bf16.mxu0 %vm283_vm0, %v209_v6  ;;  %p585_p4 = scmp.ne.s32.totalorder %s832_s22, %s584_s3  ;;  %s588_s5 = sshll.u32 %s661_s4, 4  ;;  %s589_s5 = int_to_ptr.vmem [resolvable:$false] %s588_s5 }
  0x5b   : > { %290 = vmatpush1.bf16.msra.mxu0 %v515_v2  ;;  %s590_s6 = scalar_lea.vmem %s589_s5, 64  ;;  %p591_p10 = scmp.lt.s32.totalorder %s832_s22, %s589_s5 }
  0x5c   : > { %291 = vmatprep.subr.bf16.mxu0 %v660_v0  ;;  %p586_p6 = pnand %p585_p4, %p768_p12  ;;  %p592_p13 = scmp.lt.s32.totalorder %s590_s6, %s584_s3 }
  0x5e   : > { %p587_p8 = pneg %p586_p6  ;;  %p593_p3 = por %p592_p13, %p591_p10 }
  0x5f   : > { %292 = vmatpush1.bf16.msra.mxu0 %v516_v3 }
  0x60   : > { %293 = vmatprep.subr.bf16.mxu0 %v660_v0  ;;  %p594_p7 = pnand %p593_p3, %p587_p8 }
  0x63   : > { %294 = vmatpush1.bf16.msra.mxu0 %v517_v4 }
  0x64   : > { %295 = vmatprep.subr.bf16.mxu0 %v660_v0 }
  0x67   : > { %296 = vmatpush1.bf16.msra.mxu0 %v518_v7 }
  0x68   : > { %297 = vmatprep.subr.bf16.mxu0 %v660_v0 }
  0x6b   : > { %298 = vmatpush1.bf16.msra.mxu0 %v519_v8 }
  0x6c   : > { %299 = vmatprep.subr.bf16.mxu0 %v660_v0 }
  0x6f   : > { %300 = vmatpush1.bf16.msra.mxu0 %v520_v9 }
  0x70   : > { %301 = vmatprep.subr.bf16.mxu0 %v660_v0 }
  0x73   : > { %302 = vmatpush1.bf16.msra.mxu0 %v521_v10 }
  0x74   : > { %303 = vmatprep.subr.bf16.mxu0 %v660_v0 }
  0x77   : > { %304 = vmatpush1.bf16.msra.mxu0 %v522_v11 }
  0x78   : > { %305 = vmatprep.subr.bf16.mxu0 %v660_v0 }
  0x7b   : > { %306 = vmatpush1.bf16.msra.mxu0 %v523_v12 }
  0x7c   : > { %307 = vmatprep.subr.bf16.mxu0 %v660_v0 }
  0x7f   : > { %308 = vmatpush1.bf16.msra.mxu0 %v524_v13 }
  0x80   : > { %309 = vmatprep.subr.bf16.mxu0 %v660_v0 }
  0x83   : > { %310 = vmatpush1.bf16.msra.mxu0 %v525_v14 }
  0x86   : > { %320 = vmatmul.mubr.bf16.vlgmr.msra.gmra.mrb[0].mxu0 %v435_v5 }
 0x159   : > { %v321_v15 = vpop.f32.mrb[0].mxu0 }
 0x15a   : > { %v327_v16 = vpack.c.bf16 %v321_v15, %v321_v15  ;;  %v323_v17 = vpop.f32.mrb[1].mxu0 }
 0x15b   : > { %v324_v18 = vpop.f32.mrb[2].mxu0 }
 0x15c   : > { %v325_v19 = vpop.f32.mrb[3].mxu0  ;;  %329 = vst.msk [vmem:[%s174_s27] sm:$0x3] %vm328_vm1, %v327_v16 }
 0x15d   : > { %597 = shalt.err (!%p594_p7)
}
 0x15e   : > { %s598_s7 = scalar_lea.hbm %s830_s30, 32  ;;  %s602_s25 = scalar_lea.hbm %s876_s2, 64 }
 0x15f   : > { %p599_p9 = scmp.ne.s32.totalorder %s830_s30, %s598_s7  ;;  %p603_p0 = scmp.lt.u32.totalorder %s830_s30, %s876_s2 }
 0x160   : > { %p604_p1 = scmp.lt.u32.totalorder %s602_s25, %s598_s7  ;;  %p606_p4 = scmp.lt.u32.totalorder %s598_s7, %s830_s30 }
 0x161   : > { %p600_p2 = pnand %p599_p9, %p768_p12 }
 0x162   : > { %p605_p11 = por %p604_p1, %p603_p0 }
 0x163   : > { %p601_p5 = pneg %p600_p2 }
 0x164   : > { %p607_p6 = por %p606_p4, %p605_p11 }
 0x166   : > { %p608_p8 = pnand %p607_p6, %p601_p5 }
 0x168   : > { %611 = shalt.err (!%p608_p8)
}
 0x169   : > { %460 = dma.vmem_to_hbm [thread:$0]  (%p768_p12), %s832_s22, 32, %s830_s30, %s331_s13  }
 0x16a PF: > { %s356_s19 = sand.u32 1, %s642_s9   ;;  %p891_p10 = scmp.ne.s32.totalorder %s881_s16, 0 }
 0x16b   : > { %p892_p13 = scmp.ge.s32.totalorder %s654_s12, 2  ;;  %s357_s29 = scalar_lea.sflag [#allocation4], %s356_s19 }
 0x16d   : > { %p471_p3 = pnand %p892_p13, %p891_p10 }
 0x16f   : > { %637 = dma.done.wait (!%p471_p3), %s357_s29, 32  }
 0x170   : > { %639 = vsyncadd (!%p471_p3), %s357_s29, 4294967264  ;;  %p16_p7 = scmp.ge.s32.totalorder %s733_s21, 4   ;;  %s893_s9 = smov %s646_s10 }
 0x171   : > { %s894_s10 = smov %s650_s11  ;;  %s895_s11 = smov %s764_s8 }
 0x172   : > { %s896_s12 = smov %s733_s21  ;;  %18 = sbr.rel (!%p16_p7) target bundleno = 6 (0x6), region = 77 }
 0x179   :  { %362 = vsyncpa [#allocation3], 1 }
 0x17a   :  { %364 = vsyncpa [#allocation3 + $0x1], 1 }
 0x17b   :  { %365 = vsyncpa [#allocation6], 1 }
 0x17c   :  { %366 = vsyncpa [#allocation4], 1 }
 0x17d   :  { %368 = vsyncpa [#allocation4 + $0x1], 1 }

// kernel: clip_classifier_forward.10
= control target key start
LH: loop header
LB: loop body
LE: loop exit
PB: predicated region body
PF: predicated region fallthrough
CT: control target
= control target key end

     0   :  { %12 = vsyncpa [#allocation3], 0  ;;  %s1638_s0 = inlined_call_operand.hbm [shape: bf16[2,5,64], index: 0, kind: input, shape index: {}]   ;;  %s1639_s1 = inlined_call_operand.hbm [shape: f32[1,64], index: 1, kind: input, shape index: {}]   ;;  %s1640_s2 = inlined_call_operand.hbm [shape: f32[1,64], index: 2, kind: input, shape index: {}]   ;;  %s1641_s3 = inlined_call_operand.hbm [shape: bf16[64,128], index: 3, kind: input, shape index: {}]   ;;  %s1642_s4 = inlined_call_operand.hbm [shape: f32[1,128], index: 4, kind: input, shape index: {}]   ;;  %s1643_s5 = inlined_call_operand.hbm [shape: bf16[128,64], index: 5, kind: input, shape index: {}]   ;;  %s1644_s6 = inlined_call_operand.hbm [shape: f32[1,64], index: 6, kind: input, shape index: {}]   ;;  %s1645_s7 = inlined_call_operand.hbm [shape: bf16[2,5,64], index: 7, kind: output, shape index: {}]  }
   0x1   :  { %14 = vsyncpa [#allocation3 + $0x1], 0 }
   0x2   :  { %15 = vsyncpa [#allocation6], 0 }
   0x3   :  { %16 = vsyncpa [#allocation9], 0 }
   0x4   :  { %17 = vsyncpa [#allocation12], 0 }
   0x5   :  { %18 = vsyncpa [#allocation4], 0 }
   0x6   :  { %20 = vsyncpa [#allocation4 + $0x1], 0  ;;  %s1308_s24 = smov 0   ;;  %s1310_s25 = smov 0  }
   0x7   :  { %s1312_s26 = smov 0   ;;  %s1314_s27 = smov 0  }
   0x8 LB: > { %s1256_s28 = smov [#allocation5]   ;;  %s1329_s30 = sadd.s32 4294967295, %s1254_s27   ;;  %s1254_s27 = sphi %s1314_s27, %s1671_s27   ;;  %s1250_s26 = sphi %s1312_s26, %s1670_s26   ;;  %s1246_s25 = sphi %s1310_s25, %s1669_s25   ;;  %s1242_s24 = sphi %s1308_s24, %s1668_s24  }
   0x9   : > { %s222_s29 = sshll.u32 %s1256_s28, 4  ;;  %p762_p0 = scmp.ge.s32.totalorder %s1254_s27, 1  ;;  %s1334_s29 = int_to_ptr.vmem [resolvable:$true] %s222_s29 }
   0xa   : > { %p1646_p1 = scmp.eq.s32.totalorder %s1329_s30, 0  ;;  %p209_p2 = scmp.lt.s32.totalorder %s1254_s27, 3 }
   0xb   : > { %s1257_s9 = smov [#allocation8]   ;;  %s1258_s12 = smov [#allocation11]  }
   0xc   : > { %p1336_p3 = pnand %p762_p0, %p209_p2  ;;  %s243_s10 = sshll.u32 %s1257_s9, 4  ;;  %s1343_s10 = int_to_ptr.vmem [resolvable:$true] %s243_s10 }
   0xd   : > { %s267_s13 = sshll.u32 %s1258_s12, 4  ;;  %s978_s16 = scalar_lea.hbm %s1639_s1, 16  ;;  %s1351_s13 = int_to_ptr.vmem [resolvable:$true] %s267_s13 }
   0xe   : > { %s1649_s8 = scalar_select %p1336_p3, 1, 0 }
   0xf   : > { %p877_p5 = pneg %p1336_p3  ;;  %p979_p7 = scmp.ne.s32.totalorder %s1639_s1, %s978_s16 }
  0x10   : > { %p985_p11 = scmp.lt.u32.totalorder %s978_s16, %s1639_s1 }
  0x11   : > { %p1347_p6 = pnand %p877_p5, %p1646_p1 }
  0x13   : > { %p1361_p8 = pneg %p1347_p6 }
  0x15   : > { %p981_p9 = pnand %p1361_p8, %p979_p7 }
  0x17   : > { %p982_p10 = pneg %p981_p9 }
  0x19   : > { %p987_p12 = pnand %p985_p11, %p982_p10 }
  0x1b   : > { %990 = shalt.err (!%p987_p12)
}
  0x1c   : > { %s991_s22 = scalar_lea.vmem %s1334_s29, 16  ;;  %s998_s23 = scalar_lea.vmem %s1334_s29, 32 }
  0x1d   : > { %p992_p13 = scmp.ne.s32.totalorder %s1334_s29, %s991_s22  ;;  %p999_p5 = scmp.lt.s32.totalorder %s1334_s29, %s1334_s29 }
  0x1e   : > { %p1000_p7 = scmp.lt.s32.totalorder %s998_s23, %s991_s22 }
  0x1f   : > { %p994_p0 = pnand %p992_p13, %p1361_p8 }
  0x20   : > { %p1001_p9 = por %p1000_p7, %p999_p5 }
  0x21   : > { %p995_p2 = pneg %p994_p0 }
  0x23   : > { %p1002_p4 = pnand %p1001_p9, %p995_p2 }
  0x25   : > { %1005 = shalt.err (!%p1002_p4)
}
  0x26   : > { %880 = dma.hbm_to_vmem [thread:$0]  (!%p1347_p6), %s1639_s1, 16, %s1334_s29, [#allocation6]  }
  0x27   : > { %s1006_s15 = scalar_lea.hbm %s1641_s3, 512 }
  0x28   : > { %p1007_p10 = scmp.ne.s32.totalorder %s1641_s3, %s1006_s15  ;;  %p1013_p4 = scmp.lt.u32.totalorder %s1006_s15, %s1641_s3 }
  0x2a   : > { %p1009_p11 = pnand %p1007_p10, %p1361_p8 }
  0x2c   : > { %p1010_p12 = pneg %p1009_p11 }
  0x2e   : > { %p1015_p13 = pnand %p1013_p4, %p1010_p12 }
  0x30   : > { %1018 = shalt.err (!%p1015_p13)
}
  0x31   : > { %s1019_s29 = scalar_lea.vmem %s1343_s10, 512  ;;  %p1027_p7 = scmp.lt.s32.totalorder %s1343_s10, %s1343_s10 }
  0x32   : > { %p1020_p0 = scmp.ne.s32.totalorder %s1343_s10, %s1019_s29  ;;  %p1028_p9 = scmp.lt.s32.totalorder %s1019_s29, %s1019_s29 }
  0x34   : > { %p1022_p2 = pnand %p1020_p0, %p1361_p8  ;;  %p1029_p10 = por %p1028_p9, %p1027_p7 }
  0x36   : > { %p1023_p5 = pneg %p1022_p2 }
  0x38   : > { %p1030_p11 = pnand %p1029_p10, %p1023_p5 }
  0x3a   : > { %1033 = shalt.err (!%p1030_p11)
}
  0x3b   : > { %s1259_s21 = smov 64   ;;  %s1260_s22 = smov 4  }
  0x3c   : > { %886 = dma.hbm_to_vmem [thread:$0]  (!%p1347_p6), %s1641_s3, 512, %s1343_s10, [#allocation9], %s1259_s21, %s1259_s21, %s1260_s22  }
  0x3d   : > { %s1034_s14 = scalar_lea.hbm %s1643_s5, 1024 }
  0x3e   : > { %p1035_p12 = scmp.ne.s32.totalorder %s1643_s5, %s1034_s14  ;;  %p1041_p0 = scmp.lt.u32.totalorder %s1034_s14, %s1643_s5 }
  0x40   : > { %p1037_p4 = pnand %p1035_p12, %p1361_p8 }
  0x42   : > { %p1038_p13 = pneg %p1037_p4 }
  0x44   : > { %p1043_p2 = pnand %p1041_p0, %p1038_p13 }
  0x46   : > { %1046 = shalt.err (!%p1043_p2)
}
  0x47   : > { %s1047_s10 = scalar_lea.vmem %s1351_s13, 1024  ;;  %p1055_p10 = scmp.lt.s32.totalorder %s1351_s13, %s1351_s13 }
  0x48   : > { %p1048_p5 = scmp.ne.s32.totalorder %s1351_s13, %s1047_s10  ;;  %p1056_p11 = scmp.lt.s32.totalorder %s1047_s10, %s1047_s10 }
  0x4a   : > { %p1050_p7 = pnand %p1048_p5, %p1361_p8  ;;  %p1057_p12 = por %p1056_p11, %p1055_p10 }
  0x4c   : > { %p1051_p9 = pneg %p1050_p7 }
  0x4e   : > { %p1058_p4 = pnand %p1057_p12, %p1051_p9 }
  0x50   : > { %1061 = shalt.err (!%p1058_p4)
}
  0x51   : > { %892 = dma.hbm_to_vmem [thread:$0]  (!%p1347_p6), %s1643_s5, 1024, %s1351_s13, [#allocation12], %s1259_s21, %s1259_s21, %s1260_s22  }
  0x52   : > { %s1261_s23 = smov [#allocation7]   ;;  %s1262_s9 = smov [#allocation10]  }
  0x53   : > { %s233_s28 = sshll.u32 %s1261_s23, 4  ;;  %s257_s12 = sshll.u32 %s1262_s9, 4  ;;  %s234_s28 = int_to_ptr.vmem [resolvable:$true] %s233_s28  ;;  %s258_s12 = int_to_ptr.vmem [resolvable:$true] %s257_s12 }
  0x54   : > { %s1062_s16 = scalar_lea.hbm %s1640_s2, 16 }
  0x55   : > { %p1063_p13 = scmp.ne.s32.totalorder %s1640_s2, %s1062_s16  ;;  %p1069_p5 = scmp.lt.u32.totalorder %s1062_s16, %s1640_s2 }
  0x57   : > { %p1065_p0 = pnand %p1063_p13, %p1361_p8 }
  0x59   : > { %p1066_p2 = pneg %p1065_p0 }
  0x5b   : > { %p1071_p7 = pnand %p1069_p5, %p1066_p2 }
  0x5d   : > { %1074 = shalt.err (!%p1071_p7)
}
  0x5e   : > { %s1075_s13 = scalar_lea.vmem %s234_s28, 16  ;;  %s1082_s21 = scalar_lea.vmem %s234_s28, 32 }
  0x5f   : > { %p1076_p9 = scmp.ne.s32.totalorder %s234_s28, %s1075_s13  ;;  %p1083_p12 = scmp.lt.s32.totalorder %s234_s28, %s234_s28 }
  0x60   : > { %p1084_p4 = scmp.lt.s32.totalorder %s1082_s21, %s1075_s13 }
  0x61   : > { %p1078_p10 = pnand %p1076_p9, %p1361_p8 }
  0x62   : > { %p1085_p1 = por %p1084_p4, %p1083_p12 }
  0x63   : > { %p1079_p11 = pneg %p1078_p10 }
  0x65   : > { %p1086_p3 = pnand %p1085_p1, %p1079_p11 }
  0x67   : > { %1089 = shalt.err (!%p1086_p3)
}
  0x68   : > { %883 = dma.hbm_to_vmem [thread:$0]  (!%p1347_p6), %s1640_s2, 16, %s234_s28, [#allocation6]  }
  0x69   : > { %s1090_s14 = scalar_lea.hbm %s1642_s4, 16 }
  0x6a   : > { %p1091_p13 = scmp.ne.s32.totalorder %s1642_s4, %s1090_s14  ;;  %p1097_p3 = scmp.lt.u32.totalorder %s1090_s14, %s1642_s4 }
  0x6c   : > { %p1093_p0 = pnand %p1091_p13, %p1361_p8 }
  0x6e   : > { %p1094_p1 = pneg %p1093_p0 }
  0x70   : > { %p1099_p2 = pnand %p1097_p3, %p1094_p1 }
  0x72   : > { %1102 = shalt.err (!%p1099_p2)
}
  0x73   : > { %s1103_s10 = scalar_lea.vmem %s258_s12, 16  ;;  %s1110_s28 = scalar_lea.vmem %s258_s12, 32 }
  0x74   : > { %p1104_p5 = scmp.ne.s32.totalorder %s258_s12, %s1103_s10  ;;  %p1111_p10 = scmp.lt.s32.totalorder %s258_s12, %s258_s12 }
  0x75   : > { %p1112_p11 = scmp.lt.s32.totalorder %s1110_s28, %s1103_s10 }
  0x76   : > { %p1106_p7 = pnand %p1104_p5, %p1361_p8 }
  0x77   : > { %p1113_p12 = por %p1112_p11, %p1111_p10 }
  0x78   : > { %p1107_p9 = pneg %p1106_p7 }
  0x7a   : > { %p1114_p4 = pnand %p1113_p12, %p1107_p9 }
  0x7c   : > { %1117 = shalt.err (!%p1114_p4)
}
  0x7d   : > { %889 = dma.hbm_to_vmem [thread:$0]  (!%p1347_p6), %s1642_s4, 16, %s258_s12, [#allocation9]  }
  0x7e   : > { %s1263_s21 = smov [#allocation13]   ;;  %s1118_s9 = scalar_lea.hbm %s1644_s6, 16 }
  0x7f   : > { %s281_s22 = sshll.u32 %s1263_s21, 4  ;;  %p1119_p13 = scmp.ne.s32.totalorder %s1644_s6, %s1118_s9  ;;  %s282_s22 = int_to_ptr.vmem [resolvable:$true] %s281_s22 }
  0x80   : > { %p1125_p3 = scmp.lt.u32.totalorder %s1118_s9, %s1644_s6 }
  0x81   : > { %p1121_p0 = pnand %p1119_p13, %p1361_p8 }
  0x83   : > { %p1122_p1 = pneg %p1121_p0 }
  0x85   : > { %p1127_p2 = pnand %p1125_p3, %p1122_p1 }
  0x87   : > { %1130 = shalt.err (!%p1127_p2)
}
  0x88   : > { %s1131_s12 = scalar_lea.vmem %s282_s22, 16  ;;  %s1138_s18 = scalar_lea.vmem %s282_s22, 32 }
  0x89   : > { %p1132_p5 = scmp.ne.s32.totalorder %s282_s22, %s1131_s12  ;;  %p1139_p10 = scmp.lt.s32.totalorder %s282_s22, %s282_s22 }
  0x8a   : > { %p1140_p11 = scmp.lt.s32.totalorder %s1138_s18, %s1131_s12 }
  0x8b   : > { %p1134_p7 = pnand %p1132_p5, %p1361_p8 }
  0x8c   : > { %p1141_p12 = por %p1140_p11, %p1139_p10 }
  0x8d   : > { %p1135_p9 = pneg %p1134_p7 }
  0x8f   : > { %p1142_p4 = pnand %p1141_p12, %p1135_p9 }
  0x91   : > { %1145 = shalt.err (!%p1142_p4)
}
  0x92   : > { %895 = dma.hbm_to_vmem [thread:$0]  (!%p1347_p6), %s1644_s6, 16, %s282_s22, [#allocation12]  }
  0x93   : > { %s761_s19 = sadd.s32 4294967294, %s1254_s27   ;;  %s1485_s11 = sadd.s32 1, %s1254_s27  }
  0x94   : > { %s30_s20 = ssub.s32 %s1254_s27, %s1485_s11  ;;  %s33_s13 = sadd.s32 1, %s1250_s26 }
  0x95   : > { %p31_p8 = scmp.eq.s32.totalorder %s30_s20, 0  ;;  %p40_p13 = scmp.ne.s32.totalorder %s1250_s26, %s1246_s25 }
  0x96   : > { %p41_p0 = scmp.eq.s32.totalorder %s1254_s27, 0  ;;  %p46_p1 = scmp.ne.s32.totalorder %s1246_s25, %s1242_s24 }
  0x97   : > { %s1496_s21 = scalar_select %p31_p8, %s1250_s26, %s33_s13  }
  0x98   : > { %p1498_p3 = por %p41_p0, %p40_p13  ;;  %p1653_p2 = scmp.eq.s32.totalorder %s1329_s30, 0 }
  0x99   : > { %p196_p5 = scmp.eq.s32.totalorder %s1329_s30, 1  ;;  %p202_p7 = scmp.eq.s32.totalorder %s761_s19, 1 }
  0x9a   : > { %p1504_p6 = por %p1653_p2, %p46_p1  ;;  %p910_p9 = scmp.lt.s32.totalorder %s1254_s27, 2 }
  0x9b   : > { %s292_s23 = sand.u32 1, %s1250_s26   ;;  %p1511_p10 = por %p196_p5, %p40_p13 }
  0x9c   : > { %p1515_p11 = por %p202_p7, %p46_p1  ;;  %s770_s15 = sshll.u32 %s292_s23, 2 }
  0x9d   : > { %s1655_s9 = scalar_select %p1511_p10, 1, 0 }
  0x9e   : > { %s1656_s14 = scalar_select %p1515_p11, 1, 0 }
  0x9f   : > { %s771_s16 = sshll.u32 %s1254_s27, 6  ;;  %s296_s10 = scalar_lea.vmem [#allocation2], %s770_s15 }
  0xa0   : > { %s1523_s18 = scalar_lea.hbm %s1638_s0, %s771_s16  ;;  %s303_s28 = sshll.u32 %s296_s10, 4  ;;  %s1525_s28 = int_to_ptr.vmem [resolvable:$true] %s303_s28 }
  0xa1   : > { %p1529_p12 = pnand %p910_p9, %p1498_p3  ;;  %s293_s20 = scalar_lea.sflag [#allocation3], %s292_s23 }
  0xa2   : > { %s1146_s13 = scalar_lea.hbm %s1523_s18, 64  ;;  %s1151_s17 = scalar_lea.hbm %s1638_s0, 128 }
  0xa3   : > { %p1147_p4 = scmp.ne.s32.totalorder %s1523_s18, %s1146_s13  ;;  %p1148_p8 = pneg %p1529_p12 }
  0xa4   : > { %p1152_p1 = scmp.lt.u32.totalorder %s1523_s18, %s1638_s0  ;;  %p1153_p3 = scmp.lt.u32.totalorder %s1151_s17, %s1146_s13 }
  0xa5   : > { %p1149_p13 = pnand %p1148_p8, %p1147_p4  ;;  %p1155_p5 = scmp.lt.u32.totalorder %s1146_s13, %s1523_s18 }
  0xa6   : > { %p1154_p2 = por %p1153_p3, %p1152_p1 }
  0xa7   : > { %p1150_p0 = pneg %p1149_p13 }
  0xa8   : > { %p1156_p7 = por %p1155_p5, %p1154_p2 }
  0xaa   : > { %p1157_p9 = pnand %p1156_p7, %p1150_p0 }
  0xac   : > { %1160 = shalt.err (!%p1157_p9)
}
  0xad   : > { %s1161_s23 = scalar_lea.vmem %s1525_s28, 64  ;;  %s1264_s10 = smov [#allocation2]  }
  0xae   : > { %p1162_p4 = scmp.ne.s32.totalorder %s1525_s28, %s1161_s23  ;;  %s1166_s15 = sshll.u32 %s1264_s10, 4  ;;  %s1167_s15 = int_to_ptr.vmem [resolvable:$false] %s1166_s15 }
  0xaf   : > { %s1168_s16 = scalar_lea.vmem %s1167_s15, 128  ;;  %p1169_p10 = scmp.lt.s32.totalorder %s1525_s28, %s1167_s15 }
  0xb0   : > { %p1164_p13 = pnand %p1162_p4, %p1148_p8  ;;  %p1170_p1 = scmp.lt.s32.totalorder %s1168_s16, %s1161_s23 }
  0xb2   : > { %p1165_p11 = pneg %p1164_p13  ;;  %p1171_p3 = por %p1170_p1, %p1169_p10 }
  0xb4   : > { %p1172_p2 = pnand %p1171_p3, %p1165_p11 }
  0xb6   : > { %1175 = shalt.err (!%p1172_p2)
}
  0xb7   : > { %899 = dma.hbm_to_vmem [thread:$0]  (!%p1529_p12), %s1523_s18, 64, %s1525_s28, %s293_s20  }
  0xb8   : > { %p1658_p0 = scmp.ne.s32.totalorder %s1649_s8, 0 }
  0xb9   : > { %s1561_s13 = sand.u32 (!%p1658_p0), 1, %s1246_s25  }
  0xba   : > { %312 = sbr.rel (%p1658_p0) target bundleno = 999 (0x3e7), region = 48  ;;  %s773_s17 = sshll.u32 (!%p1658_p0), %s1561_s13, 2 }
  0xbb   : > { %s315_s29 = scalar_lea.sflag (!%p1658_p0), [#allocation3], %s1561_s13  ;;  %s318_s12 = scalar_lea.vmem (!%p1658_p0), [#allocation2], %s773_s17 }
  0xc1   : > { %1221 = dma.done.wait (%p1504_p6), %s315_s29, 64  }
  0xc2   : > { %1223 = vsyncadd (%p1504_p6), %s315_s29, 4294967232  ;;  %p1659_p10 = scmp.eq.s32.totalorder %s1329_s30, 0 }
  0xc4   : > { %1225 = dma.done.wait (%p1659_p10), [#allocation6], 32   ;;  %p1660_p11 = pmov %p1659_p10 }
  0xc5   : > { %p1661_p12 = pmov %p1659_p10 }
  0xc6   : > { %1227 = vsyncadd (%p1660_p11), [#allocation6], 4294967264 }
  0xc7   : > { %1229 = dma.done.wait (%p1661_p12), [#allocation9], 528   ;;  %p1662_p8 = pmov %p1659_p10 }
  0xc9   : > { %1231 = vsyncadd (%p1662_p8), [#allocation9], 4294966768  ;;  %p1663_p5 = pmov %p1662_p8 }
  0xcb   : > { %1233 = dma.done.wait (%p1663_p5), [#allocation12], 1040   ;;  %p1664_p7 = pmov %p1663_p5 }
  0xcc   : > { %vm376_vm0 = vcmask 520192   ;;  %v374_v0 = vld [vmem:[%s318_s12] sm:$0x7]  ;;  %v960_v8 = vld [vmem:[#allocation8] sm:$0xff]   ;;  %v1265_v9 = vmov 0.0   ;;  %v961_v10 = vld [vmem:[#allocation8 + $0x8] sm:$0xff]  }
  0xcd   : > { %1235 = vsyncadd (%p1664_p7), [#allocation12], 4294966256  ;;  %v1583_v1 = vunpack.c.l.bf16 %v374_v0  ;;  %817 = vmatprep.subr.bf16.mxu0 %v1265_v9  ;;  %829 = vmatprep.subr.bf16.mxu1 %v1265_v9  ;;  %v962_v11 = vld [vmem:[#allocation8 + $0x10] sm:$0xff]   ;;  %v963_v12 = vld [vmem:[#allocation8 + $0x18] sm:$0xff]   ;;  %vm1266_vm1 = vmmov 0   ;;  %vm455_vm2 = vcmask 523264  }
  0xce   : > { %818 = vmatpush3.bf16.msra.mxu0 %v960_v8  ;;  %825 = vmatprep.mubr.msk.bf16.mxu0 %vm1266_vm1, %v1265_v9  ;;  %v781_v17 = vld [vmem:[#allocation5] ss:$0 sm:$0xff]  ;;  %v782_v19 = vld [vmem:[#allocation7] ss:$0 sm:$0xff]  ;;  %v964_v23 = vld [vmem:[#allocation11] sm:$0xff]   ;;  %vm614_vm3 = vcmask 518144  }
  0xcf   : > { %v377_v2 = vsel %vm376_vm0, %v1583_v1, 0.0  ;;  %819 = vmatprep.subr.bf16.mxu0 %v1265_v9  ;;  %845 = vmatprep.mubr.msk.bf16.mxu1 %vm1266_vm1, %v1265_v9  ;;  %v965_v24 = vld [vmem:[#allocation11 + $0x8] sm:$0xff]   ;;  %v966_v25 = vld [vmem:[#allocation11 + $0x10] sm:$0xff]   ;;  %v967_v26 = vld [vmem:[#allocation11 + $0x18] sm:$0xff]   ;;  %vm615_vm4 = vsmask.f32 2304 }
  0xd0   : > { %378 = vadd.xlane.f32.xlu0 %v377_v2  ;;  %830 = vmatpush3.bf16.msra.mxu1 %v964_v23  ;;  %v968_v27 = vld [vmem:[#allocation11 + $0x20] sm:$0xff]   ;;  %v969_v28 = vld [vmem:[#allocation11 + $0x28] sm:$0xff]   ;;  %v970_v29 = vld [vmem:[#allocation11 + $0x30] sm:$0xff]   ;;  %s800_s8 = sshll.u32 %s1329_s30, 6  ;;  %s372_s22 = scalar_lea.vmem [#allocation14], %s773_s17 }
  0xd1   : > { %831 = vmatprep.subr.bf16.mxu1 %v1265_v9  ;;  %v971_v30 = vld [vmem:[#allocation11 + $0x38] sm:$0xff]   ;;  %v783_v44 = vld [vmem:[#allocation13] ss:$0 sm:$0xff]  ;;  %s634_s18 = sshll.u32 %s372_s22, 4  ;;  %vm616_vm5 = vmand %vm614_vm3, %vm615_vm4  ;;  %s1594_s20 = scalar_lea.hbm %s1645_s7, %s800_s8  ;;  %s1596_s18 = int_to_ptr.vmem [resolvable:$true] %s634_s18 }
  0xd2   : > { %820 = vmatpush3.bf16.msra.mxu0 %v961_v10  ;;  %v784_v31 = vld [vmem:[#allocation10] ss:$0 sm:$0xff]  ;;  %v415_v45 = vadd.f32 %v783_v44, %v1583_v1  ;;  %v617_v49 = vld [vmem:[%s372_s22] sm:$0x7]  ;;  %s621_s30 = scalar_lea.sflag [#allocation4], %s1561_s13  ;;  %s1176_s23 = scalar_lea.vmem %s1596_s18, 64 }
  0xd3   : > { %821 = vmatprep.subr.bf16.mxu0 %v1265_v9  ;;  %p1177_p6 = scmp.ne.s32.totalorder %s1596_s18, %s1176_s23  ;;  %p1665_p9 = scmp.ne.s32.totalorder %s1655_s9, 0 }
  0xd4   : > { %832 = vmatpush3.bf16.msra.mxu1 %v965_v24  ;;  %s1267_s10 = smov [#allocation14]  }
  0xd5   : > { %833 = vmatprep.subr.bf16.mxu1 %v1265_v9  ;;  %p1178_p4 = pnand %p1177_p6, %p1665_p9  ;;  %s1180_s15 = sshll.u32 %s1267_s10, 4  ;;  %s1181_s15 = int_to_ptr.vmem [resolvable:$false] %s1180_s15 }
  0xd6   : > { %822 = vmatpush3.bf16.msra.mxu0 %v962_v11  ;;  %s1182_s16 = scalar_lea.vmem %s1181_s15, 128  ;;  %p1183_p1 = scmp.lt.s32.totalorder %s1596_s18, %s1181_s15 }
  0xd7   : > { %823 = vmatprep.subr.bf16.mxu0 %v1265_v9  ;;  %p1179_p13 = pneg %p1178_p4  ;;  %p1184_p3 = scmp.lt.s32.totalorder %s1182_s16, %s1176_s23 }
  0xd8   : > { %834 = vmatpush3.bf16.msra.mxu1 %v966_v25 }
  0xd9   : > { %835 = vmatprep.subr.bf16.mxu1 %v1265_v9  ;;  %p1185_p2 = por %p1184_p3, %p1183_p1 }
  0xda   : > { %824 = vmatpush3.bf16.msra.mxu0 %v963_v12 }
  0xdb   : > { %p1186_p0 = pnand %p1185_p2, %p1179_p13 }
  0xdc   : > { %836 = vmatpush3.bf16.msra.mxu1 %v967_v26 }
  0xdd   : > { %837 = vmatprep.subr.bf16.mxu1 %v1265_v9 }
  0xe0   : > { %838 = vmatpush3.bf16.msra.mxu1 %v968_v27 }
  0xe1   : > { %839 = vmatprep.subr.bf16.mxu1 %v1265_v9 }
  0xe4   : > { %840 = vmatpush3.bf16.msra.mxu1 %v969_v28 }
  0xe5   : > { %841 = vmatprep.subr.bf16.mxu1 %v1265_v9 }
  0xe8   : > { %842 = vmatpush3.bf16.msra.mxu1 %v970_v29 }
  0xe9   : > { %843 = vmatprep.subr.bf16.mxu1 %v1265_v9 }
  0xec   : > { %844 = vmatpush3.bf16.msra.mxu1 %v971_v30 }
 0x15d   : > { %v379_v3 = vpop.xlane.xlu0 %378 }
 0x15e   : > { %v381_v4 = vmul.f32 0.015625, %v379_v3 }
 0x160   : > { %v382_v5 = vsub.f32 %v1583_v1, %v381_v4 }
 0x162   : > { %v383_v6 = vmul.f32 %v382_v5, %v382_v5 }
 0x164   : > { %v384_v7 = vsel %vm376_vm0, %v383_v6, 0.0 }
 0x165   : > { %385 = vadd.xlane.f32.xlu0 %v384_v7 }
 0x1f2   : > { %v386_v13 = vpop.xlane.xlu0 %385 }
 0x1f3   : > { %v387_v14 = vmul.f32 0.015625, %v386_v13 }
 0x1f5   : > { %v388_v15 = vadd.f32 1e-05, %v387_v14 }
 0x1f7   : > { %972 = vrsqrt.f32 %v388_v15 }
 0x201   : > { %v973_v16 = vpop.eup %972 }
 0x202   : > { %v390_v18 = vmul.f32 %v973_v16, %v382_v5 }
 0x204   : > { %v398_v20 = vmul.f32 %v781_v17, %v390_v18 }
 0x206   : > { %v406_v21 = vadd.f32 %v782_v19, %v398_v20 }
 0x208   : > { %v407_v22 = vpack.c.bf16 %v406_v21, %v406_v21 }
 0x20a   : > { %826 = vmatmul.mubr.msk.bf16.vlgmr.msra.gmra.mrb[0].mxu0 %vm455_vm2, %v407_v22 }
 0x2dd   : > { %v493_v32 = vpop.f32.mrb[0].mxu0 }
 0x2de   : > { %v494_v33 = vadd.f32 %v784_v31, %v493_v32  ;;  %v827_v34 = vpop.f32.mrb[1].mxu0 }
 0x2df   : > { %v496_v35 = vpop.f32.mrb[2].mxu0 }
 0x2e0   : > { %v790_v36 = vmul.f32 -1.702, %v494_v33  ;;  %v828_v37 = vpop.f32.mrb[3].mxu0 }
 0x2e2   : > { %v501_v38 = vmul.f32 1.442695, %v790_v36 }
 0x2e4   : > { %974 = vpow2.f32 %v501_v38 }
 0x2ee   : > { %v975_v39 = vpop.eup %974 }
 0x2ef   : > { %v503_v40 = vadd.f32 1.0, %v975_v39 }
 0x2f1   : > { %976 = vrcp.f32 %v503_v40 }
 0x2fb   : > { %v977_v41 = vpop.eup %976 }
 0x2fc   : > { %v506_v42 = vmul.f32 %v977_v41, %v494_v33 }
 0x2fe   : > { %v507_v43 = vpack.c.bf16 %v506_v42, %v506_v42 }
 0x300   : > { %846 = vmatmul.mubr.bf16.vlgmr.msra.gmra.mrb[0].mxu1 %v507_v43 }
 0x3d3   : > { %v606_v46 = vpop.f32.mrb[0].mxu1 }
 0x3d4   : > { %v612_v47 = vadd.f32 %v606_v46, %v415_v45  ;;  %v847_v48 = vpop.f32.mrb[1].mxu1 }
 0x3d5   : > { %v609_v50 = vpop.f32.mrb[2].mxu1 }
 0x3d6   : > { %v613_v51 = vpack.c.bf16 %v612_v47, %v612_v47  ;;  %v848_v52 = vpop.f32.mrb[3].mxu1 }
 0x3d8   : > { %v618_v53 = vsel %vm616_vm5, %v613_v51, %v617_v49 }
 0x3d9   : > { %619 = vst [vmem:[%s372_s22] sm:$0x7] %v618_v53 }
 0x3da   : > { %1189 = shalt.err (!%p1186_p0)
}
 0x3db   : > { %s1190_s13 = scalar_lea.hbm %s1594_s20, 64  ;;  %s1194_s12 = scalar_lea.hbm %s1645_s7, 128 }
 0x3dc   : > { %p1191_p10 = scmp.ne.s32.totalorder %s1594_s20, %s1190_s13  ;;  %p1195_p8 = scmp.lt.u32.totalorder %s1594_s20, %s1645_s7 }
 0x3dd   : > { %p1196_p5 = scmp.lt.u32.totalorder %s1194_s12, %s1190_s13  ;;  %p1198_p6 = scmp.lt.u32.totalorder %s1190_s13, %s1594_s20 }
 0x3de   : > { %p1192_p11 = pnand %p1191_p10, %p1665_p9 }
 0x3df   : > { %p1197_p7 = por %p1196_p5, %p1195_p8 }
 0x3e0   : > { %p1193_p12 = pneg %p1192_p11 }
 0x3e1   : > { %p1199_p4 = por %p1198_p6, %p1197_p7 }
 0x3e3   : > { %p1200_p13 = pnand %p1199_p4, %p1193_p12 }
 0x3e5   : > { %1203 = shalt.err (!%p1200_p13)
}
 0x3e6   : > { %875 = dma.vmem_to_hbm [thread:$0]  (%p1665_p9), %s1596_s18, 64, %s1594_s20, %s621_s30  }
 0x3e7 PF: > { %s646_s28 = sand.u32 1, %s1242_s24   ;;  %p1666_p1 = scmp.ne.s32.totalorder %s1656_s14, 0 }
 0x3e8   : > { %p1667_p3 = scmp.ge.s32.totalorder %s1254_s27, 2  ;;  %s647_s19 = scalar_lea.sflag [#allocation4], %s646_s28 }
 0x3ea   : > { %p901_p2 = pnand %p1667_p3, %p1666_p1 }
 0x3ec   : > { %1237 = dma.done.wait (!%p901_p2), %s647_s19, 64  }
 0x3ed   : > { %1239 = vsyncadd (!%p901_p2), %s647_s19, 4294967232  ;;  %p23_p0 = scmp.ge.s32.totalorder %s1485_s11, 4   ;;  %s1668_s24 = smov %s1246_s25 }
 0x3ee   : > { %s1669_s25 = smov %s1250_s26  ;;  %s1670_s26 = smov %s1496_s21 }
 0x3ef   : > { %s1671_s27 = smov %s1485_s11  ;;  %25 = sbr.rel (!%p23_p0) target bundleno = 8 (0x8), region = 117 }
 0x3f6   :  { %652 = vsyncpa [#allocation3], 1 }
 0x3f7   :  { %654 = vsyncpa [#allocation3 + $0x1], 1 }
 0x3f8   :  { %655 = vsyncpa [#allocation6], 1 }
 0x3f9   :  { %656 = vsyncpa [#allocation9], 1 }
 0x3fa   :  { %657 = vsyncpa [#allocation12], 1 }
 0x3fb   :  { %658 = vsyncpa [#allocation4], 1 }
 0x3fc   :  { %660 = vsyncpa [#allocation4 + $0x1], 1 }

// kernel: clip_classifier_forward.9
= control target key start
LH: loop header
LB: loop body
LE: loop exit
PB: predicated region body
PF: predicated region fallthrough
CT: control target
= control target key end

     0   :  { %s2402_s0 = inlined_call_operand.hbm [shape: bf16[2,5,64], index: 0, kind: input, shape index: {}]   ;;  %s2403_s1 = inlined_call_operand.hbm [shape: f32[1,64], index: 1, kind: input, shape index: {}]   ;;  %s2404_s2 = inlined_call_operand.hbm [shape: f32[1,64], index: 2, kind: input, shape index: {}]   ;;  %s2405_s3 = inlined_call_operand.hbm [shape: bf16[64,192], index: 3, kind: input, shape index: {}]   ;;  %s2406_s4 = inlined_call_operand.hbm [shape: f32[1,192], index: 4, kind: input, shape index: {}]   ;;  %s2407_s5 = inlined_call_operand.hbm [shape: bf16[64,64], index: 5, kind: input, shape index: {}]   ;;  %s2408_s6 = inlined_call_operand.hbm [shape: f32[1,64], index: 6, kind: input, shape index: {}]   ;;  %s2409_s7 = inlined_call_operand.hbm [shape: bf16[2,5,64], index: 7, kind: output, shape index: {}]  }
   0x1   :  { %2413 = sst [smem:[#allocation20_spill]] %s2403_s1 }
   0x2   :  { %12 = vsyncpa [#allocation3], 0 }
   0x3   :  { %14 = vsyncpa [#allocation3 + $0x1], 0 }
   0x4   :  { %15 = vsyncpa [#allocation6], 0 }
   0x5   :  { %16 = vsyncpa [#allocation9], 0 }
   0x6   :  { %17 = vsyncpa [#allocation12], 0 }
   0x7   :  { %18 = vsyncpa [#allocation4], 0 }
   0x8   :  { %20 = vsyncpa [#allocation4 + $0x1], 0  ;;  %s1983_s24 = smov 0   ;;  %s1985_s25 = smov 0  }
   0x9   :  { %s1987_s26 = smov 0   ;;  %s1989_s27 = smov 0  }
   0xa LB: > { %s1920_s28 = smov [#allocation5]   ;;  %s2004_s30 = sadd.s32 4294967295, %s1918_s27   ;;  %s1918_s27 = sphi %s1989_s27, %s2437_s27   ;;  %s1914_s26 = sphi %s1987_s26, %s2436_s26   ;;  %s1910_s25 = sphi %s1985_s25, %s2435_s25   ;;  %s1906_s24 = sphi %s1983_s24, %s2434_s24  }
   0xb   : > { %s222_s29 = sshll.u32 %s1920_s28, 4  ;;  %p1329_p0 = scmp.ge.s32.totalorder %s1918_s27, 1  ;;  %s2009_s29 = int_to_ptr.vmem [resolvable:$true] %s222_s29 }
   0xc   : > { %p2410_p1 = scmp.eq.s32.totalorder %s2004_s30, 0  ;;  %p209_p2 = scmp.lt.s32.totalorder %s1918_s27, 3 }
   0xd   : > { %s1921_s9 = smov [#allocation8]   ;;  %s1922_s12 = smov [#allocation11]  }
   0xe   : > { %p2011_p3 = pnand %p1329_p0, %p209_p2  ;;  %s243_s10 = sshll.u32 %s1921_s9, 4  ;;  %s2018_s10 = int_to_ptr.vmem [resolvable:$true] %s243_s10 }
   0xf   : > { %s267_s13 = sshll.u32 %s1922_s12, 4  ;;  %s2416_s1 = sld [smem:[#allocation20_spill]]  ;;  %s2026_s13 = int_to_ptr.vmem [resolvable:$true] %s267_s13 }
  0x10   : > { %s2414_s8 = scalar_select %p2011_p3, 1, 0 }
  0x11   : > { %p1514_p5 = pneg %p2011_p3 }
  0x13   : > { %p2022_p6 = pnand %p1514_p5, %p2410_p1 }
  0x15   : > { %s1642_s16 = scalar_lea.hbm %s2416_s1, 16  ;;  %p2036_p8 = pneg %p2022_p6 }
  0x16   : > { %p1643_p7 = scmp.ne.s32.totalorder %s2416_s1, %s1642_s16  ;;  %p1649_p11 = scmp.lt.u32.totalorder %s1642_s16, %s2416_s1 }
  0x18   : > { %p1645_p9 = pnand %p2036_p8, %p1643_p7 }
  0x1a   : > { %p1646_p10 = pneg %p1645_p9 }
  0x1c   : > { %p1651_p12 = pnand %p1649_p11, %p1646_p10 }
  0x1e   : > { %1654 = shalt.err (!%p1651_p12)
}
  0x1f   : > { %s1655_s22 = scalar_lea.vmem %s2009_s29, 16  ;;  %s1662_s23 = scalar_lea.vmem %s2009_s29, 32 }
  0x20   : > { %p1656_p13 = scmp.ne.s32.totalorder %s2009_s29, %s1655_s22  ;;  %p1663_p5 = scmp.lt.s32.totalorder %s2009_s29, %s2009_s29 }
  0x21   : > { %p1664_p7 = scmp.lt.s32.totalorder %s1662_s23, %s1655_s22 }
  0x22   : > { %p1658_p0 = pnand %p1656_p13, %p2036_p8 }
  0x23   : > { %p1665_p9 = por %p1664_p7, %p1663_p5 }
  0x24   : > { %p1659_p2 = pneg %p1658_p0 }
  0x26   : > { %p1666_p4 = pnand %p1665_p9, %p1659_p2 }
  0x28   : > { %1669 = shalt.err (!%p1666_p4)
}
  0x29   : > { %1517 = dma.hbm_to_vmem [thread:$0]  (!%p2022_p6), %s2416_s1, 16, %s2009_s29, [#allocation6]  }
  0x2a   : > { %s1670_s15 = scalar_lea.hbm %s2405_s3, 1024 }
  0x2b   : > { %p1671_p10 = scmp.ne.s32.totalorder %s2405_s3, %s1670_s15  ;;  %p1677_p4 = scmp.lt.u32.totalorder %s1670_s15, %s2405_s3 }
  0x2d   : > { %p1673_p11 = pnand %p1671_p10, %p2036_p8 }
  0x2f   : > { %p1674_p12 = pneg %p1673_p11 }
  0x31   : > { %p1679_p13 = pnand %p1677_p4, %p1674_p12 }
  0x33   : > { %1682 = shalt.err (!%p1679_p13)
}
  0x34   : > { %s1683_s29 = scalar_lea.vmem %s2018_s10, 1024  ;;  %p1691_p7 = scmp.lt.s32.totalorder %s2018_s10, %s2018_s10 }
  0x35   : > { %p1684_p0 = scmp.ne.s32.totalorder %s2018_s10, %s1683_s29  ;;  %p1692_p9 = scmp.lt.s32.totalorder %s1683_s29, %s1683_s29 }
  0x37   : > { %p1686_p2 = pnand %p1684_p0, %p2036_p8  ;;  %p1693_p10 = por %p1692_p9, %p1691_p7 }
  0x39   : > { %p1687_p5 = pneg %p1686_p2 }
  0x3b   : > { %p1694_p11 = pnand %p1693_p10, %p1687_p5 }
  0x3d   : > { %1697 = shalt.err (!%p1694_p11)
}
  0x3e   : > { %s1923_s21 = smov 128   ;;  %s1924_s22 = smov 8  }
  0x3f   : > { %1523 = dma.hbm_to_vmem [thread:$0]  (!%p2022_p6), %s2405_s3, 1024, %s2018_s10, [#allocation9], %s1923_s21, %s1923_s21, %s1924_s22  }
  0x40   : > { %s1698_s14 = scalar_lea.hbm %s2407_s5, 512 }
  0x41   : > { %p1699_p12 = scmp.ne.s32.totalorder %s2407_s5, %s1698_s14  ;;  %p1705_p0 = scmp.lt.u32.totalorder %s1698_s14, %s2407_s5 }
  0x43   : > { %p1701_p4 = pnand %p1699_p12, %p2036_p8 }
  0x45   : > { %p1702_p13 = pneg %p1701_p4 }
  0x47   : > { %p1707_p2 = pnand %p1705_p0, %p1702_p13 }
  0x49   : > { %1710 = shalt.err (!%p1707_p2)
}
  0x4a   : > { %s1711_s10 = scalar_lea.vmem %s2026_s13, 512  ;;  %p1719_p10 = scmp.lt.s32.totalorder %s2026_s13, %s2026_s13 }
  0x4b   : > { %p1712_p5 = scmp.ne.s32.totalorder %s2026_s13, %s1711_s10  ;;  %p1720_p11 = scmp.lt.s32.totalorder %s1711_s10, %s1711_s10 }
  0x4d   : > { %p1714_p7 = pnand %p1712_p5, %p2036_p8  ;;  %p1721_p12 = por %p1720_p11, %p1719_p10 }
  0x4f   : > { %p1715_p9 = pneg %p1714_p7 }
  0x51   : > { %p1722_p4 = pnand %p1721_p12, %p1715_p9 }
  0x53   : > { %1725 = shalt.err (!%p1722_p4)
}
  0x54   : > { %s1925_s20 = smov 64   ;;  %s1926_s29 = smov 4  }
  0x55   : > { %1529 = dma.hbm_to_vmem [thread:$0]  (!%p2022_p6), %s2407_s5, 512, %s2026_s13, [#allocation12], %s1925_s20, %s1925_s20, %s1926_s29  }
  0x56   : > { %s1927_s23 = smov [#allocation7]   ;;  %s1928_s9 = smov [#allocation10]  }
  0x57   : > { %s233_s28 = sshll.u32 %s1927_s23, 4  ;;  %s257_s12 = sshll.u32 %s1928_s9, 4  ;;  %s234_s28 = int_to_ptr.vmem [resolvable:$true] %s233_s28  ;;  %s258_s12 = int_to_ptr.vmem [resolvable:$true] %s257_s12 }
  0x58   : > { %s1726_s16 = scalar_lea.hbm %s2404_s2, 16 }
  0x59   : > { %p1727_p13 = scmp.ne.s32.totalorder %s2404_s2, %s1726_s16  ;;  %p1733_p5 = scmp.lt.u32.totalorder %s1726_s16, %s2404_s2 }
  0x5b   : > { %p1729_p0 = pnand %p1727_p13, %p2036_p8 }
  0x5d   : > { %p1730_p2 = pneg %p1729_p0 }
  0x5f   : > { %p1735_p7 = pnand %p1733_p5, %p1730_p2 }
  0x61   : > { %1738 = shalt.err (!%p1735_p7)
}
  0x62   : > { %s1739_s13 = scalar_lea.vmem %s234_s28, 16  ;;  %s1746_s20 = scalar_lea.vmem %s234_s28, 32 }
  0x63   : > { %p1740_p9 = scmp.ne.s32.totalorder %s234_s28, %s1739_s13  ;;  %p1747_p12 = scmp.lt.s32.totalorder %s234_s28, %s234_s28 }
  0x64   : > { %p1748_p4 = scmp.lt.s32.totalorder %s1746_s20, %s1739_s13 }
  0x65   : > { %p1742_p10 = pnand %p1740_p9, %p2036_p8 }
  0x66   : > { %p1749_p1 = por %p1748_p4, %p1747_p12 }
  0x67   : > { %p1743_p11 = pneg %p1742_p10 }
  0x69   : > { %p1750_p3 = pnand %p1749_p1, %p1743_p11 }
  0x6b   : > { %1753 = shalt.err (!%p1750_p3)
}
  0x6c   : > { %1520 = dma.hbm_to_vmem [thread:$0]  (!%p2022_p6), %s2404_s2, 16, %s234_s28, [#allocation6]  }
  0x6d   : > { %s1754_s23 = scalar_lea.hbm %s2406_s4, 32 }
  0x6e   : > { %p1755_p13 = scmp.ne.s32.totalorder %s2406_s4, %s1754_s23  ;;  %p1761_p3 = scmp.lt.u32.totalorder %s1754_s23, %s2406_s4 }
  0x70   : > { %p1757_p0 = pnand %p1755_p13, %p2036_p8 }
  0x72   : > { %p1758_p1 = pneg %p1757_p0 }
  0x74   : > { %p1763_p2 = pnand %p1761_p3, %p1758_p1 }
  0x76   : > { %1766 = shalt.err (!%p1763_p2)
}
  0x77   : > { %s1767_s17 = scalar_lea.vmem %s258_s12, 32  ;;  %p1775_p10 = scmp.lt.s32.totalorder %s258_s12, %s258_s12 }
  0x78   : > { %p1768_p5 = scmp.ne.s32.totalorder %s258_s12, %s1767_s17  ;;  %p1776_p11 = scmp.lt.s32.totalorder %s1767_s17, %s1767_s17 }
  0x7a   : > { %p1770_p7 = pnand %p1768_p5, %p2036_p8  ;;  %p1777_p12 = por %p1776_p11, %p1775_p10 }
  0x7c   : > { %p1771_p9 = pneg %p1770_p7 }
  0x7e   : > { %p1778_p4 = pnand %p1777_p12, %p1771_p9 }
  0x80   : > { %1781 = shalt.err (!%p1778_p4)
}
  0x81   : > { %1526 = dma.hbm_to_vmem [thread:$0]  (!%p2022_p6), %s2406_s4, 32, %s258_s12, [#allocation9]  }
  0x82   : > { %s1929_s10 = smov [#allocation13]   ;;  %s1782_s21 = scalar_lea.hbm %s2408_s6, 16 }
  0x83   : > { %s281_s13 = sshll.u32 %s1929_s10, 4  ;;  %p1783_p13 = scmp.ne.s32.totalorder %s2408_s6, %s1782_s21  ;;  %s282_s13 = int_to_ptr.vmem [resolvable:$true] %s281_s13 }
  0x84   : > { %p1789_p3 = scmp.lt.u32.totalorder %s1782_s21, %s2408_s6 }
  0x85   : > { %p1785_p0 = pnand %p1783_p13, %p2036_p8 }
  0x87   : > { %p1786_p1 = pneg %p1785_p0 }
  0x89   : > { %p1791_p2 = pnand %p1789_p3, %p1786_p1 }
  0x8b   : > { %1794 = shalt.err (!%p1791_p2)
}
  0x8c   : > { %s1795_s12 = scalar_lea.vmem %s282_s13, 16  ;;  %s1802_s14 = scalar_lea.vmem %s282_s13, 32 }
  0x8d   : > { %p1796_p5 = scmp.ne.s32.totalorder %s282_s13, %s1795_s12  ;;  %p1803_p10 = scmp.lt.s32.totalorder %s282_s13, %s282_s13 }
  0x8e   : > { %p1804_p11 = scmp.lt.s32.totalorder %s1802_s14, %s1795_s12 }
  0x8f   : > { %p1798_p7 = pnand %p1796_p5, %p2036_p8 }
  0x90   : > { %p1805_p12 = por %p1804_p11, %p1803_p10 }
  0x91   : > { %p1799_p9 = pneg %p1798_p7 }
  0x93   : > { %p1806_p4 = pnand %p1805_p12, %p1799_p9 }
  0x95   : > { %1809 = shalt.err (!%p1806_p4)
}
  0x96   : > { %1532 = dma.hbm_to_vmem [thread:$0]  (!%p2022_p6), %s2408_s6, 16, %s282_s13, [#allocation12]  }
  0x97   : > { %s1328_s19 = sadd.s32 4294967294, %s1918_s27   ;;  %s2160_s11 = sadd.s32 1, %s1918_s27  }
  0x98   : > { %s30_s17 = ssub.s32 %s1918_s27, %s2160_s11  ;;  %s33_s28 = sadd.s32 1, %s1914_s26 }
  0x99   : > { %p31_p8 = scmp.eq.s32.totalorder %s30_s17, 0  ;;  %p40_p13 = scmp.ne.s32.totalorder %s1914_s26, %s1910_s25 }
  0x9a   : > { %p41_p0 = scmp.eq.s32.totalorder %s1918_s27, 0  ;;  %p46_p1 = scmp.ne.s32.totalorder %s1910_s25, %s1906_s24 }
  0x9b   : > { %s2171_s18 = scalar_select %p31_p8, %s1914_s26, %s33_s28  }
  0x9c   : > { %p2173_p3 = por %p41_p0, %p40_p13  ;;  %p2419_p2 = scmp.eq.s32.totalorder %s2004_s30, 0 }
  0x9d   : > { %p196_p5 = scmp.eq.s32.totalorder %s2004_s30, 1  ;;  %p202_p7 = scmp.eq.s32.totalorder %s1328_s19, 1 }
  0x9e   : > { %p2179_p6 = por %p2419_p2, %p46_p1  ;;  %p1547_p9 = scmp.lt.s32.totalorder %s1918_s27, 2 }
  0x9f   : > { %s292_s20 = sand.u32 1, %s1914_s26   ;;  %p2186_p10 = por %p196_p5, %p40_p13 }
  0xa0   : > { %p2190_p11 = por %p202_p7, %p46_p1  ;;  %s1337_s1 = sshll.u32 %s292_s20, 2 }
  0xa1   : > { %s2421_s29 = scalar_select %p2186_p10, 1, 0 }
  0xa2   : > { %s2422_s21 = scalar_select %p2190_p11, 1, 0 }
  0xa3   : > { %s1338_s22 = sshll.u32 %s1918_s27, 6  ;;  %s296_s14 = scalar_lea.vmem [#allocation2], %s1337_s1 }
  0xa4   : > { %s2198_s12 = scalar_lea.hbm %s2402_s0, %s1338_s22  ;;  %s303_s15 = sshll.u32 %s296_s14, 4  ;;  %s2200_s15 = int_to_ptr.vmem [resolvable:$true] %s303_s15 }
  0xa5   : > { %p2204_p12 = pnand %p1547_p9, %p2173_p3  ;;  %s293_s19 = scalar_lea.sflag [#allocation3], %s292_s20 }
  0xa6   : > { %s1810_s17 = scalar_lea.hbm %s2198_s12, 64  ;;  %s1815_s22 = scalar_lea.hbm %s2402_s0, 128 }
  0xa7   : > { %p1811_p4 = scmp.ne.s32.totalorder %s2198_s12, %s1810_s17  ;;  %p1812_p8 = pneg %p2204_p12 }
  0xa8   : > { %p1816_p1 = scmp.lt.u32.totalorder %s2198_s12, %s2402_s0  ;;  %p1817_p3 = scmp.lt.u32.totalorder %s1815_s22, %s1810_s17 }
  0xa9   : > { %p1813_p13 = pnand %p1812_p8, %p1811_p4  ;;  %p1819_p5 = scmp.lt.u32.totalorder %s1810_s17, %s2198_s12 }
  0xaa   : > { %p1818_p2 = por %p1817_p3, %p1816_p1 }
  0xab   : > { %p1814_p0 = pneg %p1813_p13 }
  0xac   : > { %p1820_p7 = por %p1819_p5, %p1818_p2 }
  0xae   : > { %p1821_p9 = pnand %p1820_p7, %p1814_p0 }
  0xb0   : > { %1824 = shalt.err (!%p1821_p9)
}
  0xb1   : > { %s1825_s20 = scalar_lea.vmem %s2200_s15, 64  ;;  %s1930_s9 = smov [#allocation2]  }
  0xb2   : > { %p1826_p4 = scmp.ne.s32.totalorder %s2200_s15, %s1825_s20  ;;  %s1830_s14 = sshll.u32 %s1930_s9, 4  ;;  %s1831_s14 = int_to_ptr.vmem [resolvable:$false] %s1830_s14 }
  0xb3   : > { %s1832_s28 = scalar_lea.vmem %s1831_s14, 128  ;;  %p1833_p10 = scmp.lt.s32.totalorder %s2200_s15, %s1831_s14 }
  0xb4   : > { %p1828_p13 = pnand %p1826_p4, %p1812_p8  ;;  %p1834_p1 = scmp.lt.s32.totalorder %s1832_s28, %s1825_s20 }
  0xb6   : > { %p1829_p11 = pneg %p1828_p13  ;;  %p1835_p3 = por %p1834_p1, %p1833_p10 }
  0xb8   : > { %p1836_p2 = pnand %p1835_p3, %p1829_p11 }
  0xba   : > { %1839 = shalt.err (!%p1836_p2)
}
  0xbb   : > { %1536 = dma.hbm_to_vmem [thread:$0]  (!%p2204_p12), %s2198_s12, 64, %s2200_s15, %s293_s19  }
  0xbc   : > { %p2424_p0 = scmp.ne.s32.totalorder %s2414_s8, 0 }
  0xbd   : > { %s2236_s17 = sand.u32 (!%p2424_p0), 1, %s1910_s25  }
  0xbe   : > { %312 = sbr.rel (%p2424_p0) target bundleno = 3132 (0xc3c), region = 48  ;;  %s1340_s1 = sshll.u32 (!%p2424_p0), %s2236_s17, 2 }
  0xbf   : > { %s315_s22 = scalar_lea.sflag (!%p2424_p0), [#allocation3], %s2236_s17  ;;  %s318_s10 = scalar_lea.vmem (!%p2424_p0), [#allocation2], %s1340_s1 }
  0xc5   : > { %1885 = dma.done.wait (%p2179_p6), %s315_s22, 64  }
  0xc6   : > { %1887 = vsyncadd (%p2179_p6), %s315_s22, 4294967232  ;;  %p2425_p10 = scmp.eq.s32.totalorder %s2004_s30, 0 }
  0xc8   : > { %1889 = dma.done.wait (%p2425_p10), [#allocation6], 32   ;;  %p2426_p11 = pmov %p2425_p10 }
  0xc9   : > { %p2427_p12 = pmov %p2425_p10 }
  0xca   : > { %1891 = vsyncadd (%p2426_p11), [#allocation6], 4294967264 }
  0xcb   : > { %1893 = dma.done.wait (%p2427_p12), [#allocation9], 1056   ;;  %p2428_p8 = pmov %p2425_p10 }
  0xcd   : > { %1895 = vsyncadd (%p2428_p8), [#allocation9], 4294966240  ;;  %p2429_p5 = pmov %p2428_p8 }
  0xcf   : > { %1897 = dma.done.wait (%p2429_p5), [#allocation12], 528   ;;  %p2430_p7 = pmov %p2429_p5 }
  0xd0   : > { %v374_v0 = vld [vmem:[%s318_s10] sm:$0x7]  ;;  %vm376_vm0 = vcmask 520192   ;;  %v1608_v8 = vld [vmem:[#allocation8 + $0x4] ss:$8 sps:$4 sm:$0xff]   ;;  %v1931_v12 = vmov 0   ;;  %v418_v27 = vlaneseq }
  0xd1   : > { %1899 = vsyncadd (%p2430_p7), [#allocation12], 4294966768  ;;  %v2258_v1 = vunpack.c.l.bf16 %v374_v0  ;;  %v1610_v9 = vld [vmem:[#allocation8] ss:$8 sps:$4 sm:$0xff]   ;;  %v1611_v10 = vld [vmem:[#allocation8 + $0x14] ss:$8 sps:$4 sm:$0xff]   ;;  %472 = vmatprep.subr.bf16.mxu0 %v1608_v8  ;;  %504 = vmatprep.mubr.bf16.mxu0 %v1931_v12 }
  0xd2   : > { %473 = vmatpush1.bf16.msra.mxu0 %v1610_v9  ;;  %v1613_v11 = vld [vmem:[#allocation8 + $0x10] ss:$8 sps:$4 sm:$0xff]   ;;  %v1614_v13 = vld [vmem:[#allocation8 + $0x24] ss:$8 sps:$4 sm:$0xff]   ;;  %v1616_v14 = vld [vmem:[#allocation8 + $0x20] ss:$8 sps:$4 sm:$0xff]  }
  0xd3   : > { %v377_v2 = vsel %vm376_vm0, %v2258_v1, 0.0  ;;  %474 = vmatprep.subr.bf16.mxu0 %v1611_v10  ;;  %v1617_v15 = vld [vmem:[#allocation8 + $0x34] ss:$8 sps:$4 sm:$0xff]   ;;  %v1619_v16 = vld [vmem:[#allocation8 + $0x30] ss:$8 sps:$4 sm:$0xff]   ;;  %vm468_vm1 = vcmask 523264  }
  0xd4   : > { %378 = vadd.xlane.f32.xlu0 %v377_v2  ;;  %v1348_v21 = vld [vmem:[#allocation5] ss:$0 sm:$0xff]  ;;  %v1349_v23 = vld [vmem:[#allocation7] ss:$0 sm:$0xff]  ;;  %v419_v28 = vshrl.u32 %v418_v27, 7  ;;  %v1932_v29 = vmov 0.0  }
  0xd5   : > { %1404 = vmatprep.subr.bf16.mxu1 %v1932_v29  ;;  %v416_v31 = vld [vmem:[#allocation10] sm:$0x3]  ;;  %vm1933_vm2 = vmmov 0   ;;  %s1934_s8 = smov 64   ;;  %vm526_vm3 = vcmask 130048   ;;  %vm590_vm4 = vcmask 1041408  }
  0xd6   : > { %475 = vmatpush1.bf16.msra.mxu0 %v1613_v11  ;;  %v420_v30 = vsub.s32 0, %v419_v28  ;;  %1406 = vmatprep.mubr.msk.bf16.mxu1 %vm1933_vm2, %v1932_v29  ;;  %v424_v39 = vsub.s32 1, %v419_v28  ;;  %vm591_vm5 = vcmask 1042432   ;;  %v1935_v44 = vmov 65535   ;;  %s1936_s13 = smov 96   ;;  %s1937_s12 = smov 48  }
  0xd7   : > { %476 = vmatprep.subr.bf16.mxu0 %v1614_v13  ;;  %v592_v45 = vsel %vm590_vm4, 4294967295, %v1935_v44  ;;  %vm573_vm6 = vcmask 36864   ;;  %s1938_s15 = smov 112   ;;  %s1939_s16 = smov 32   ;;  %vm586_vm7 = vcmask 39936   ;;  %v1620_v62 = vld [vmem:[#allocation11] sm:$0xff]  }
  0xd8   : > { %v421_v32 = vrot.slane %v416_v31, %v420_v30  ;;  %v425_v40 = vrot.slane %v416_v31, %v424_v39  ;;  %v2275_v47 = vsel %vm591_vm5, %v592_v45, 0  ;;  %s1940_s19 = smov 80   ;;  %s1941_s23 = smov 16   ;;  %vm1181_vm8 = vcmask 518144  }
  0xd9   : > { %vm1182_vm9 = vsmask.f32 2304  ;;  %s1377_s20 = sshll.u32 %s2004_s30, 6  ;;  %s372_s9 = scalar_lea.vmem [#allocation14], %s1340_s1 }
  0xda   : > { %477 = vmatpush1.bf16.msra.mxu0 %v1616_v14  ;;  %s1201_s14 = sshll.u32 %s372_s9, 4  ;;  %vm1183_vm10 = vmand %vm1181_vm8, %vm1182_vm9  ;;  %s2358_s10 = scalar_lea.hbm %s2409_s7, %s1377_s20  ;;  %s2360_s14 = int_to_ptr.vmem [resolvable:$true] %s1201_s14 }
  0xdb   : > { %478 = vmatprep.subr.bf16.mxu0 %v1617_v15  ;;  %s1188_s30 = scalar_lea.sflag [#allocation4], %s2236_s17  ;;  %s1840_s1 = scalar_lea.vmem %s2360_s14, 64 }
  0xdc   : > { %p1841_p6 = scmp.ne.s32.totalorder %s2360_s14, %s1840_s1  ;;  %p2431_p9 = scmp.ne.s32.totalorder %s2421_s29, 0 }
  0xde   : > { %479 = vmatpush1.bf16.msra.mxu0 %v1619_v16  ;;  %p1842_p4 = pnand %p1841_p6, %p2431_p9 }
  0xdf   : > { %1428 = vmatprep.subr.bf16.mxu0 %v1932_v29 }
  0xe0   : > { %p1843_p13 = pneg %p1842_p4 }
 0x161   : > { %v379_v3 = vpop.xlane.xlu0 %378 }
 0x162   : > { %v381_v4 = vmul.f32 0.015625, %v379_v3 }
 0x164   : > { %v382_v5 = vsub.f32 %v2258_v1, %v381_v4 }
 0x166   : > { %v383_v6 = vmul.f32 %v382_v5, %v382_v5 }
 0x168   : > { %v384_v7 = vsel %vm376_vm0, %v383_v6, 0.0 }
 0x169   : > { %385 = vadd.xlane.f32.xlu0 %v384_v7 }
 0x1f6   : > { %v386_v17 = vpop.xlane.xlu0 %385 }
 0x1f7   : > { %v387_v18 = vmul.f32 0.015625, %v386_v17 }
 0x1f9   : > { %v388_v19 = vadd.f32 1e-05, %v387_v18 }
 0x1fb   : > { %1624 = vrsqrt.f32 %v388_v19 }
 0x205   : > { %v1625_v20 = vpop.eup %1624 }
 0x206   : > { %v390_v22 = vmul.f32 %v1625_v20, %v382_v5 }
 0x208   : > { %v398_v24 = vmul.f32 %v1348_v21, %v390_v22 }
 0x20a   : > { %v406_v25 = vadd.f32 %v1349_v23, %v398_v24 }
 0x20c   : > { %v407_v26 = vpack.c.bf16 %v406_v25, %v406_v25 }
 0x20e   : > { %1358 = vmatmul.mubr.msk.bf16.vlgmr.msra.gmra.mrb[0].mxu0 %vm468_vm1, %v407_v26 }
 0x20f   : > { %1430 = vmatprep.mubr.msk.bf16.mxu0 %vm1933_vm2, %v1932_v29 }
 0x2e1   : > { %v506_v33 = vpop.f32.mrb[0].mxu0 }
 0x2e2   : > { %v507_v34 = vadd.f32 %v506_v33, %v421_v32  ;;  %v508_v35 = vpop.f32.mrb[1].mxu0 }
 0x2e3   : > { %v510_v36 = vpop.f32.mrb[2].mxu0  ;;  %v509_v41 = vadd.f32 %v508_v35, %v425_v40 }
 0x2e4   : > { %v2268_v37 = vpack.c.bf16 %v507_v34, %v507_v34  ;;  %v511_v38 = vpop.f32.mrb[3].mxu0 }
 0x2e5   : > { %v2273_v46 = vpack.c.bf16 %v509_v41, %v509_v41 }
 0x2e6   : > { %524 = vrot.lane.b32.xlu1 %v2268_v37, %s1934_s8  ;;  %s1942_s8 = smov [#allocation14]  }
 0x2e7   : > { %v595_v48 = vand.u32 %v2275_v47, %v2273_v46 }
 0x358   : > { %v525_v42 = vpop.permute.xlu1 %524 }
 0x359   : > { %v531_v43 = vsel %vm526_vm3, %v525_v42, 0 }
 0x35a   : > { %1405 = vmatpush3.bf16.xpose.msra.mxu1 %v531_v43 }
 0x35b   : > { %1410 = vmatprep.subr.bf16.mxu1 %v1932_v29 }
 0x361   : > { %1407 = vmatmul.mubr.msk.bf16.vlgmr.msra.gmra.mrb[0].mxu1 %vm526_vm3, %v2268_v37 }
 0x362   : > { %1411 = vmatpush3.bf16.msra.mxu1 %v595_v48  ;;  %1412 = vmatprep.mubr.msk.bf16.mxu1 %vm1933_vm2, %v1932_v29 }
 0x363   : > { %1416 = vmatprep.subr.bf16.mxu1 %v1932_v29 }
 0x434   : > { %v567_v49 = vpop.f32.mrb[0].mxu1 }
 0x435   : > { %v1408_v50 = vpop.f32.mrb[1].mxu1  ;;  %v574_v51 = vsel %vm573_vm6, %v567_v49, -inf }
 0x436   : > { %575 = vmax.xlane.f32.xlu1 %v574_v51  ;;  %v570_v52 = vpop.f32.mrb[2].mxu1 }
 0x437   : > { %v1409_v53 = vpop.f32.mrb[3].mxu1 }
 0x438   : > { %v1621_v53 = vld [vmem:[#allocation11 + $0x8] sm:$0xff]  }
 0x447   : > { %854 = vrot.lane.b32.xlu1 %v2268_v37, %s1936_s13 }
 0x4c3   : > { %v576_v54 = vpop.xlane.xlu1 %575 }
 0x4c4   : > { %v577_v55 = vsub.f32 %v567_v49, %v576_v54 }
 0x4c6   : > { %v578_v56 = vmul.f32 1.442695, %v577_v55 }
 0x4c7   : > { %v855_v11 = vpop.permute.xlu1 %854 }
 0x4c8   : > { %1626 = vpow2.f32 %v578_v56 }
 0x4d2   : > { %v1627_v57 = vpop.eup %1626 }
 0x4d3   : > { %v580_v58 = vsel %vm573_vm6, %v1627_v57, 0.0 }
 0x4d4   : > { %581 = vadd.xlane.f32.xlu0 %v580_v58 }
 0x4ea   : > { %692 = vrot.lane.b32.xlu0 %v2268_v37, %s1937_s12 }
 0x4ee   : > { %690 = vrot.lane.b32.xlu0 %v2268_v37, %s1938_s15 }
 0x4f2   : > { %856 = vrot.lane.b32.xlu0 %v2268_v37, %s1939_s16 }
 0x561   : > { %v582_v59 = vpop.xlane.xlu0 %581 }
 0x562   : > { %1628 = vrcp.f32 %v582_v59 }
 0x565   : > { %v693_v0 = vpop.permute.xlu0 %692 }
 0x566   : > { %v698_v7 = vsel %vm526_vm3, %v693_v0, 0  ;;  %v1622_v0 = vld [vmem:[#allocation11 + $0x10] sm:$0xff]  }
 0x569   : > { %v691_v5 = vpop.permute.xlu0 %690 }
 0x56c   : > { %v1629_v60 = vpop.eup %1628 }
 0x56d   : > { %v584_v61 = vmul.f32 %v1629_v60, %v1627_v57  ;;  %v857_v9 = vpop.permute.xlu0 %856 }
 0x56e   : > { %v862_v10 = vsel %vm526_vm3, %v857_v9, 0 }
 0x56f   : > { %v585_v63 = vpack.c.bf16 %v584_v61, %v584_v61 }
 0x571   : > { %1413 = vmatmul.mubr.msk.bf16.vlgmr.msra.gmra.mrb[4].mxu1 %vm586_vm7, %v585_v63 }
 0x572   : > { %1417 = vmatpush3.bf16.msra.mxu1 %v1620_v62  ;;  %1418 = vmatprep.mubr.msk.bf16.mxu1 %vm1933_vm2, %v1932_v29 }
 0x573   : > { %1422 = vmatprep.subr.bf16.mxu1 %v1932_v29 }
 0x644   : > { %v631_v2 = vpop.f32.mrb[4].mxu1 }
 0x645   : > { %v637_v3 = vpack.c.bf16 %v631_v2, %v631_v2  ;;  %v1414_v4 = vpop.f32.mrb[5].mxu1 }
 0x646   : > { %v634_v6 = vpop.f32.mrb[6].mxu1 }
 0x647   : > { %v1415_v8 = vpop.f32.mrb[7].mxu1  ;;  %1419 = vmatmul.mubr.msk.bf16.vlgmr.msra.gmra.mrb[8].mxu1 %vm526_vm3, %v637_v3 }
 0x648   : > { %1423 = vmatpush3.bf16.xpose.msra.mxu1 %v698_v7  ;;  %1424 = vmatprep.mubr.msk.bf16.mxu1 %vm1933_vm2, %v1932_v29 }
 0x649   : > { %1440 = vmatprep.subr.bf16.mxu1 %v1932_v29 }
 0x64f   : > { %1425 = vmatmul.mubr.msk.bf16.vlgmr.msra.gmra.mrb[12].mxu1 %vm526_vm3, %v691_v5 }
 0x650   : > { %1441 = vmatpush3.bf16.xpose.msra.mxu1 %v862_v10  ;;  %1442 = vmatprep.mubr.msk.bf16.mxu1 %vm1933_vm2, %v1932_v29 }
 0x651   : > { %1446 = vmatprep.subr.bf16.mxu1 %v1932_v29 }
 0x657   : > { %1443 = vmatmul.mubr.msk.bf16.vlgmr.msra.gmra.mrb[16].mxu1 %vm526_vm3, %v855_v11 }
 0x658   : > { %1448 = vmatprep.mubr.msk.bf16.mxu1 %vm1933_vm2, %v1932_v29 }
 0x71a   : > { %v2309_v12 = vpop.f32.mrb[8].mxu1 }
 0x71b   : > { %v1420_v13 = vpop.f32.mrb[9].mxu1 }
 0x71c   : > { %v686_v14 = vpop.f32.mrb[10].mxu1 }
 0x71d   : > { %v1421_v15 = vpop.f32.mrb[11].mxu1 }
 0x722   : > { %v734_v16 = vpop.f32.mrb[12].mxu1 }
 0x723   : > { %v1426_v17 = vpop.f32.mrb[13].mxu1  ;;  %v740_v25 = vsel %vm573_vm6, %v734_v16, -inf }
 0x724   : > { %v737_v18 = vpop.f32.mrb[14].mxu1  ;;  %v1623_v17 = vld [vmem:[#allocation11 + $0x18] sm:$0xff]  }
 0x725   : > { %v1427_v19 = vpop.f32.mrb[15].mxu1 }
 0x72a   : > { %v898_v20 = vpop.f32.mrb[16].mxu1 }
 0x72b   : > { %v1444_v21 = vpop.f32.mrb[17].mxu1  ;;  %v904_v22 = vsel %vm573_vm6, %v898_v20, -inf }
 0x72c   : > { %905 = vmax.xlane.f32.xlu0 %v904_v22  ;;  %v901_v23 = vpop.f32.mrb[18].mxu1 }
 0x72d   : > { %v1445_v24 = vpop.f32.mrb[19].mxu1 }
 0x72e   : > { %v1359_v24 = vld [vmem:[#allocation13] ss:$0 sm:$0xff] }
 0x742   : > { %916 = vrot.lane.b32.xlu0 %v2273_v46, %s1936_s13  ;;  %s1844_s13 = sshll.u32 %s1942_s8, 4  ;;  %s1845_s13 = int_to_ptr.vmem [resolvable:$false] %s1844_s13 }
 0x743   : > { %s1846_s12 = scalar_lea.vmem %s1845_s13, 128  ;;  %p1847_p1 = scmp.lt.s32.totalorder %s2360_s14, %s1845_s13 }
 0x744   : > { %p1848_p3 = scmp.lt.s32.totalorder %s1846_s12, %s1840_s1 }
 0x746   : > { %1017 = vrot.lane.b32.xlu0 %v2268_v37, %s1940_s19  ;;  %p1849_p2 = por %p1848_p3, %p1847_p1 }
 0x748   : > { %p1850_p0 = pnand %p1849_p2, %p1843_p13 }
 0x765   : > { %741 = vmax.xlane.f32.xlu0 %v740_v25  ;;  %v520_v25 = vadd.f32 %v1359_v24, %v2258_v1 }
 0x77b   : > { %753 = vrot.lane.b32.xlu0 %v2273_v46, %s1938_s15 }
 0x77f   : > { %1079 = vrot.lane.b32.xlu0 %v2273_v46, %s1940_s19 }
 0x7b9   : > { %v906_v26 = vpop.xlane.xlu0 %905 }
 0x7ba   : > { %v907_v27 = vsub.f32 %v898_v20, %v906_v26  ;;  %v689_v26 = vadd.f32 %v2309_v12, %v520_v25 }
 0x7bc   : > { %v908_v28 = vmul.f32 1.442695, %v907_v27 }
 0x7bd   : > { %v917_v30 = vpop.permute.xlu0 %916 }
 0x7be   : > { %1630 = vpow2.f32 %v908_v28  ;;  %v922_v31 = vand.u32 %v917_v30, %v2275_v47 }
 0x7c0   : > { %1447 = vmatpush3.bf16.msra.mxu1 %v922_v31 }
 0x7c1   : > { %1458 = vmatprep.subr.bf16.mxu1 %v1932_v29  ;;  %v1018_v34 = vpop.permute.xlu0 %1017 }
 0x7c8   : > { %v1631_v32 = vpop.eup %1630 }
 0x7c9   : > { %v910_v33 = vsel %vm573_vm6, %v1631_v32, 0.0 }
 0x7ca   : > { %911 = vadd.xlane.f32.xlu1 %v910_v33 }
 0x7db   : > { %1019 = vrot.lane.b32.xlu1 %v2268_v37, %s1941_s23 }
 0x7f2   : > { %v742_v35 = vpop.xlane.xlu0 %741 }
 0x7f3   : > { %v743_v36 = vsub.f32 %v734_v16, %v742_v35 }
 0x7f5   : > { %v744_v38 = vmul.f32 1.442695, %v743_v36 }
 0x7f6   : > { %v754_v39 = vpop.permute.xlu0 %753 }
 0x7f7   : > { %1632 = vpow2.f32 %v744_v38  ;;  %v759_v40 = vand.u32 %v754_v39, %v2275_v47 }
 0x7f9   : > { %1429 = vmatpush3.bf16.msra.mxu0 %v759_v40 }
 0x7fa   : > { %1434 = vmatprep.subr.bf16.mxu0 %v1932_v29  ;;  %v1080_v6 = vpop.permute.xlu0 %1079 }
 0x7fb   : > { %v1085_v8 = vand.u32 %v1080_v6, %v2275_v47 }
 0x801   : > { %v1633_v41 = vpop.eup %1632 }
 0x802   : > { %v746_v42 = vsel %vm573_vm6, %v1633_v41, 0.0 }
 0x803   : > { %747 = vadd.xlane.f32.xlu1 %v746_v42 }
 0x857   : > { %v912_v43 = vpop.xlane.xlu1 %911 }
 0x858   : > { %1634 = vrcp.f32 %v912_v43 }
 0x85b   : > { %v1020_v37 = vpop.permute.xlu1 %1019 }
 0x85c   : > { %v1025_v48 = vsel %vm526_vm3, %v1020_v37, 0 }
 0x862   : > { %v1635_v44 = vpop.eup %1634 }
 0x863   : > { %v914_v45 = vmul.f32 %v1635_v44, %v1631_v32 }
 0x865   : > { %v915_v46 = vpack.c.bf16 %v914_v45, %v914_v45 }
 0x867   : > { %1449 = vmatmul.mubr.msk.bf16.vlgmr.msra.gmra.mrb[20].mxu1 %vm586_vm7, %v915_v46 }
 0x868   : > { %1459 = vmatpush3.bf16.xpose.msra.mxu1 %v1025_v48  ;;  %1460 = vmatprep.mubr.msk.bf16.mxu1 %vm1933_vm2, %v1932_v29 }
 0x86f   : > { %1461 = vmatmul.mubr.msk.bf16.vlgmr.msra.gmra.mrb[24].mxu1 %vm526_vm3, %v1018_v34 }
 0x890   : > { %v748_v49 = vpop.xlane.xlu1 %747 }
 0x891   : > { %1636 = vrcp.f32 %v748_v49 }
 0x89b   : > { %v1637_v50 = vpop.eup %1636 }
 0x89c   : > { %v750_v51 = vmul.f32 %v1637_v50, %v1633_v41 }
 0x89e   : > { %v751_v52 = vpack.c.bf16 %v750_v51, %v750_v51 }
 0x8a0   : > { %1431 = vmatmul.mubr.msk.bf16.vlgmr.msra.gmra.mrb[4].mxu0 %vm586_vm7, %v751_v52 }
 0x8a1   : > { %1436 = vmatprep.mubr.msk.bf16.mxu0 %vm1933_vm2, %v1932_v29  ;;  %1435 = vmatpush3.bf16.msra.mxu0 %v1621_v53 }
 0x8a2   : > { %1452 = vmatprep.subr.bf16.mxu0 %v1932_v29 }
 0x93a   : > { %v958_v54 = vpop.f32.mrb[20].mxu1 }
 0x93b   : > { %v1450_v55 = vpop.f32.mrb[21].mxu1  ;;  %v964_v7 = vpack.c.bf16 %v958_v54, %v958_v54 }
 0x93c   : > { %v961_v56 = vpop.f32.mrb[22].mxu1 }
 0x93d   : > { %v1451_v57 = vpop.f32.mrb[23].mxu1 }
 0x942   : > { %v1061_v58 = vpop.f32.mrb[24].mxu1 }
 0x943   : > { %v1462_v59 = vpop.f32.mrb[25].mxu1  ;;  %v1067_v60 = vsel %vm573_vm6, %v1061_v58, -inf }
 0x944   : > { %1068 = vmax.xlane.f32.xlu1 %v1067_v60  ;;  %v1064_v61 = vpop.f32.mrb[26].mxu1 }
 0x945   : > { %v1463_v62 = vpop.f32.mrb[27].mxu1 }
 0x973   : > { %v795_v63 = vpop.f32.mrb[4].mxu0 }
 0x974   : > { %v801_v2 = vpack.c.bf16 %v795_v63, %v795_v63  ;;  %v1432_v3 = vpop.f32.mrb[5].mxu0 }
 0x975   : > { %v798_v4 = vpop.f32.mrb[6].mxu0 }
 0x976   : > { %v1433_v5 = vpop.f32.mrb[7].mxu0  ;;  %1437 = vmatmul.mubr.msk.bf16.vlgmr.msra.gmra.mrb[8].mxu0 %vm526_vm3, %v801_v2 }
 0x977   : > { %1453 = vmatpush3.bf16.msra.mxu0 %v1622_v0  ;;  %1454 = vmatprep.mubr.msk.bf16.mxu0 %vm1933_vm2, %v1932_v29 }
 0x978   : > { %1464 = vmatprep.subr.bf16.mxu0 %v1932_v29 }
 0x982   : > { %1455 = vmatmul.mubr.msk.bf16.vlgmr.msra.gmra.mrb[8].mxu0 %vm526_vm3, %v964_v7 }
 0x983   : > { %1465 = vmatpush3.bf16.msra.mxu0 %v1085_v8  ;;  %1466 = vmatprep.mubr.msk.bf16.mxu0 %vm1933_vm2, %v1932_v29 }
 0x984   : > { %1470 = vmatprep.subr.bf16.mxu0 %v1932_v29 }
 0x9d1   : > { %v1069_v9 = vpop.xlane.xlu1 %1068 }
 0x9d2   : > { %v1070_v10 = vsub.f32 %v1061_v58, %v1069_v9 }
 0x9d4   : > { %v1071_v11 = vmul.f32 1.442695, %v1070_v10 }
 0x9d6   : > { %1638 = vpow2.f32 %v1071_v11 }
 0x9e0   : > { %v1639_v13 = vpop.eup %1638 }
 0x9e1   : > { %v1073_v14 = vsel %vm573_vm6, %v1639_v13, 0.0 }
 0x9e2   : > { %1074 = vadd.xlane.f32.xlu1 %v1073_v14 }
 0xa6f   : > { %v1075_v15 = vpop.xlane.xlu1 %1074 }
 0xa70   : > { %1640 = vrcp.f32 %v1075_v15 }
 0xa7a   : > { %v1641_v16 = vpop.eup %1640 }
 0xa7b   : > { %v1077_v47 = vmul.f32 %v1641_v16, %v1639_v13 }
 0xa7d   : > { %v1078_v18 = vpack.c.bf16 %v1077_v47, %v1077_v47 }
 0xa7f   : > { %1467 = vmatmul.mubr.msk.bf16.vlgmr.msra.gmra.mrb[12].mxu0 %vm586_vm7, %v1078_v18 }
 0xa80   : > { %1471 = vmatpush3.bf16.msra.mxu0 %v1623_v17  ;;  %1472 = vmatprep.mubr.msk.bf16.mxu0 %vm1933_vm2, %v1932_v29  ;;  %v1184_v29 = vld [vmem:[%s372_s9] sm:$0x7] }
 0xb52   : > { %v1121_v19 = vpop.f32.mrb[12].mxu0 }
 0xb53   : > { %v1127_v20 = vpack.c.bf16 %v1121_v19, %v1121_v19  ;;  %v1468_v21 = vpop.f32.mrb[13].mxu0 }
 0xb54   : > { %v1124_v22 = vpop.f32.mrb[14].mxu0 }
 0xb55   : > { %v1469_v23 = vpop.f32.mrb[15].mxu0  ;;  %1473 = vmatmul.mubr.msk.bf16.vlgmr.msra.gmra.mrb[8].mxu0 %vm526_vm3, %v1127_v20 }
 0xc28   : > { %v1173_v27 = vpop.f32.mrb[8].mxu0 }
 0xc29   : > { %v1477_v28 = vadd.f32 %v1173_v27, %v689_v26  ;;  %v1474_v30 = vpop.f32.mrb[9].mxu0 }
 0xc2a   : > { %v1176_v31 = vpop.f32.mrb[10].mxu0 }
 0xc2b   : > { %v1180_v32 = vpack.c.bf16 %v1477_v28, %v1477_v28  ;;  %v1475_v33 = vpop.f32.mrb[11].mxu0 }
 0xc2d   : > { %v1185_v1 = vsel %vm1183_vm10, %v1180_v32, %v1184_v29 }
 0xc2e   : > { %1186 = vst [vmem:[%s372_s9] sm:$0x7] %v1185_v1 }
 0xc2f   : > { %1853 = shalt.err (!%p1850_p0)
}
 0xc30   : > { %s1854_s17 = scalar_lea.hbm %s2358_s10, 64  ;;  %s1858_s19 = scalar_lea.hbm %s2409_s7, 128 }
 0xc31   : > { %p1855_p10 = scmp.ne.s32.totalorder %s2358_s10, %s1854_s17  ;;  %p1859_p8 = scmp.lt.u32.totalorder %s2358_s10, %s2409_s7 }
 0xc32   : > { %p1860_p5 = scmp.lt.u32.totalorder %s1858_s19, %s1854_s17  ;;  %p1862_p6 = scmp.lt.u32.totalorder %s1854_s17, %s2358_s10 }
 0xc33   : > { %p1856_p11 = pnand %p1855_p10, %p2431_p9 }
 0xc34   : > { %p1861_p7 = por %p1860_p5, %p1859_p8 }
 0xc35   : > { %p1857_p12 = pneg %p1856_p11 }
 0xc36   : > { %p1863_p4 = por %p1862_p6, %p1861_p7 }
 0xc38   : > { %p1864_p13 = pnand %p1863_p4, %p1857_p12 }
 0xc3a   : > { %1867 = shalt.err (!%p1864_p13)
}
 0xc3b   : > { %1512 = dma.vmem_to_hbm [thread:$0]  (%p2431_p9), %s2360_s14, 64, %s2358_s10, %s1188_s30  }
 0xc3c PF: > { %s1213_s9 = sand.u32 1, %s1906_s24   ;;  %p2432_p1 = scmp.ne.s32.totalorder %s2422_s21, 0 }
 0xc3d   : > { %p2433_p3 = scmp.ge.s32.totalorder %s1918_s27, 2  ;;  %s1214_s28 = scalar_lea.sflag [#allocation4], %s1213_s9 }
 0xc3f   : > { %p1538_p2 = pnand %p2433_p3, %p2432_p1 }
 0xc41   : > { %1901 = dma.done.wait (!%p1538_p2), %s1214_s28, 64  }
 0xc42   : > { %1903 = vsyncadd (!%p1538_p2), %s1214_s28, 4294967232  ;;  %p23_p0 = scmp.ge.s32.totalorder %s2160_s11, 4   ;;  %s2434_s24 = smov %s1910_s25 }
 0xc43   : > { %s2435_s25 = smov %s1914_s26  ;;  %s2436_s26 = smov %s2171_s18 }
 0xc44   : > { %s2437_s27 = smov %s2160_s11  ;;  %25 = sbr.rel (!%p23_p0) target bundleno = 10 (0xa), region = 117 }
 0xc4b   :  { %1219 = vsyncpa [#allocation3], 1 }
 0xc4c   :  { %1221 = vsyncpa [#allocation3 + $0x1], 1 }
 0xc4d   :  { %1222 = vsyncpa [#allocation6], 1 }
 0xc4e   :  { %1223 = vsyncpa [#allocation9], 1 }
 0xc4f   :  { %1224 = vsyncpa [#allocation12], 1 }
 0xc50   :  { %1225 = vsyncpa [#allocation4], 1 }
 0xc51   :  { %1227 = vsyncpa [#allocation4 + $0x1], 1 }

// kernel: clip_classifier_forward.13
= control target key start
LH: loop header
LB: loop body
LE: loop exit
PB: predicated region body
PF: predicated region fallthrough
CT: control target
= control target key end

     0   :  { %10 = vsyncpa [#allocation3], 0  ;;  %s517_s0 = inlined_call_operand.hbm [shape: bf16[2,64], index: 0, kind: input, shape index: {}]   ;;  %s518_s1 = inlined_call_operand.hbm [shape: f32[1,64], index: 1, kind: input, shape index: {}]   ;;  %s519_s2 = inlined_call_operand.hbm [shape: f32[1,64], index: 2, kind: input, shape index: {}]   ;;  %s520_s3 = inlined_call_operand.hbm [shape: bf16[64,128], index: 3, kind: input, shape index: {}]   ;;  %s521_s4 = inlined_call_operand.hbm [shape: f32[1,128], index: 4, kind: input, shape index: {}]   ;;  %s522_s5 = inlined_call_operand.hbm [shape: f32[2,128], index: 5, kind: output, shape index: {}]  }
   0x1   :  { %11 = vsyncpa [#allocation6], 0 }
   0x2   :  { %12 = vsyncpa [#allocation9], 0 }
   0x3   :  { %13 = vsyncpa [#allocation4], 0  ;;  %s398_s18 = smov [#allocation5]   ;;  %s399_s20 = smov [#allocation8]  }
   0x4   :  { %s30_s19 = sshll.u32 %s398_s18, 4  ;;  %s49_s21 = sshll.u32 %s399_s20, 4  ;;  %s31_s19 = int_to_ptr.vmem [resolvable:$true] %s30_s19  ;;  %s438_s21 = int_to_ptr.vmem [resolvable:$true] %s49_s21 }
   0x5   :  { %s258_s24 = scalar_lea.hbm %s518_s1, 16 }
   0x6   :  { %p259_p0 = scmp.ne.s32.totalorder %s518_s1, %s258_s24  ;;  %p262_p1 = scmp.lt.u32.totalorder %s258_s24, %s518_s1 }
   0x8   :  { %p264_p2 = pnand %p262_p1, %p259_p0 }
   0xa   :  { %267 = shalt.err (!%p264_p2)
}
   0xb   :  { %s268_s29 = scalar_lea.vmem %s31_s19, 16  ;;  %s272_s30 = scalar_lea.vmem %s31_s19, 32 }
   0xc   :  { %p269_p3 = scmp.ne.s32.totalorder %s31_s19, %s268_s29  ;;  %p273_p4 = scmp.lt.s32.totalorder %s31_s19, %s31_s19 }
   0xd   :  { %p274_p5 = scmp.lt.s32.totalorder %s272_s30, %s268_s29 }
   0xf   :  { %p275_p6 = por %p274_p5, %p273_p4 }
  0x11   :  { %p276_p7 = pnand %p275_p6, %p269_p3 }
  0x13   :  { %279 = shalt.err (!%p276_p7)
}
  0x14   :  { %33 = dma.hbm_to_vmem [thread:$0]  %s518_s1, 16, %s31_s19, [#allocation6]  }
  0x15   :  { %s280_s10 = scalar_lea.hbm %s520_s3, 512 }
  0x16   :  { %p281_p8 = scmp.ne.s32.totalorder %s520_s3, %s280_s10  ;;  %p284_p9 = scmp.lt.u32.totalorder %s280_s10, %s520_s3 }
  0x18   :  { %p286_p10 = pnand %p284_p9, %p281_p8 }
  0x1a   :  { %289 = shalt.err (!%p286_p10)
}
  0x1b   :  { %s290_s15 = scalar_lea.vmem %s438_s21, 512  ;;  %p295_p12 = scmp.lt.s32.totalorder %s438_s21, %s438_s21 }
  0x1c   :  { %p291_p11 = scmp.ne.s32.totalorder %s438_s21, %s290_s15  ;;  %p296_p13 = scmp.lt.s32.totalorder %s290_s15, %s290_s15 }
  0x1e   :  { %p297_p0 = por %p296_p13, %p295_p12 }
  0x20   :  { %p298_p1 = pnand %p297_p0, %p291_p11 }
  0x22   :  { %301 = shalt.err (!%p298_p1)
}
  0x23   :  { %s400_s1 = smov 64   ;;  %s401_s16 = smov 4  }
  0x24   :  { %55 = dma.hbm_to_vmem [thread:$0]  %s520_s3, 512, %s438_s21, [#allocation9], %s400_s1, %s400_s1, %s401_s16  }
  0x25   :  { %s402_s19 = smov [#allocation2]   ;;  %s403_s22 = smov [#allocation7]  }
  0x26   :  { %s20_s20 = sshll.u32 %s402_s19, 4  ;;  %s40_s23 = sshll.u32 %s403_s22, 4  ;;  %s21_s20 = int_to_ptr.vmem [resolvable:$true] %s20_s20  ;;  %s41_s23 = int_to_ptr.vmem [resolvable:$true] %s40_s23 }
  0x27   :  { %s302_s26 = scalar_lea.hbm %s517_s0, 16 }
  0x28   :  { %p303_p2 = scmp.ne.s32.totalorder %s517_s0, %s302_s26  ;;  %p306_p3 = scmp.lt.u32.totalorder %s302_s26, %s517_s0 }
  0x2a   :  { %p308_p4 = pnand %p306_p3, %p303_p2 }
  0x2c   :  { %311 = shalt.err (!%p308_p4)
}
  0x2d   :  { %s312_s3 = scalar_lea.vmem %s21_s20, 16  ;;  %s316_s21 = scalar_lea.vmem %s21_s20, 32 }
  0x2e   :  { %p313_p5 = scmp.ne.s32.totalorder %s21_s20, %s312_s3  ;;  %p317_p6 = scmp.lt.s32.totalorder %s21_s20, %s21_s20 }
  0x2f   :  { %p318_p7 = scmp.lt.s32.totalorder %s316_s21, %s312_s3 }
  0x31   :  { %p319_p8 = por %p318_p7, %p317_p6 }
  0x33   :  { %p320_p9 = pnand %p319_p8, %p313_p5 }
  0x35   :  { %323 = shalt.err (!%p320_p9)
}
  0x36   :  { %23 = dma.hbm_to_vmem [thread:$0]  %s517_s0, 16, %s21_s20, [#allocation3]  }
  0x37   :  { %s324_s10 = scalar_lea.hbm %s519_s2, 16 }
  0x38   :  { %p325_p10 = scmp.ne.s32.totalorder %s519_s2, %s324_s10  ;;  %p328_p11 = scmp.lt.u32.totalorder %s324_s10, %s519_s2 }
  0x3a   :  { %p330_p12 = pnand %p328_p11, %p325_p10 }
  0x3c   :  { %333 = shalt.err (!%p330_p12)
}
  0x3d   :  { %s334_s15 = scalar_lea.vmem %s41_s23, 16  ;;  %s338_s1 = scalar_lea.vmem %s41_s23, 32 }
  0x3e   :  { %p335_p13 = scmp.ne.s32.totalorder %s41_s23, %s334_s15  ;;  %p339_p0 = scmp.lt.s32.totalorder %s41_s23, %s41_s23 }
  0x3f   :  { %p340_p1 = scmp.lt.s32.totalorder %s338_s1, %s334_s15 }
  0x41   :  { %p341_p2 = por %p340_p1, %p339_p0 }
  0x43   :  { %p342_p3 = pnand %p341_p2, %p335_p13 }
  0x45   :  { %345 = shalt.err (!%p342_p3)
}
  0x46   :  { %43 = dma.hbm_to_vmem [thread:$0]  %s519_s2, 16, %s41_s23, [#allocation6]  }
  0x47   :  { %s404_s17 = smov [#allocation10]   ;;  %s346_s22 = scalar_lea.hbm %s521_s4, 16 }
  0x48   :  { %s62_s18 = sshll.u32 %s404_s17, 4  ;;  %p347_p4 = scmp.ne.s32.totalorder %s521_s4, %s346_s22  ;;  %s63_s18 = int_to_ptr.vmem [resolvable:$true] %s62_s18 }
  0x49   :  { %p350_p5 = scmp.lt.u32.totalorder %s346_s22, %s521_s4 }
  0x4b   :  { %p352_p6 = pnand %p350_p5, %p347_p4 }
  0x4d   :  { %355 = shalt.err (!%p352_p6)
}
  0x4e   :  { %s356_s28 = scalar_lea.vmem %s63_s18, 16  ;;  %s360_s2 = scalar_lea.vmem %s63_s18, 32 }
  0x4f   :  { %p357_p7 = scmp.ne.s32.totalorder %s63_s18, %s356_s28  ;;  %p361_p8 = scmp.lt.s32.totalorder %s63_s18, %s63_s18 }
  0x50   :  { %p362_p9 = scmp.lt.s32.totalorder %s360_s2, %s356_s28 }
  0x52   :  { %p363_p10 = por %p362_p9, %p361_p8 }
  0x54   :  { %p364_p11 = pnand %p363_p10, %p357_p7 }
  0x56   :  { %367 = shalt.err (!%p364_p11)
}
  0x57   :  { %65 = dma.hbm_to_vmem [thread:$0]  %s521_s4, 16, %s63_s18, [#allocation9]  }
  0x58   :  { %390 = dma.done.wait [#allocation3], 16  }
  0x59   :  { %391 = vsyncadd [#allocation3], 4294967280 }
  0x5a   :  { %392 = dma.done.wait [#allocation6], 32  }
  0x5b   :  { %393 = vsyncadd [#allocation6], 4294967264 }
  0x5c   :  { %394 = dma.done.wait [#allocation9], 528  }
  0x5d   :  { %395 = vsyncadd [#allocation9], 4294966768  ;;  %vm84_vm0 = vcmask 517120   ;;  %v82_v0 = vld [vmem:[#allocation2] sm:$0x1]  ;;  %v252_v8 = vld [vmem:[#allocation8] sm:$0xff]  }
  0x5e   :  { %v83_v1 = vunpack.c.l.bf16 %v82_v0  ;;  %v405_v9 = vmov 0.0   ;;  %v253_v10 = vld [vmem:[#allocation8 + $0x8] sm:$0xff]   ;;  %v254_v11 = vld [vmem:[#allocation8 + $0x10] sm:$0xff]   ;;  %v255_v12 = vld [vmem:[#allocation8 + $0x18] sm:$0xff]   ;;  %vm406_vm1 = vmmov 0   ;;  %vm155_vm2 = vcmask 523264  }
  0x5f   :  { %230 = vmatprep.subr.bf16.mxu0 %v405_v9  ;;  %238 = vmatprep.mubr.msk.bf16.mxu0 %vm406_vm1, %v405_v9  ;;  %v217_v17 = vld [vmem:[#allocation5] ss:$0 sm:$0xff]  ;;  %v218_v19 = vld [vmem:[#allocation7] ss:$0 sm:$0xff]  ;;  %v219_v23 = vld [vmem:[#allocation10] ss:$0 sm:$0xff] }
  0x60   :  { %v85_v2 = vsel %vm84_vm0, %v83_v1, 0.0  ;;  %231 = vmatpush3.bf16.msra.mxu0 %v252_v8  ;;  %s407_s4 = smov [#allocation11]  }
  0x61   :  { %86 = vadd.xlane.f32.xlu0 %v85_v2  ;;  %232 = vmatprep.subr.bf16.mxu0 %v405_v9  ;;  %s206_s30 = sshll.u32 %s407_s4, 4  ;;  %s207_s30 = int_to_ptr.vmem [resolvable:$true] %s206_s30 }
  0x62   :  { %s368_s3 = scalar_lea.vmem %s207_s30, 32  ;;  %p373_p13 = scmp.lt.s32.totalorder %s207_s30, %s207_s30 }
  0x63   :  { %p369_p12 = scmp.ne.s32.totalorder %s207_s30, %s368_s3  ;;  %p374_p0 = scmp.lt.s32.totalorder %s368_s3, %s368_s3 }
  0x64   :  { %233 = vmatpush3.bf16.msra.mxu0 %v253_v10 }
  0x65   :  { %234 = vmatprep.subr.bf16.mxu0 %v405_v9  ;;  %p375_p1 = por %p374_p0, %p373_p13 }
  0x67   :  { %p376_p2 = pnand %p375_p1, %p369_p12 }
  0x68   :  { %235 = vmatpush3.bf16.msra.mxu0 %v254_v11 }
  0x69   :  { %236 = vmatprep.subr.bf16.mxu0 %v405_v9 }
  0x6c   :  { %237 = vmatpush3.bf16.msra.mxu0 %v255_v12 }
  0xee   :  { %v87_v3 = vpop.xlane.xlu0 %86 }
  0xef   :  { %v89_v4 = vmul.f32 0.015625, %v87_v3 }
  0xf1   :  { %v90_v5 = vsub.f32 %v83_v1, %v89_v4 }
  0xf3   :  { %v91_v6 = vmul.f32 %v90_v5, %v90_v5 }
  0xf5   :  { %v92_v7 = vsel %vm84_vm0, %v91_v6, 0.0 }
  0xf6   :  { %93 = vadd.xlane.f32.xlu0 %v92_v7 }
 0x183   :  { %v94_v13 = vpop.xlane.xlu0 %93 }
 0x184   :  { %v95_v14 = vmul.f32 0.015625, %v94_v13 }
 0x186   :  { %v96_v15 = vadd.f32 1e-05, %v95_v14 }
 0x188   :  { %256 = vrsqrt.f32 %v96_v15 }
 0x192   :  { %v257_v16 = vpop.eup %256 }
 0x193   :  { %v98_v18 = vmul.f32 %v257_v16, %v90_v5 }
 0x195   :  { %v106_v20 = vmul.f32 %v217_v17, %v98_v18 }
 0x197   :  { %v114_v21 = vadd.f32 %v218_v19, %v106_v20 }
 0x199   :  { %v115_v22 = vpack.c.bf16 %v114_v21, %v114_v21 }
 0x19b   :  { %239 = vmatmul.mubr.msk.bf16.vlgmr.msra.gmra.mrb[0].mxu0 %vm155_vm2, %v115_v22 }
 0x26e   :  { %v193_v24 = vpop.f32.mrb[0].mxu0 }
 0x26f   :  { %v194_v25 = vadd.f32 %v219_v23, %v193_v24  ;;  %v240_v26 = vpop.f32.mrb[1].mxu0 }
 0x270   :  { %v196_v27 = vpop.f32.mrb[2].mxu0 }
 0x271   :  { %199 = vst [vmem:[#allocation11] sm:$0x3] %v194_v25  ;;  %v241_v28 = vpop.f32.mrb[3].mxu0 }
 0x272   :  { %379 = shalt.err (!%p376_p2)
}
 0x273   :  { %s380_s7 = scalar_lea.hbm %s522_s5, 32 }
 0x274   :  { %p381_p3 = scmp.ne.s32.totalorder %s522_s5, %s380_s7  ;;  %p384_p4 = scmp.lt.u32.totalorder %s380_s7, %s522_s5 }
 0x276   :  { %p386_p5 = pnand %p384_p4, %p381_p3 }
 0x278   :  { %389 = shalt.err (!%p386_p5)
}
 0x279   :  { %209 = dma.vmem_to_hbm [thread:$0]  %s207_s30, 32, %s522_s5, [#allocation4]  }
 0x27a   :  { %396 = dma.done.wait [#allocation4], 32  }
 0x27b   :  { %397 = vsyncadd [#allocation4], 4294967264 }
 0x27c   :  { %213 = vsyncpa [#allocation3], 1 }
 0x27d   :  { %214 = vsyncpa [#allocation6], 1 }
 0x27e   :  { %215 = vsyncpa [#allocation9], 1 }
 0x27f   :  { %216 = vsyncpa [#allocation4], 1 }

</bundles_post_ra>
